<compile_context>
chip_gen: v6e
topology: v6e:2x2x1
jax: 0.10.0
libtpu: 0.0.40
codegen_flags: <defaults>
</compile_context>

<pallas_src>
import functools
import math

import jax
import jax.numpy as jnp
from jax.experimental import pallas as pl
from jax.experimental.pallas import tpu as pltpu

_CompilerParams = getattr(pltpu, "CompilerParams",
                          getattr(pltpu, "TPUCompilerParams", None))

# ----------------------------------------------------------------------------
# VMEM budget / tile caps
# ----------------------------------------------------------------------------
try:
    _VMEM_PHYS = int(pltpu.get_tpu_info().vmem_capacity_bytes)
except Exception:  # pragma: no cover - conservative fallback (v7x-safe)
    _VMEM_PHYS = 64 * 1024 * 1024
_VMEM_LIMIT = int(min(_VMEM_PHYS * 3 // 4, 96 * 1024 * 1024))

# Max tile sizes: worst-case double-buffered working set (x, w, bias, residual,
# f32 accumulator, out) is ~22 MiB, comfortably inside v7x's 64 MiB VMEM.
_TM_MAX = 512
_TN_MAX = 2048
_TK_MAX = 1024


def _round_up(x, m):
    return (x + m - 1) // m * m


def _choose_tm(m, cap=_TM_MAX):
    """Row tile: multiple of 8, balanced so padding waste stays < 8 rows/tile."""
    nt = -(-m // cap)
    tm = _round_up(-(-m // nt), 8)
    return tm, nt * tm


def _largest_divisor_tile(size, cap, unit=128):
    """Largest multiple of `unit` that divides `size` (itself a multiple of
    unit) and is <= cap.  Guarantees no extra padding of pre-padded weights."""
    t = (min(cap, size) // unit) * unit
    while t > unit and size % t:
        t -= unit
    return max(t, unit)


def _pad_cast(a, shape, dtype):
    """Zero-pad + cast; statically skipped when already matching."""
    if tuple(a.shape) == tuple(shape) and a.dtype == dtype:
        return a
    out = jnp.zeros(shape, dtype)
    return out.at[tuple(slice(0, s) for s in a.shape)].set(a.astype(dtype))


# ----------------------------------------------------------------------------
# Matmul kernels:  o = act(x @ w + b) [+ residual]
# ----------------------------------------------------------------------------
def _matmul_epilogue(y, b, r_ref, activation):
    y = y + b
    if activation == "gelu":
        # TODO(synk): PyTorch nn.GELU default is the exact erf form; tanh approx used here.
        y = jax.nn.gelu(y, approximate=True)
    if r_ref is not None:
        y = y + r_ref[...].astype(jnp.float32)
    return y


def _matmul_single_kernel(*refs, activation, has_residual):
    # K fits in one block: no accumulator scratch, 2-D (i, j) grid.
    if has_residual:
        x_ref, w_ref, b_ref, r_ref, o_ref = refs
    else:
        x_ref, w_ref, b_ref, o_ref = refs
        r_ref = None
    y = jnp.dot(x_ref[...], w_ref[...], preferred_element_type=jnp.float32)
    o_ref[...] = _matmul_epilogue(y, b_ref[...], r_ref, activation).astype(o_ref.dtype)


def _matmul_kloop_kernel(*refs, activation, has_residual, n_k):
    if has_residual:
        x_ref, w_ref, b_ref, r_ref, o_ref, acc_ref = refs
    else:
        x_ref, w_ref, b_ref, o_ref, acc_ref = refs
        r_ref = None

    @pl.when(pl.program_id(2) == 0)
    def _():
        acc_ref[...] = jnp.zeros_like(acc_ref)

    acc_ref[...] += jnp.dot(x_ref[...], w_ref[...],
                            preferred_element_type=jnp.float32)

    @pl.when(pl.program_id(2) == n_k - 1)
    def _():
        o_ref[...] = _matmul_epilogue(acc_ref[...], b_ref[...], r_ref,
                                      activation).astype(o_ref.dtype)


def linear(x, w, b, n_out, activation=None, residual=None, out_dtype=jnp.bfloat16):
    """x: (..., K) @ pre-padded bf16 w: (Kp, Np) + pre-padded f32 b: (1, Np).
    Optional residual fused into the epilogue; output sliced to (..., n_out)."""
    Kp, Np = w.shape
    *lead, K = x.shape
    x2 = x.reshape(-1, K)
    M = x2.shape[0]

    tm, Mp = _choose_tm(M)
    tk = _largest_divisor_tile(Kp, _TK_MAX)
    tn = _largest_divisor_tile(Np, _TN_MAX)
    n_k = Kp // tk

    xp = _pad_cast(x2, (Mp, Kp), jnp.bfloat16)
    has_residual = residual is not None
    operands = [xp, w, b]
    if has_residual:
        operands.append(_pad_cast(residual.reshape(-1, n_out), (Mp, Np),
                                  jnp.bfloat16))

    if n_k == 1:
        in_specs = [pl.BlockSpec((tm, Kp), lambda i, j: (i, 0)),
                    pl.BlockSpec((Kp, tn), lambda i, j: (0, j)),
                    pl.BlockSpec((1, tn), lambda i, j: (0, j))]
        if has_residual:
            in_specs.append(pl.BlockSpec((tm, tn), lambda i, j: (i, j)))
        out = pl.pallas_call(
            functools.partial(_matmul_single_kernel, activation=activation,
                              has_residual=has_residual),
            grid=(Mp // tm, Np // tn),
            in_specs=in_specs,
            out_specs=pl.BlockSpec((tm, tn), lambda i, j: (i, j)),
            out_shape=jax.ShapeDtypeStruct((Mp, Np), out_dtype),
            compiler_params=_CompilerParams(
                dimension_semantics=("parallel", "parallel"),
                vmem_limit_bytes=_VMEM_LIMIT),
        )(*operands)
    else:
        in_specs = [pl.BlockSpec((tm, tk), lambda i, j, k: (i, k)),
                    pl.BlockSpec((tk, tn), lambda i, j, k: (k, j)),
                    pl.BlockSpec((1, tn), lambda i, j, k: (0, j))]
        if has_residual:
            in_specs.append(pl.BlockSpec((tm, tn), lambda i, j, k: (i, j)))
        out = pl.pallas_call(
            functools.partial(_matmul_kloop_kernel, activation=activation,
                              has_residual=has_residual, n_k=n_k),
            grid=(Mp // tm, Np // tn, n_k),
            in_specs=in_specs,
            out_specs=pl.BlockSpec((tm, tn), lambda i, j, k: (i, j)),
            out_shape=jax.ShapeDtypeStruct((Mp, Np), out_dtype),
            scratch_shapes=[pltpu.VMEM((tm, tn), jnp.float32)],
            compiler_params=_CompilerParams(
                dimension_semantics=("parallel", "parallel", "arbitrary"),
                vmem_limit_bytes=_VMEM_LIMIT),
        )(*operands)

    if (Mp, Np) != (M, n_out):
        out = out[:M, :n_out]
    return out.reshape(*lead, n_out)


# ----------------------------------------------------------------------------
# Fused LayerNorm + matmul:  o = act(LN(x) @ w + b)
# LN is computed once per row block (at j == 0) into a VMEM scratch and reused
# for every N tile (no redundant VPU/EUP work across N tiles).
# ----------------------------------------------------------------------------
def _ln_matmul_kernel(x_ref, g_ref, bln_ref, w_ref, b_ref, o_ref, xn_ref, *,
                      eps, activation):
    @pl.when(pl.program_id(1) == 0)
    def _():
        x = x_ref[...].astype(jnp.float32)
        mean = jnp.mean(x, axis=-1, keepdims=True)
        xc = x - mean
        var = jnp.mean(xc * xc, axis=-1, keepdims=True)
        xn = xc * jax.lax.rsqrt(var + eps) * g_ref[...] + bln_ref[...]
        xn_ref[...] = xn.astype(xn_ref.dtype)

    y = jnp.dot(xn_ref[...], w_ref[...], preferred_element_type=jnp.float32)
    o_ref[...] = _matmul_epilogue(y, b_ref[...], None, activation).astype(o_ref.dtype)


def ln_linear(x, g, bln, w, b, n_out, activation=None, out_dtype=jnp.bfloat16,
              eps=1e-6):
    """LN over the true (un-padded) K dim, matmul against pre-padded weights."""
    *lead, K = x.shape
    Np = w.shape[1]
    assert w.shape[0] == K, "ln_linear weights must not be K-padded"
    x2 = x.reshape(-1, K)
    M = x2.shape[0]
    tm, Mp = _choose_tm(M)
    tn = _largest_divisor_tile(Np, _TN_MAX)

    xp = _pad_cast(x2, (Mp, K), jnp.bfloat16)
    gp = g.astype(jnp.float32).reshape(1, K)
    blnp = bln.astype(jnp.float32).reshape(1, K)

    out = pl.pallas_call(
        functools.partial(_ln_matmul_kernel, eps=eps, activation=activation),
        grid=(Mp // tm, Np // tn),
        in_specs=[
            pl.BlockSpec((tm, K), lambda i, j: (i, 0)),
            pl.BlockSpec((1, K), lambda i, j: (0, 0)),
            pl.BlockSpec((1, K), lambda i, j: (0, 0)),
            pl.BlockSpec((K, tn), lambda i, j: (0, j)),
            pl.BlockSpec((1, tn), lambda i, j: (0, j)),
        ],
        out_specs=pl.BlockSpec((tm, tn), lambda i, j: (i, j)),
        out_shape=jax.ShapeDtypeStruct((Mp, Np), out_dtype),
        scratch_shapes=[pltpu.VMEM((tm, K), jnp.bfloat16)],
        compiler_params=_CompilerParams(
            dimension_semantics=("parallel", "arbitrary"),
            vmem_limit_bytes=_VMEM_LIMIT),
    )(xp, gp, blnp, w, b)
    if (Mp, Np) != (M, n_out):
        out = out[:M, :n_out]
    return out.reshape(*lead, n_out)


# ----------------------------------------------------------------------------
# Standalone row-tiled LayerNorm (encoder output is returned, so not fusible)
# ----------------------------------------------------------------------------
def _layernorm_kernel(x_ref, g_ref, b_ref, o_ref, *, eps):
    x = x_ref[...].astype(jnp.float32)
    mean = jnp.mean(x, axis=-1, keepdims=True)
    xc = x - mean
    var = jnp.mean(xc * xc, axis=-1, keepdims=True)
    o_ref[...] = (xc * jax.lax.rsqrt(var + eps) * g_ref[...]
                  + b_ref[...]).astype(o_ref.dtype)


def layernorm(x, g, b, eps=1e-6, out_dtype=jnp.float32):
    *lead, D = x.shape
    x2 = x.reshape(-1, D)
    M = x2.shape[0]
    tm, Mp = _choose_tm(M)
    xp = _pad_cast(x2, (Mp, D), jnp.bfloat16)
    out = pl.pallas_call(
        functools.partial(_layernorm_kernel, eps=eps),
        grid=(Mp // tm,),
        in_specs=[pl.BlockSpec((tm, D), lambda i: (i, 0)),
                  pl.BlockSpec((1, D), lambda i: (0, 0)),
                  pl.BlockSpec((1, D), lambda i: (0, 0))],
        out_specs=pl.BlockSpec((tm, D), lambda i: (i, 0)),
        out_shape=jax.ShapeDtypeStruct((Mp, D), out_dtype),
        compiler_params=_CompilerParams(
            dimension_semantics=("parallel",), vmem_limit_bytes=_VMEM_LIMIT),
    )(xp, g.astype(jnp.float32).reshape(1, D), b.astype(jnp.float32).reshape(1, D))
    if Mp != M:
        out = out[:M]
    return out.reshape(*lead, D)


# ----------------------------------------------------------------------------
# Multi-head attention: heads batched as (G, Lp, dh) blocks, lane-dense (Lp is
# padded to a multiple of 128, padded keys masked). Softmax scale is already
# folded into the QKV weights at param-prep time.
# ----------------------------------------------------------------------------
def _attn_kernel(q_ref, k_ref, v_ref, o_ref, *, seq_len):
    q = q_ref[...]                                   # (G, Lp, dh) bf16
    k = k_ref[...]
    v = v_ref[...]
    s = jax.lax.dot_general(q, k, (((2,), (2,)), ((0,), (0,))),
                            preferred_element_type=jnp.float32)   # (G, Lq, Lk)
    lk = s.shape[-1]
    if seq_len < lk:                                 # mask zero-padded keys
        key_idx = jax.lax.broadcasted_iota(jnp.int32, (1, 1, lk), 2)
        s = jnp.where(key_idx < seq_len, s, -1e30)
    s = s - jnp.max(s, axis=-1, keepdims=True)
    p = jnp.exp(s)
    p = p * (1.0 / jnp.sum(p, axis=-1, keepdims=True))
    o = jax.lax.dot_general(p.astype(v.dtype), v, (((2,), (1,)), ((0,), (0,))),
                            preferred_element_type=jnp.float32)    # (G, Lq, dh)
    o_ref[...] = o.astype(o_ref.dtype)


def attention(qkv, num_heads):
    """qkv: (B, L, 3D) -> (B, L, D); full softmax attention, head-batched."""
    B, L, threeD = qkv.shape
    D = threeD // 3
    dh = D // num_heads
    Lp = _round_up(L, 128)

    # head split / pad done once in plain JAX (one transpose for q, k and v)
    t = qkv.astype(jnp.bfloat16).reshape(B, L, 3, num_heads, dh)
    t = t.transpose(2, 0, 3, 1, 4)                   # (3, B, H, L, dh)
    if Lp != L:
        t = jnp.pad(t, ((0, 0), (0, 0), (0, 0), (0, Lp - L), (0, 0)))
    q, k, v = t[0], t[1], t[2]                       # each (B, H, Lp, dh)

    # heads per grid step: largest divisor of H whose f32 score slab <= 8 MiB
    g = 1
    for cand in range(num_heads, 0, -1):
        if num_heads % cand == 0 and cand * Lp * Lp * 4 <= (8 << 20):
            g = cand
            break

    spec = pl.BlockSpec((None, g, Lp, dh), lambda b, h: (b, h, 0, 0))
    # TODO(synk): full (Lp, Lp) scores per head-group; switch to flash-style KV
    # tiling for long sequences.
    out = pl.pallas_call(
        functools.partial(_attn_kernel, seq_len=L),
        grid=(B, num_heads // g),
        in_specs=[spec, spec, spec],
        out_specs=pl.BlockSpec((None, g, Lp, dh), lambda b, h: (b, h, 0, 0)),
        out_shape=jax.ShapeDtypeStruct((B, num_heads, Lp, dh), jnp.bfloat16),
        compiler_params=_CompilerParams(
            dimension_semantics=("parallel", "parallel"),
            vmem_limit_bytes=_VMEM_LIMIT),
    )(q, k, v)
    return out[:, :, :L, :].transpose(0, 2, 1, 3).reshape(B, L, D)


# ----------------------------------------------------------------------------
# Transformer (encoder_transformer / decoder_transformer instances)
# ----------------------------------------------------------------------------
def _transformer_block(x, p, num_heads, d_model, mlp_dim):
    qkv = ln_linear(x, p["ln1_g"], p["ln1_b"], p["w_qkv"], p["b_qkv"],
                    3 * d_model)                                    # LN + QKV fused
    attn = attention(qkv, num_heads)
    x = linear(attn, p["w_out"], p["b_out"], d_model, residual=x)   # residual fused
    h = ln_linear(x, p["ln2_g"], p["ln2_b"], p["w_fc1"], p["b_fc1"],
                  mlp_dim, activation="gelu")                       # LN + MLP1 + GELU fused
    x = linear(h, p["w_fc2"], p["b_fc2"], d_model, residual=x)      # residual fused
    return x


def transformer_blocks(x, layers, num_heads, d_model, mlp_dim):
    for p in layers:
        x = _transformer_block(x, p, num_heads, d_model, mlp_dim)
    return x


# ----------------------------------------------------------------------------
# 2D sin-cos position embeddings (get_2d_sin_cos_embeddings)
# ----------------------------------------------------------------------------
def _sincos_1d(embed_dim, pos):
    omega = jnp.arange(embed_dim // 2, dtype=jnp.float32) / (embed_dim / 2.0)
    omega = 1.0 / (10000.0 ** omega)
    out = pos[:, None] * omega[None, :]
    return jnp.concatenate([jnp.sin(out), jnp.cos(out)], axis=1)


def get_2d_sin_cos_embeddings(embed_dim, grid_w, grid_h):
    gh = jnp.arange(grid_h, dtype=jnp.float32)
    gw = jnp.arange(grid_w, dtype=jnp.float32)
    mesh_w, mesh_h = jnp.meshgrid(gw, gh)          # row-major: token = h * grid_w + w
    emb_h = _sincos_1d(embed_dim // 2, mesh_h.reshape(-1))
    emb_w = _sincos_1d(embed_dim // 2, mesh_w.reshape(-1))
    emb = jnp.concatenate([emb_h, emb_w], axis=1)
    cls = jnp.zeros((1, embed_dim), jnp.float32)   # zero embedding for the CLS slot
    return jnp.concatenate([cls, emb], axis=0)[None]   # (1, L+1, D)


# ----------------------------------------------------------------------------
# Deterministic parameter init (mirrors MaskedAutoEncoder._initialize_weights)
# ----------------------------------------------------------------------------
def _xavier_uniform(key, fan_in, fan_out, shape):
    a = math.sqrt(6.0 / (fan_in + fan_out))
    return jax.random.uniform(key, shape, jnp.float32, -a, a)


def _init_linear(key, d_in, d_out):
    return _xavier_uniform(key, d_in, d_out, (d_in, d_out)), jnp.zeros((d_out,), jnp.float32)


def _init_block(key, d, mlp_dim):
    ks = jax.random.split(key, 6)
    wq, bq = _init_linear(ks[0], d, d)
    wk, bk = _init_linear(ks[1], d, d)
    wv, bv = _init_linear(ks[2], d, d)
    wo, bo = _init_linear(ks[3], d, d)
    w1, b1 = _init_linear(ks[4], d, mlp_dim)
    w2, b2 = _init_linear(ks[5], mlp_dim, d)
    ones, zeros = jnp.ones((d,), jnp.float32), jnp.zeros((d,), jnp.float32)
    return dict(wqkv=jnp.concatenate([wq, wk, wv], axis=1),
                bqkv=jnp.concatenate([bq, bk, bv], axis=0),
                wo=wo, bo=bo, w1=w1, b1=b1, w2=w2, b2=b2,
                ln1_g=ones, ln1_b=zeros, ln2_g=ones, ln2_b=zeros)


def init_mae_params(key, cfg):
    C, P = cfg["num_channels"], cfg["patch_size"]
    D, DD = cfg["embed_dim"], cfg["decoder_embed_dim"]
    Hp = Wp = cfg["input_size"] // P
    keys = jax.random.split(key, 8)
    params = {}
    # PatchEmbeddings conv projection expressed as (C*P*P, D) matmul weight.
    params["conv_w"] = _xavier_uniform(keys[0], C * P * P, D, (C * P * P, D))
    params["conv_b"] = jnp.zeros((D,), jnp.float32)
    params["cls_token"] = 0.02 * jax.random.normal(keys[1], (1, 1, D), jnp.float32)
    params["enc_pos"] = get_2d_sin_cos_embeddings(D, Wp, Hp)
    params["enc_layers"] = [_init_block(k, D, cfg["mlp_ratio"] * D)
                            for k in jax.random.split(keys[2], cfg["encoder_layers"])]
    params["enc_ln_g"], params["enc_ln_b"] = jnp.ones((D,)), jnp.zeros((D,))
    # DecoderEmbeddings
    params["dec_embed_w"], params["dec_embed_b"] = _init_linear(keys[3], D, DD)
    params["mask_token"] = 0.02 * jax.random.normal(keys[4], (1, 1, DD), jnp.float32)
    params["dec_pos"] = get_2d_sin_cos_embeddings(DD, Wp, Hp)
    params["dec_layers"] = [_init_block(k, DD, cfg["mlp_ratio"] * DD)
                            for k in jax.random.split(keys[5], cfg["decoder_layers"])]
    params["dec_ln_g"], params["dec_ln_b"] = jnp.ones((DD,)), jnp.zeros((DD,))
    # decoder_pred head
    params["pred_w"], params["pred_b"] = _init_linear(keys[6], DD, P * P * C)
    return params


# ----------------------------------------------------------------------------
# One-time parameter preparation: bf16 cast, 128-lane padding, scale folding.
# Run once (outside the jitted forward) so no per-step weight re-cast traffic.
# ----------------------------------------------------------------------------
def _prep_w(w, pad_k):
    K, N = w.shape
    Kp = _round_up(K, 128) if pad_k else K
    Np = _round_up(N, 128)
    return _pad_cast(w, (Kp, Np), jnp.bfloat16)


def _prep_b(b):
    N = b.shape[-1]
    return _pad_cast(b.astype(jnp.float32).reshape(1, N), (1, _round_up(N, 128)),
                     jnp.float32)


def _prep_block(blk, num_heads):
    d = blk["wo"].shape[0]
    scale = 1.0 / math.sqrt(d // num_heads)
    # fold the softmax 1/sqrt(head_dim) scale into the q columns of wqkv/bqkv
    wqkv = blk["wqkv"].at[:, :d].multiply(scale)
    bqkv = blk["bqkv"].at[:d].multiply(scale)
    return dict(
        w_qkv=_prep_w(wqkv, pad_k=False), b_qkv=_prep_b(bqkv),
        w_out=_prep_w(blk["wo"], pad_k=True), b_out=_prep_b(blk["bo"]),
        w_fc1=_prep_w(blk["w1"], pad_k=False), b_fc1=_prep_b(blk["b1"]),
        w_fc2=_prep_w(blk["w2"], pad_k=True), b_fc2=_prep_b(blk["b2"]),
        ln1_g=blk["ln1_g"], ln1_b=blk["ln1_b"],
        ln2_g=blk["ln2_g"], ln2_b=blk["ln2_b"])


def prepare_mae_params(params, cfg):
    return dict(
        conv_w=_prep_w(params["conv_w"], pad_k=True), conv_b=_prep_b(params["conv_b"]),
        cls_token=params["cls_token"], enc_pos=params["enc_pos"],
        enc_ln_g=params["enc_ln_g"], enc_ln_b=params["enc_ln_b"],
        dec_embed_w=_prep_w(params["dec_embed_w"], pad_k=False),
        dec_embed_b=_prep_b(params["dec_embed_b"]),
        mask_token=params["mask_token"], dec_pos=params["dec_pos"],
        dec_ln_g=params["dec_ln_g"], dec_ln_b=params["dec_ln_b"],
        pred_w=_prep_w(params["pred_w"], pad_k=False), pred_b=_prep_b(params["pred_b"]),
        enc_layers=[_prep_block(b, cfg["encoder_heads"]) for b in params["enc_layers"]],
        dec_layers=[_prep_block(b, cfg["decoder_heads"]) for b in params["dec_layers"]],
    )


# ----------------------------------------------------------------------------
# MAE forward (training path)
# ----------------------------------------------------------------------------
def mae_forward(prep, x, cfg, mask_key):
    B, C, H, W = x.shape
    P = cfg["patch_size"]
    Hp, Wp = H // P, W // P
    L = Hp * Wp
    D, DD = cfg["embed_dim"], cfg["decoder_embed_dim"]
    enc_mlp, dec_mlp = cfg["mlp_ratio"] * D, cfg["mlp_ratio"] * DD

    # --- PatchEmbeddings: conv(kernel=stride=P) as a patchified matmul -------
    xp = (x.reshape(B, C, Hp, P, Wp, P)
            .transpose(0, 2, 4, 1, 3, 5)           # (B, Hp, Wp, C, P, P)
            .reshape(B, L, C * P * P))
    emb = linear(xp, prep["conv_w"], prep["conv_b"], D)               # (B, L, D) bf16
    emb = emb.astype(jnp.float32) + prep["enc_pos"][:, 1:, :]

    # --- MAE random masking (argsort shuffle, keep (1-ratio)*L patches) ------
    # TODO(synk): argsort / gather for random masking stays in plain JAX (no Pallas sort primitive).
    len_keep = int(L * (1 - cfg["masking_ratio"]))
    noise = jax.random.uniform(mask_key, (B, L))
    ids_shuffle = jnp.argsort(noise, axis=1)
    ids_restore = jnp.argsort(ids_shuffle, axis=1)
    ids_keep = ids_shuffle[:, :len_keep]
    emb_masked = jnp.take_along_axis(emb, ids_keep[:, :, None], axis=1)
    mask = jnp.ones((B, L), jnp.float32).at[:, :len_keep].set(0.0)
    mask = jnp.take_along_axis(mask, ids_restore, axis=1)

    cls = prep["cls_token"] + prep["enc_pos"][:, :1, :]
    enc_in = jnp.concatenate([jnp.broadcast_to(cls, (B, 1, D)), emb_masked],
                             axis=1).astype(jnp.bfloat16)

    # --- encoder transformer ---------------------------------------------------
    enc_x = transformer_blocks(enc_in, prep["enc_layers"], cfg["encoder_heads"],
                               D, enc_mlp)
    # standalone f32 LN only for the returned encoder_output ...
    enc_out = layernorm(enc_x, prep["enc_ln_g"], prep["enc_ln_b"],
                        out_dtype=jnp.float32)
    # ... while the decoder path gets the same LN fused into the decoder embed
    dx = ln_linear(enc_x, prep["enc_ln_g"], prep["enc_ln_b"],
                   prep["dec_embed_w"], prep["dec_embed_b"], DD)      # (B, keep+1, DD)

    # --- DecoderEmbeddings ------------------------------------------------------
    n_mask = ids_restore.shape[1] + 1 - dx.shape[1]
    mask_tokens = jnp.broadcast_to(prep["mask_token"].astype(dx.dtype), (B, n_mask, DD))
    dx_ = jnp.concatenate([dx[:, 1:, :], mask_tokens], axis=1)
    dx_ = jnp.take_along_axis(dx_, ids_restore[:, :, None], axis=1)   # un-shuffle
    dec_in = (jnp.concatenate([dx[:, :1, :], dx_], axis=1).astype(jnp.float32)
              + prep["dec_pos"]).astype(jnp.bfloat16)

    # --- decoder transformer + fused final LN + pred head (use_cls_in_decoder=True)
    dec_x = transformer_blocks(dec_in, prep["dec_layers"], cfg["decoder_heads"],
                               DD, dec_mlp)
    pred = ln_linear(dec_x, prep["dec_ln_g"], prep["dec_ln_b"],
                     prep["pred_w"], prep["pred_b"], P * P * C,
                     out_dtype=jnp.float32)[:, 1:, :]                 # drop CLS

    # --- patchified ground-truth labels ---------------------------------------
    label_patches = (x.reshape(B, C, Hp, P, Wp, P)
                       .transpose(0, 2, 4, 3, 5, 1)                   # nchpwq -> nhwpqc
                       .reshape(B, L, P * P * C))

    return dict(encoder_output=enc_out, decoder_pred=pred,
                label_patches=label_patches, mask=mask)


# ----------------------------------------------------------------------------
if __name__ == "__main__":
    cfg = dict(
        input_size=16, patch_size=4, num_channels=3,
        embed_dim=32, decoder_embed_dim=16, masking_ratio=0.75,
        encoder_layers=2, decoder_layers=2,
        encoder_heads=4, decoder_heads=2, mlp_ratio=2,
    )
    key = jax.random.PRNGKey(0)
    pkey, xkey, mkey = jax.random.split(key, 3)

    params = init_mae_params(pkey, cfg)
    prep = prepare_mae_params(params, cfg)      # one-time weight cast / pad / scale-fold
    x = jax.random.normal(xkey, (2, 3, 16, 16), jnp.float32)   # NCHW, like PyTorch

    fwd = jax.jit(lambda pr, xx, mk: mae_forward(pr, xx, cfg, mk))
    out = fwd(prep, x, mkey)
    jax.block_until_ready(out["decoder_pred"])

    L = (16 // 4) ** 2
    assert out["encoder_output"].shape == (2, int(L * 0.25) + 1, 32)
    assert out["decoder_pred"].shape == (2, L, 4 * 4 * 3)
    assert out["label_patches"].shape == (2, L, 4 * 4 * 3)
    assert out["mask"].shape == (2, L)
    assert jnp.all(jnp.isfinite(out["decoder_pred"]))
    assert jnp.all(jnp.isfinite(out["encoder_output"]))
    print("KERNEL_OK")
</pallas_src>

<mosaic_0001>
module attributes {stable_mosaic.version = 11 : i64} {
  func.func @_matmul_single_kernel(%arg0: i32, %arg1: i32, %arg2: memref<32x128xbf16, #tpu.memory_space<vmem>>, %arg3: memref<128x128xbf16, #tpu.memory_space<vmem>>, %arg4: memref<1x128xf32, #tpu.memory_space<vmem>>, %arg5: memref<32x128xbf16, #tpu.memory_space<vmem>>) attributes {dimension_semantics = [#tpu.dimension_semantics<parallel>, #tpu.dimension_semantics<parallel>], iteration_bounds = array<i64: 1, 1>, scalar_prefetch = 0 : i64, scratch_operands = 0 : i64, tpu.core_type = #tpu.core_type<tc>, window_params = [{transform_indices = @transform_0, window_bounds = array<i64: 32, 128>}, {transform_indices = @transform_1, window_bounds = array<i64: 128, 128>}, {transform_indices = @transform_2, window_bounds = array<i64: 1, 128>}, {transform_indices = @transform_3, window_bounds = array<i64: 32, 128>}]} {
    %c0 = arith.constant 0 : index
    %c0_0 = arith.constant 0 : index
    %0 = vector.load %arg2[%c0, %c0_0] : memref<32x128xbf16, #tpu.memory_space<vmem>>, vector<32x128xbf16>
    %c0_1 = arith.constant 0 : index
    %c0_2 = arith.constant 0 : index
    %1 = vector.load %arg3[%c0_1, %c0_2] : memref<128x128xbf16, #tpu.memory_space<vmem>>, vector<128x128xbf16>
    %cst = arith.constant dense<0.000000e+00> : vector<32x128xf32>
    %2 = tpu.matmul %0, %1, %cst {dimension_numbers = #tpu.dot_dimension_numbers<[1], [0], [0], [1], [0, 0, 1, 1], [], []>} : vector<32x128xbf16>, vector<128x128xbf16>, vector<32x128xf32> -> vector<32x128xf32>
    %c0_3 = arith.constant 0 : index
    %c0_4 = arith.constant 0 : index
    %3 = vector.load %arg4[%c0_3, %c0_4] : memref<1x128xf32, #tpu.memory_space<vmem>>, vector<1x128xf32>
    %4 = vector.broadcast %3 : vector<1x128xf32> to vector<32x128xf32>
    %5 = arith.addf %2, %4 : vector<32x128xf32>
    %6 = arith.truncf %5 : vector<32x128xf32> to vector<32x128xbf16>
    %c0_5 = arith.constant 0 : index
    %c0_6 = arith.constant 0 : index
    %7 = vector.load %arg5[%c0_5, %c0_6] : memref<32x128xbf16, #tpu.memory_space<vmem>>, vector<32x128xbf16>
    tpu.vector_store %arg5[%c0_5, %c0_6], %6 {strides = array<i32>} : memref<32x128xbf16, #tpu.memory_space<vmem>>, vector<32x128xbf16>,
    return
  }
  func.func @transform_0(%arg0: i32, %arg1: i32) -> (i32, i32) {
    %c0_i32 = arith.constant 0 : i32
    %c0_i32_0 = arith.constant 0 : i32
    return %arg0, %c0_i32 : i32, i32
  }
  func.func @transform_1(%arg0: i32, %arg1: i32) -> (i32, i32) {
    %c0_i32 = arith.constant 0 : i32
    %c0_i32_0 = arith.constant 0 : i32
    return %c0_i32, %arg1 : i32, i32
  }
  func.func @transform_2(%arg0: i32, %arg1: i32) -> (i32, i32) {
    %c0_i32 = arith.constant 0 : i32
    %c0_i32_0 = arith.constant 0 : i32
    return %c0_i32, %arg1 : i32, i32
  }
  func.func @transform_3(%arg0: i32, %arg1: i32) -> (i32, i32) {
    %c0_i32 = arith.constant 0 : i32
    return %arg0, %arg1 : i32, i32
  }
}

module attributes {stable_mosaic.version = 11 : i64} {
  func.func @_ln_matmul_kernel(%arg0: i32, %arg1: i32, %arg2: memref<16x32xbf16, #tpu.memory_space<vmem>>, %arg3: memref<1x32xf32, #tpu.memory_space<vmem>>, %arg4: memref<1x32xf32, #tpu.memory_space<vmem>>, %arg5: memref<32x128xbf16, #tpu.memory_space<vmem>>, %arg6: memref<1x128xf32, #tpu.memory_space<vmem>>, %arg7: memref<16x128xbf16, #tpu.memory_space<vmem>>, %arg8: memref<16x32xbf16, #tpu.memory_space<vmem>>) attributes {dimension_semantics = [#tpu.dimension_semantics<parallel>, #tpu.dimension_semantics<arbitrary>], iteration_bounds = array<i64: 1, 1>, scalar_prefetch = 0 : i64, scratch_operands = 1 : i64, tpu.core_type = #tpu.core_type<tc>, window_params = [{transform_indices = @transform_0, window_bounds = array<i64: 16, 32>}, {pipeline_mode = #tpu.pipeline_mode<synchronous>, transform_indices = @transform_1, window_bounds = array<i64: 1, 32>}, {pipeline_mode = #tpu.pipeline_mode<synchronous>, transform_indices = @transform_2, window_bounds = array<i64: 1, 32>}, {transform_indices = @transform_3, window_bounds = array<i64: 32, 128>}, {transform_indices = @transform_4, window_bounds = array<i64: 1, 128>}, {transform_indices = @transform_5, window_bounds = array<i64: 16, 128>}]} {
    %c0_i32 = arith.constant 0 : i32
    %0 = arith.cmpi eq, %arg1, %c0_i32 : i32
    %1 = arith.extui %0 : i1 to i32
    %c0_i32_0 = arith.constant 0 : i32
    %2 = arith.cmpi ne, %1, %c0_i32_0 : i32
    scf.if %2 {
      %c0_8 = arith.constant 0 : index
      %c0_9 = arith.constant 0 : index
      %11 = vector.load %arg2[%c0_8, %c0_9] : memref<16x32xbf16, #tpu.memory_space<vmem>>, vector<16x32xbf16>
      %12 = arith.extf %11 : vector<16x32xbf16> to vector<16x32xf32>
      %cst_10 = arith.constant dense<0.000000e+00> : vector<16xf32>
      %13 = vector.multi_reduction <add>, %12, %cst_10 [1] : vector<16x32xf32> to vector<16xf32>
      %14 = vector.shape_cast %13 : vector<16xf32> to vector<16x1xf32>
      %cst_11 = arith.constant 3.200000e+01 : f32
      %15 = vector.broadcast %cst_11 : f32 to vector<16x1xf32>
      %16 = arith.divf %14, %15 : vector<16x1xf32>
      %17 = vector.broadcast %16 : vector<16x1xf32> to vector<16x32xf32>
      %18 = arith.subf %12, %17 : vector<16x32xf32>
      %19 = arith.mulf %18, %18 : vector<16x32xf32>
      %cst_12 = arith.constant dense<0.000000e+00> : vector<16xf32>
      %20 = vector.multi_reduction <add>, %19, %cst_12 [1] : vector<16x32xf32> to vector<16xf32>
      %21 = vector.shape_cast %20 : vector<16xf32> to vector<16x1xf32>
      %cst_13 = arith.constant 3.200000e+01 : f32
      %22 = vector.broadcast %cst_13 : f32 to vector<16x1xf32>
      %23 = arith.divf %21, %22 : vector<16x1xf32>
      %cst_14 = arith.constant 9.99999997E-7 : f32
      %24 = vector.broadcast %cst_14 : f32 to vector<16x1xf32>
      %25 = arith.addf %23, %24 : vector<16x1xf32>
      %26 = math.rsqrt %25 : vector<16x1xf32>
      %27 = vector.broadcast %26 : vector<16x1xf32> to vector<16x32xf32>
      %28 = arith.mulf %18, %27 : vector<16x32xf32>
      %c0_15 = arith.constant 0 : index
      %c0_16 = arith.constant 0 : index
      %29 = vector.load %arg3[%c0_15, %c0_16] : memref<1x32xf32, #tpu.memory_space<vmem>>, vector<1x32xf32>
      %30 = vector.broadcast %29 : vector<1x32xf32> to vector<16x32xf32>
      %31 = arith.mulf %28, %30 : vector<16x32xf32>
      %c0_17 = arith.constant 0 : index
      %c0_18 = arith.constant 0 : index
      %32 = vector.load %arg4[%c0_17, %c0_18] : memref<1x32xf32, #tpu.memory_space<vmem>>, vector<1x32xf32>
      %33 = vector.broadcast %32 : vector<1x32xf32> to vector<16x32xf32>
      %34 = arith.addf %31, %33 : vector<16x32xf32>
      %35 = arith.truncf %34 : vector<16x32xf32> to vector<16x32xbf16>
      %c0_19 = arith.constant 0 : index
      %c0_20 = arith.constant 0 : index
      %36 = vector.load %arg8[%c0_19, %c0_20] : memref<16x32xbf16, #tpu.memory_space<vmem>>, vector<16x32xbf16>
      tpu.vector_store %arg8[%c0_19, %c0_20], %35 {strides = array<i32>} : memref<16x32xbf16, #tpu.memory_space<vmem>>, vector<16x32xbf16>,
    } else {
    }
    %c0 = arith.constant 0 : index
    %c0_1 = arith.constant 0 : index
    %3 = vector.load %arg8[%c0, %c0_1] : memref<16x32xbf16, #tpu.memory_space<vmem>>, vector<16x32xbf16>
    %c0_2 = arith.constant 0 : index
    %c0_3 = arith.constant 0 : index
    %4 = vector.load %arg5[%c0_2, %c0_3] : memref<32x128xbf16, #tpu.memory_space<vmem>>, vector<32x128xbf16>
    %cst = arith.constant dense<0.000000e+00> : vector<16x128xf32>
    %5 = tpu.matmul %3, %4, %cst {dimension_numbers = #tpu.dot_dimension_numbers<[1], [0], [0], [1], [0, 0, 1, 1], [], []>} : vector<16x32xbf16>, vector<32x128xbf16>, vector<16x128xf32> -> vector<16x128xf32>
    %c0_4 = arith.constant 0 : index
    %c0_5 = arith.constant 0 : index
    %6 = vector.load %arg6[%c0_4, %c0_5] : memref<1x128xf32, #tpu.memory_space<vmem>>, vector<1x128xf32>
    %7 = vector.broadcast %6 : vector<1x128xf32> to vector<16x128xf32>
    %8 = arith.addf %5, %7 : vector<16x128xf32>
    %9 = arith.truncf %8 : vector<16x128xf32> to vector<16x128xbf16>
    %c0_6 = arith.constant 0 : index
    %c0_7 = arith.constant 0 : index
    %10 = vector.load %arg7[%c0_6, %c0_7] : memref<16x128xbf16, #tpu.memory_space<vmem>>, vector<16x128xbf16>
    tpu.vector_store %arg7[%c0_6, %c0_7], %9 {strides = array<i32>} : memref<16x128xbf16, #tpu.memory_space<vmem>>, vector<16x128xbf16>,
    return
  }
  func.func @transform_0(%arg0: i32, %arg1: i32) -> (i32, i32) {
    %c0_i32 = arith.constant 0 : i32
    %c0_i32_0 = arith.constant 0 : i32
    return %arg0, %c0_i32 : i32, i32
  }
  func.func @transform_1(%arg0: i32, %arg1: i32) -> (i32, i32) {
    %c0_i32 = arith.constant 0 : i32
    %c0_i32_0 = arith.constant 0 : i32
    %c0_i32_1 = arith.constant 0 : i32
    return %c0_i32, %c0_i32_0 : i32, i32
  }
  func.func @transform_2(%arg0: i32, %arg1: i32) -> (i32, i32) {
    %c0_i32 = arith.constant 0 : i32
    %c0_i32_0 = arith.constant 0 : i32
    %c0_i32_1 = arith.constant 0 : i32
    return %c0_i32, %c0_i32_0 : i32, i32
  }
  func.func @transform_3(%arg0: i32, %arg1: i32) -> (i32, i32) {
    %c0_i32 = arith.constant 0 : i32
    %c0_i32_0 = arith.constant 0 : i32
    return %c0_i32, %arg1 : i32, i32
  }
  func.func @transform_4(%arg0: i32, %arg1: i32) -> (i32, i32) {
    %c0_i32 = arith.constant 0 : i32
    %c0_i32_0 = arith.constant 0 : i32
    return %c0_i32, %arg1 : i32, i32
  }
  func.func @transform_5(%arg0: i32, %arg1: i32) -> (i32, i32) {
    %c0_i32 = arith.constant 0 : i32
    return %arg0, %arg1 : i32, i32
  }
}

module attributes {stable_mosaic.version = 11 : i64} {
  func.func @_attn_kernel(%arg0: i32, %arg1: i32, %arg2: memref<1x4x128x8xbf16, #tpu.memory_space<vmem>>, %arg3: memref<1x4x128x8xbf16, #tpu.memory_space<vmem>>, %arg4: memref<1x4x128x8xbf16, #tpu.memory_space<vmem>>, %arg5: memref<1x4x128x8xbf16, #tpu.memory_space<vmem>>) attributes {dimension_semantics = [#tpu.dimension_semantics<parallel>, #tpu.dimension_semantics<parallel>], iteration_bounds = array<i64: 2, 1>, scalar_prefetch = 0 : i64, scratch_operands = 0 : i64, tpu.core_type = #tpu.core_type<tc>, window_params = [{transform_indices = @transform_0, window_bounds = array<i64: 1, 4, 128, 8>}, {transform_indices = @transform_1, window_bounds = array<i64: 1, 4, 128, 8>}, {transform_indices = @transform_2, window_bounds = array<i64: 1, 4, 128, 8>}, {transform_indices = @transform_3, window_bounds = array<i64: 1, 4, 128, 8>}]} {
    %c0 = arith.constant 0 : index
    %c0_0 = arith.constant 0 : index
    %c0_1 = arith.constant 0 : index
    %c0_2 = arith.constant 0 : index
    %0 = vector.load %arg2[%c0, %c0_0, %c0_1, %c0_2] : memref<1x4x128x8xbf16, #tpu.memory_space<vmem>>, vector<1x4x128x8xbf16>
    %1 = vector.shape_cast %0 : vector<1x4x128x8xbf16> to vector<4x128x8xbf16>
    %c0_3 = arith.constant 0 : index
    %c0_4 = arith.constant 0 : index
    %c0_5 = arith.constant 0 : index
    %c0_6 = arith.constant 0 : index
    %2 = vector.load %arg3[%c0_3, %c0_4, %c0_5, %c0_6] : memref<1x4x128x8xbf16, #tpu.memory_space<vmem>>, vector<1x4x128x8xbf16>
    %3 = vector.shape_cast %2 : vector<1x4x128x8xbf16> to vector<4x128x8xbf16>
    %c0_7 = arith.constant 0 : index
    %c0_8 = arith.constant 0 : index
    %c0_9 = arith.constant 0 : index
    %c0_10 = arith.constant 0 : index
    %4 = vector.load %arg4[%c0_7, %c0_8, %c0_9, %c0_10] : memref<1x4x128x8xbf16, #tpu.memory_space<vmem>>, vector<1x4x128x8xbf16>
    %5 = vector.shape_cast %4 : vector<1x4x128x8xbf16> to vector<4x128x8xbf16>
    %cst = arith.constant dense<0.000000e+00> : vector<4x128x128xf32>
    %6 = tpu.matmul %1, %3, %cst {dimension_numbers = #tpu.dot_dimension_numbers<[2], [2], [1], [1], [0, 0, 0, 1, 1, 1], [0], [0]>} : vector<4x128x8xbf16>, vector<4x128x8xbf16>, vector<4x128x128xf32> -> vector<4x128x128xf32>
    %7 = tpu.iota {dimensions = array<i32: 2>} : vector<1x1x128xi32>
    %c5_i32 = arith.constant 5 : i32
    %8 = vector.broadcast %c5_i32 : i32 to vector<1x1x128xi32>
    %9 = arith.cmpi slt, %7, %8 : vector<1x1x128xi32>
    %cst_11 = arith.constant -1.000000e+30 : f32
    %10 = vector.shape_cast %9 : vector<1x1x128xi1> to vector<1x1x128xi1>
    %11 = vector.broadcast %10 : vector<1x1x128xi1> to vector<4x128x128xi1>
    %12 = vector.broadcast %cst_11 : f32 to vector<4x128x128xf32>
    %13 = arith.select %11, %6, %12 : vector<4x128x128xi1>, vector<4x128x128xf32>
    %cst_12 = arith.constant dense<0xFF800000> : vector<4x128xf32>
    %14 = vector.multi_reduction <maximumf>, %13, %cst_12 [2] : vector<4x128x128xf32> to vector<4x128xf32>
    %15 = vector.shape_cast %14 : vector<4x128xf32> to vector<4x128x1xf32>
    %16 = vector.broadcast %15 : vector<4x128x1xf32> to vector<4x128x128xf32>
    %17 = arith.subf %13, %16 : vector<4x128x128xf32>
    %18 = math.exp %17 : vector<4x128x128xf32>
    %cst_13 = arith.constant dense<0.000000e+00> : vector<4x128xf32>
    %19 = vector.multi_reduction <add>, %18, %cst_13 [2] : vector<4x128x128xf32> to vector<4x128xf32>
    %20 = vector.shape_cast %19 : vector<4x128xf32> to vector<4x128x1xf32>
    %cst_14 = arith.constant 1.000000e+00 : f32
    %21 = vector.broadcast %cst_14 : f32 to vector<4x128x1xf32>
    %22 = arith.divf %21, %20 : vector<4x128x1xf32>
    %23 = vector.broadcast %22 : vector<4x128x1xf32> to vector<4x128x128xf32>
    %24 = arith.mulf %18, %23 : vector<4x128x128xf32>
    %25 = arith.truncf %24 : vector<4x128x128xf32> to vector<4x128x128xbf16>
    %cst_15 = arith.constant dense<0.000000e+00> : vector<4x128x8xf32>
    %26 = tpu.matmul %25, %5, %cst_15 {dimension_numbers = #tpu.dot_dimension_numbers<[2], [1], [1], [2], [0, 0, 0, 1, 1, 2], [0], [0]>} : vector<4x128x128xbf16>, vector<4x128x8xbf16>, vector<4x128x8xf32> -> vector<4x128x8xf32>
    %27 = arith.truncf %26 : vector<4x128x8xf32> to vector<4x128x8xbf16>
    %c0_16 = arith.constant 0 : index
    %c0_17 = arith.constant 0 : index
    %c0_18 = arith.constant 0 : index
    %c0_19 = arith.constant 0 : index
    %28 = vector.load %arg5[%c0_16, %c0_17, %c0_18, %c0_19] : memref<1x4x128x8xbf16, #tpu.memory_space<vmem>>, vector<1x4x128x8xbf16>
    %29 = vector.shape_cast %28 : vector<1x4x128x8xbf16> to vector<4x128x8xbf16>
    %30 = vector.shape_cast %27 : vector<4x128x8xbf16> to vector<1x4x128x8xbf16>
    tpu.vector_store %arg5[%c0_16, %c0_17, %c0_18, %c0_19], %30 {strides = array<i32>} : memref<1x4x128x8xbf16, #tpu.memory_space<vmem>>, vector<1x4x128x8xbf16>,
    return
  }
  func.func @transform_0(%arg0: i32, %arg1: i32) -> (i32, i32, i32, i32) {
    %c0_i32 = arith.constant 0 : i32
    %c0_i32_0 = arith.constant 0 : i32
    %c0_i32_1 = arith.constant 0 : i32
    return %arg0, %arg1, %c0_i32, %c0_i32_0 : i32, i32, i32, i32
  }
  func.func @transform_1(%arg0: i32, %arg1: i32) -> (i32, i32, i32, i32) {
    %c0_i32 = arith.constant 0 : i32
    %c0_i32_0 = arith.constant 0 : i32
    %c0_i32_1 = arith.constant 0 : i32
    return %arg0, %arg1, %c0_i32, %c0_i32_0 : i32, i32, i32, i32
  }
  func.func @transform_2(%arg0: i32, %arg1: i32) -> (i32, i32, i32, i32) {
    %c0_i32 = arith.constant 0 : i32
    %c0_i32_0 = arith.constant 0 : i32
    %c0_i32_1 = arith.constant 0 : i32
    return %arg0, %arg1, %c0_i32, %c0_i32_0 : i32, i32, i32, i32
  }
  func.func @transform_3(%arg0: i32, %arg1: i32) -> (i32, i32, i32, i32) {
    %c0_i32 = arith.constant 0 : i32
    %c0_i32_0 = arith.constant 0 : i32
    %c0_i32_1 = arith.constant 0 : i32
    return %arg0, %arg1, %c0_i32, %c0_i32_0 : i32, i32, i32, i32
  }
}

module attributes {stable_mosaic.version = 11 : i64} {
  func.func @_matmul_single_kernel(%arg0: i32, %arg1: i32, %arg2: memref<16x128xbf16, #tpu.memory_space<vmem>>, %arg3: memref<128x128xbf16, #tpu.memory_space<vmem>>, %arg4: memref<1x128xf32, #tpu.memory_space<vmem>>, %arg5: memref<16x128xbf16, #tpu.memory_space<vmem>>, %arg6: memref<16x128xbf16, #tpu.memory_space<vmem>>) attributes {dimension_semantics = [#tpu.dimension_semantics<parallel>, #tpu.dimension_semantics<parallel>], iteration_bounds = array<i64: 1, 1>, scalar_prefetch = 0 : i64, scratch_operands = 0 : i64, tpu.core_type = #tpu.core_type<tc>, window_params = [{transform_indices = @transform_0, window_bounds = array<i64: 16, 128>}, {transform_indices = @transform_1, window_bounds = array<i64: 128, 128>}, {transform_indices = @transform_2, window_bounds = array<i64: 1, 128>}, {transform_indices = @transform_3, window_bounds = array<i64: 16, 128>}, {transform_indices = @transform_4, window_bounds = array<i64: 16, 128>}]} {
    %c0 = arith.constant 0 : index
    %c0_0 = arith.constant 0 : index
    %0 = vector.load %arg2[%c0, %c0_0] : memref<16x128xbf16, #tpu.memory_space<vmem>>, vector<16x128xbf16>
    %c0_1 = arith.constant 0 : index
    %c0_2 = arith.constant 0 : index
    %1 = vector.load %arg3[%c0_1, %c0_2] : memref<128x128xbf16, #tpu.memory_space<vmem>>, vector<128x128xbf16>
    %cst = arith.constant dense<0.000000e+00> : vector<16x128xf32>
    %2 = tpu.matmul %0, %1, %cst {dimension_numbers = #tpu.dot_dimension_numbers<[1], [0], [0], [1], [0, 0, 1, 1], [], []>} : vector<16x128xbf16>, vector<128x128xbf16>, vector<16x128xf32> -> vector<16x128xf32>
    %c0_3 = arith.constant 0 : index
    %c0_4 = arith.constant 0 : index
    %3 = vector.load %arg4[%c0_3, %c0_4] : memref<1x128xf32, #tpu.memory_space<vmem>>, vector<1x128xf32>
    %4 = vector.broadcast %3 : vector<1x128xf32> to vector<16x128xf32>
    %5 = arith.addf %2, %4 : vector<16x128xf32>
    %c0_5 = arith.constant 0 : index
    %c0_6 = arith.constant 0 : index
    %6 = vector.load %arg5[%c0_5, %c0_6] : memref<16x128xbf16, #tpu.memory_space<vmem>>, vector<16x128xbf16>
    %7 = arith.extf %6 : vector<16x128xbf16> to vector<16x128xf32>
    %8 = arith.addf %5, %7 : vector<16x128xf32>
    %9 = arith.truncf %8 : vector<16x128xf32> to vector<16x128xbf16>
    %c0_7 = arith.constant 0 : index
    %c0_8 = arith.constant 0 : index
    %10 = vector.load %arg6[%c0_7, %c0_8] : memref<16x128xbf16, #tpu.memory_space<vmem>>, vector<16x128xbf16>
    tpu.vector_store %arg6[%c0_7, %c0_8], %9 {strides = array<i32>} : memref<16x128xbf16, #tpu.memory_space<vmem>>, vector<16x128xbf16>,
    return
  }
  func.func @transform_0(%arg0: i32, %arg1: i32) -> (i32, i32) {
    %c0_i32 = arith.constant 0 : i32
    %c0_i32_0 = arith.constant 0 : i32
    return %arg0, %c0_i32 : i32, i32
  }
  func.func @transform_1(%arg0: i32, %arg1: i32) -> (i32, i32) {
    %c0_i32 = arith.constant 0 : i32
    %c0_i32_0 = arith.constant 0 : i32
    return %c0_i32, %arg1 : i32, i32
  }
  func.func @transform_2(%arg0: i32, %arg1: i32) -> (i32, i32) {
    %c0_i32 = arith.constant 0 : i32
    %c0_i32_0 = arith.constant 0 : i32
    return %c0_i32, %arg1 : i32, i32
  }
  func.func @transform_3(%arg0: i32, %arg1: i32) -> (i32, i32) {
    %c0_i32 = arith.constant 0 : i32
    return %arg0, %arg1 : i32, i32
  }
  func.func @transform_4(%arg0: i32, %arg1: i32) -> (i32, i32) {
    %c0_i32 = arith.constant 0 : i32
    return %arg0, %arg1 : i32, i32
  }
}

module attributes {stable_mosaic.version = 11 : i64} {
  func.func @_ln_matmul_kernel(%arg0: i32, %arg1: i32, %arg2: memref<16x32xbf16, #tpu.memory_space<vmem>>, %arg3: memref<1x32xf32, #tpu.memory_space<vmem>>, %arg4: memref<1x32xf32, #tpu.memory_space<vmem>>, %arg5: memref<32x128xbf16, #tpu.memory_space<vmem>>, %arg6: memref<1x128xf32, #tpu.memory_space<vmem>>, %arg7: memref<16x128xbf16, #tpu.memory_space<vmem>>, %arg8: memref<16x32xbf16, #tpu.memory_space<vmem>>) attributes {dimension_semantics = [#tpu.dimension_semantics<parallel>, #tpu.dimension_semantics<arbitrary>], iteration_bounds = array<i64: 1, 1>, scalar_prefetch = 0 : i64, scratch_operands = 1 : i64, tpu.core_type = #tpu.core_type<tc>, window_params = [{transform_indices = @transform_0, window_bounds = array<i64: 16, 32>}, {pipeline_mode = #tpu.pipeline_mode<synchronous>, transform_indices = @transform_1, window_bounds = array<i64: 1, 32>}, {pipeline_mode = #tpu.pipeline_mode<synchronous>, transform_indices = @transform_2, window_bounds = array<i64: 1, 32>}, {transform_indices = @transform_3, window_bounds = array<i64: 32, 128>}, {transform_indices = @transform_4, window_bounds = array<i64: 1, 128>}, {transform_indices = @transform_5, window_bounds = array<i64: 16, 128>}]} {
    %c0_i32 = arith.constant 0 : i32
    %0 = arith.cmpi eq, %arg1, %c0_i32 : i32
    %1 = arith.extui %0 : i1 to i32
    %c0_i32_0 = arith.constant 0 : i32
    %2 = arith.cmpi ne, %1, %c0_i32_0 : i32
    scf.if %2 {
      %c0_12 = arith.constant 0 : index
      %c0_13 = arith.constant 0 : index
      %24 = vector.load %arg2[%c0_12, %c0_13] : memref<16x32xbf16, #tpu.memory_space<vmem>>, vector<16x32xbf16>
      %25 = arith.extf %24 : vector<16x32xbf16> to vector<16x32xf32>
      %cst_14 = arith.constant dense<0.000000e+00> : vector<16xf32>
      %26 = vector.multi_reduction <add>, %25, %cst_14 [1] : vector<16x32xf32> to vector<16xf32>
      %27 = vector.shape_cast %26 : vector<16xf32> to vector<16x1xf32>
      %cst_15 = arith.constant 3.200000e+01 : f32
      %28 = vector.broadcast %cst_15 : f32 to vector<16x1xf32>
      %29 = arith.divf %27, %28 : vector<16x1xf32>
      %30 = vector.broadcast %29 : vector<16x1xf32> to vector<16x32xf32>
      %31 = arith.subf %25, %30 : vector<16x32xf32>
      %32 = arith.mulf %31, %31 : vector<16x32xf32>
      %cst_16 = arith.constant dense<0.000000e+00> : vector<16xf32>
      %33 = vector.multi_reduction <add>, %32, %cst_16 [1] : vector<16x32xf32> to vector<16xf32>
      %34 = vector.shape_cast %33 : vector<16xf32> to vector<16x1xf32>
      %cst_17 = arith.constant 3.200000e+01 : f32
      %35 = vector.broadcast %cst_17 : f32 to vector<16x1xf32>
      %36 = arith.divf %34, %35 : vector<16x1xf32>
      %cst_18 = arith.constant 9.99999997E-7 : f32
      %37 = vector.broadcast %cst_18 : f32 to vector<16x1xf32>
      %38 = arith.addf %36, %37 : vector<16x1xf32>
      %39 = math.rsqrt %38 : vector<16x1xf32>
      %40 = vector.broadcast %39 : vector<16x1xf32> to vector<16x32xf32>
      %41 = arith.mulf %31, %40 : vector<16x32xf32>
      %c0_19 = arith.constant 0 : index
      %c0_20 = arith.constant 0 : index
      %42 = vector.load %arg3[%c0_19, %c0_20] : memref<1x32xf32, #tpu.memory_space<vmem>>, vector<1x32xf32>
      %43 = vector.broadcast %42 : vector<1x32xf32> to vector<16x32xf32>
      %44 = arith.mulf %41, %43 : vector<16x32xf32>
      %c0_21 = arith.constant 0 : index
      %c0_22 = arith.constant 0 : index
      %45 = vector.load %arg4[%c0_21, %c0_22] : memref<1x32xf32, #tpu.memory_space<vmem>>, vector<1x32xf32>
      %46 = vector.broadcast %45 : vector<1x32xf32> to vector<16x32xf32>
      %47 = arith.addf %44, %46 : vector<16x32xf32>
      %48 = arith.truncf %47 : vector<16x32xf32> to vector<16x32xbf16>
      %c0_23 = arith.constant 0 : index
      %c0_24 = arith.constant 0 : index
      %49 = vector.load %arg8[%c0_23, %c0_24] : memref<16x32xbf16, #tpu.memory_space<vmem>>, vector<16x32xbf16>
      tpu.vector_store %arg8[%c0_23, %c0_24], %48 {strides = array<i32>} : memref<16x32xbf16, #tpu.memory_space<vmem>>, vector<16x32xbf16>,
    } else {
    }
    %c0 = arith.constant 0 : index
    %c0_1 = arith.constant 0 : index
    %3 = vector.load %arg8[%c0, %c0_1] : memref<16x32xbf16, #tpu.memory_space<vmem>>, vector<16x32xbf16>
    %c0_2 = arith.constant 0 : index
    %c0_3 = arith.constant 0 : index
    %4 = vector.load %arg5[%c0_2, %c0_3] : memref<32x128xbf16, #tpu.memory_space<vmem>>, vector<32x128xbf16>
    %cst = arith.constant dense<0.000000e+00> : vector<16x128xf32>
    %5 = tpu.matmul %3, %4, %cst {dimension_numbers = #tpu.dot_dimension_numbers<[1], [0], [0], [1], [0, 0, 1, 1], [], []>} : vector<16x32xbf16>, vector<32x128xbf16>, vector<16x128xf32> -> vector<16x128xf32>
    %c0_4 = arith.constant 0 : index
    %c0_5 = arith.constant 0 : index
    %6 = vector.load %arg6[%c0_4, %c0_5] : memref<1x128xf32, #tpu.memory_space<vmem>>, vector<1x128xf32>
    %7 = vector.broadcast %6 : vector<1x128xf32> to vector<16x128xf32>
    %8 = arith.addf %5, %7 : vector<16x128xf32>
    %9 = arith.mulf %8, %8 : vector<16x128xf32>
    %10 = arith.mulf %8, %9 : vector<16x128xf32>
    %cst_6 = arith.constant 4.471500e-02 : f32
    %11 = vector.broadcast %cst_6 : f32 to vector<16x128xf32>
    %12 = arith.mulf %11, %10 : vector<16x128xf32>
    %13 = arith.addf %8, %12 : vector<16x128xf32>
    %cst_7 = arith.constant 0.797884583 : f32
    %14 = vector.broadcast %cst_7 : f32 to vector<16x128xf32>
    %15 = arith.mulf %14, %13 : vector<16x128xf32>
    %16 = math.tanh %15 : vector<16x128xf32>
    %cst_8 = arith.constant 1.000000e+00 : f32
    %17 = vector.broadcast %cst_8 : f32 to vector<16x128xf32>
    %18 = arith.addf %17, %16 : vector<16x128xf32>
    %cst_9 = arith.constant 5.000000e-01 : f32
    %19 = vector.broadcast %cst_9 : f32 to vector<16x128xf32>
    %20 = arith.mulf %19, %18 : vector<16x128xf32>
    %21 = arith.mulf %8, %20 : vector<16x128xf32>
    %22 = arith.truncf %21 : vector<16x128xf32> to vector<16x128xbf16>
    %c0_10 = arith.constant 0 : index
    %c0_11 = arith.constant 0 : index
    %23 = vector.load %arg7[%c0_10, %c0_11] : memref<16x128xbf16, #tpu.memory_space<vmem>>, vector<16x128xbf16>
    tpu.vector_store %arg7[%c0_10, %c0_11], %22 {strides = array<i32>} : memref<16x128xbf16, #tpu.memory_space<vmem>>, vector<16x128xbf16>,
    return
  }
  func.func @transform_0(%arg0: i32, %arg1: i32) -> (i32, i32) {
    %c0_i32 = arith.constant 0 : i32
    %c0_i32_0 = arith.constant 0 : i32
    return %arg0, %c0_i32 : i32, i32
  }
  func.func @transform_1(%arg0: i32, %arg1: i32) -> (i32, i32) {
    %c0_i32 = arith.constant 0 : i32
    %c0_i32_0 = arith.constant 0 : i32
    %c0_i32_1 = arith.constant 0 : i32
    return %c0_i32, %c0_i32_0 : i32, i32
  }
  func.func @transform_2(%arg0: i32, %arg1: i32) -> (i32, i32) {
    %c0_i32 = arith.constant 0 : i32
    %c0_i32_0 = arith.constant 0 : i32
    %c0_i32_1 = arith.constant 0 : i32
    return %c0_i32, %c0_i32_0 : i32, i32
  }
  func.func @transform_3(%arg0: i32, %arg1: i32) -> (i32, i32) {
    %c0_i32 = arith.constant 0 : i32
    %c0_i32_0 = arith.constant 0 : i32
    return %c0_i32, %arg1 : i32, i32
  }
  func.func @transform_4(%arg0: i32, %arg1: i32) -> (i32, i32) {
    %c0_i32 = arith.constant 0 : i32
    %c0_i32_0 = arith.constant 0 : i32
    return %c0_i32, %arg1 : i32, i32
  }
  func.func @transform_5(%arg0: i32, %arg1: i32) -> (i32, i32) {
    %c0_i32 = arith.constant 0 : i32
    return %arg0, %arg1 : i32, i32
  }
}

module attributes {stable_mosaic.version = 11 : i64} {
  func.func @_layernorm_kernel(%arg0: i32, %arg1: memref<16x32xbf16, #tpu.memory_space<vmem>>, %arg2: memref<1x32xf32, #tpu.memory_space<vmem>>, %arg3: memref<1x32xf32, #tpu.memory_space<vmem>>, %arg4: memref<16x32xf32, #tpu.memory_space<vmem>>) attributes {dimension_semantics = [#tpu.dimension_semantics<parallel>], iteration_bounds = array<i64: 1>, scalar_prefetch = 0 : i64, scratch_operands = 0 : i64, tpu.core_type = #tpu.core_type<tc>, window_params = [{transform_indices = @transform_0, window_bounds = array<i64: 16, 32>}, {pipeline_mode = #tpu.pipeline_mode<synchronous>, transform_indices = @transform_1, window_bounds = array<i64: 1, 32>}, {pipeline_mode = #tpu.pipeline_mode<synchronous>, transform_indices = @transform_2, window_bounds = array<i64: 1, 32>}, {transform_indices = @transform_3, window_bounds = array<i64: 16, 32>}]} {
    %c0 = arith.constant 0 : index
    %c0_0 = arith.constant 0 : index
    %0 = vector.load %arg1[%c0, %c0_0] : memref<16x32xbf16, #tpu.memory_space<vmem>>, vector<16x32xbf16>
    %1 = arith.extf %0 : vector<16x32xbf16> to vector<16x32xf32>
    %cst = arith.constant dense<0.000000e+00> : vector<16xf32>
    %2 = vector.multi_reduction <add>, %1, %cst [1] : vector<16x32xf32> to vector<16xf32>
    %3 = vector.shape_cast %2 : vector<16xf32> to vector<16x1xf32>
    %cst_1 = arith.constant 3.200000e+01 : f32
    %4 = vector.broadcast %cst_1 : f32 to vector<16x1xf32>
    %5 = arith.divf %3, %4 : vector<16x1xf32>
    %6 = vector.broadcast %5 : vector<16x1xf32> to vector<16x32xf32>
    %7 = arith.subf %1, %6 : vector<16x32xf32>
    %8 = arith.mulf %7, %7 : vector<16x32xf32>
    %cst_2 = arith.constant dense<0.000000e+00> : vector<16xf32>
    %9 = vector.multi_reduction <add>, %8, %cst_2 [1] : vector<16x32xf32> to vector<16xf32>
    %10 = vector.shape_cast %9 : vector<16xf32> to vector<16x1xf32>
    %cst_3 = arith.constant 3.200000e+01 : f32
    %11 = vector.broadcast %cst_3 : f32 to vector<16x1xf32>
    %12 = arith.divf %10, %11 : vector<16x1xf32>
    %cst_4 = arith.constant 9.99999997E-7 : f32
    %13 = vector.broadcast %cst_4 : f32 to vector<16x1xf32>
    %14 = arith.addf %12, %13 : vector<16x1xf32>
    %15 = math.rsqrt %14 : vector<16x1xf32>
    %16 = vector.broadcast %15 : vector<16x1xf32> to vector<16x32xf32>
    %17 = arith.mulf %7, %16 : vector<16x32xf32>
    %c0_5 = arith.constant 0 : index
    %c0_6 = arith.constant 0 : index
    %18 = vector.load %arg2[%c0_5, %c0_6] : memref<1x32xf32, #tpu.memory_space<vmem>>, vector<1x32xf32>
    %19 = vector.broadcast %18 : vector<1x32xf32> to vector<16x32xf32>
    %20 = arith.mulf %17, %19 : vector<16x32xf32>
    %c0_7 = arith.constant 0 : index
    %c0_8 = arith.constant 0 : index
    %21 = vector.load %arg3[%c0_7, %c0_8] : memref<1x32xf32, #tpu.memory_space<vmem>>, vector<1x32xf32>
    %22 = vector.broadcast %21 : vector<1x32xf32> to vector<16x32xf32>
    %23 = arith.addf %20, %22 : vector<16x32xf32>
    %c0_9 = arith.constant 0 : index
    %c0_10 = arith.constant 0 : index
    %24 = vector.load %arg4[%c0_9, %c0_10] : memref<16x32xf32, #tpu.memory_space<vmem>>, vector<16x32xf32>
    tpu.vector_store %arg4[%c0_9, %c0_10], %23 {strides = array<i32>} : memref<16x32xf32, #tpu.memory_space<vmem>>, vector<16x32xf32>,
    return
  }
  func.func @transform_0(%arg0: i32) -> (i32, i32) {
    %c0_i32 = arith.constant 0 : i32
    %c0_i32_0 = arith.constant 0 : i32
    return %arg0, %c0_i32 : i32, i32
  }
  func.func @transform_1(%arg0: i32) -> (i32, i32) {
    %c0_i32 = arith.constant 0 : i32
    %c0_i32_0 = arith.constant 0 : i32
    %c0_i32_1 = arith.constant 0 : i32
    return %c0_i32, %c0_i32_0 : i32, i32
  }
  func.func @transform_2(%arg0: i32) -> (i32, i32) {
    %c0_i32 = arith.constant 0 : i32
    %c0_i32_0 = arith.constant 0 : i32
    %c0_i32_1 = arith.constant 0 : i32
    return %c0_i32, %c0_i32_0 : i32, i32
  }
  func.func @transform_3(%arg0: i32) -> (i32, i32) {
    %c0_i32 = arith.constant 0 : i32
    %c0_i32_0 = arith.constant 0 : i32
    return %arg0, %c0_i32 : i32, i32
  }
}

module attributes {stable_mosaic.version = 11 : i64} {
  func.func @_ln_matmul_kernel(%arg0: i32, %arg1: i32, %arg2: memref<40x16xbf16, #tpu.memory_space<vmem>>, %arg3: memref<1x16xf32, #tpu.memory_space<vmem>>, %arg4: memref<1x16xf32, #tpu.memory_space<vmem>>, %arg5: memref<16x128xbf16, #tpu.memory_space<vmem>>, %arg6: memref<1x128xf32, #tpu.memory_space<vmem>>, %arg7: memref<40x128xbf16, #tpu.memory_space<vmem>>, %arg8: memref<40x16xbf16, #tpu.memory_space<vmem>>) attributes {dimension_semantics = [#tpu.dimension_semantics<parallel>, #tpu.dimension_semantics<arbitrary>], iteration_bounds = array<i64: 1, 1>, scalar_prefetch = 0 : i64, scratch_operands = 1 : i64, tpu.core_type = #tpu.core_type<tc>, window_params = [{transform_indices = @transform_0, window_bounds = array<i64: 40, 16>}, {pipeline_mode = #tpu.pipeline_mode<synchronous>, transform_indices = @transform_1, window_bounds = array<i64: 1, 16>}, {pipeline_mode = #tpu.pipeline_mode<synchronous>, transform_indices = @transform_2, window_bounds = array<i64: 1, 16>}, {transform_indices = @transform_3, window_bounds = array<i64: 16, 128>}, {transform_indices = @transform_4, window_bounds = array<i64: 1, 128>}, {transform_indices = @transform_5, window_bounds = array<i64: 40, 128>}]} {
    %c0_i32 = arith.constant 0 : i32
    %0 = arith.cmpi eq, %arg1, %c0_i32 : i32
    %1 = arith.extui %0 : i1 to i32
    %c0_i32_0 = arith.constant 0 : i32
    %2 = arith.cmpi ne, %1, %c0_i32_0 : i32
    scf.if %2 {
      %c0_8 = arith.constant 0 : index
      %c0_9 = arith.constant 0 : index
      %11 = vector.load %arg2[%c0_8, %c0_9] : memref<40x16xbf16, #tpu.memory_space<vmem>>, vector<40x16xbf16>
      %12 = arith.extf %11 : vector<40x16xbf16> to vector<40x16xf32>
      %cst_10 = arith.constant dense<0.000000e+00> : vector<40xf32>
      %13 = vector.multi_reduction <add>, %12, %cst_10 [1] : vector<40x16xf32> to vector<40xf32>
      %14 = vector.shape_cast %13 : vector<40xf32> to vector<40x1xf32>
      %cst_11 = arith.constant 1.600000e+01 : f32
      %15 = vector.broadcast %cst_11 : f32 to vector<40x1xf32>
      %16 = arith.divf %14, %15 : vector<40x1xf32>
      %17 = vector.broadcast %16 : vector<40x1xf32> to vector<40x16xf32>
      %18 = arith.subf %12, %17 : vector<40x16xf32>
      %19 = arith.mulf %18, %18 : vector<40x16xf32>
      %cst_12 = arith.constant dense<0.000000e+00> : vector<40xf32>
      %20 = vector.multi_reduction <add>, %19, %cst_12 [1] : vector<40x16xf32> to vector<40xf32>
      %21 = vector.shape_cast %20 : vector<40xf32> to vector<40x1xf32>
      %cst_13 = arith.constant 1.600000e+01 : f32
      %22 = vector.broadcast %cst_13 : f32 to vector<40x1xf32>
      %23 = arith.divf %21, %22 : vector<40x1xf32>
      %cst_14 = arith.constant 9.99999997E-7 : f32
      %24 = vector.broadcast %cst_14 : f32 to vector<40x1xf32>
      %25 = arith.addf %23, %24 : vector<40x1xf32>
      %26 = math.rsqrt %25 : vector<40x1xf32>
      %27 = vector.broadcast %26 : vector<40x1xf32> to vector<40x16xf32>
      %28 = arith.mulf %18, %27 : vector<40x16xf32>
      %c0_15 = arith.constant 0 : index
      %c0_16 = arith.constant 0 : index
      %29 = vector.load %arg3[%c0_15, %c0_16] : memref<1x16xf32, #tpu.memory_space<vmem>>, vector<1x16xf32>
      %30 = vector.broadcast %29 : vector<1x16xf32> to vector<40x16xf32>
      %31 = arith.mulf %28, %30 : vector<40x16xf32>
      %c0_17 = arith.constant 0 : index
      %c0_18 = arith.constant 0 : index
      %32 = vector.load %arg4[%c0_17, %c0_18] : memref<1x16xf32, #tpu.memory_space<vmem>>, vector<1x16xf32>
      %33 = vector.broadcast %32 : vector<1x16xf32> to vector<40x16xf32>
      %34 = arith.addf %31, %33 : vector<40x16xf32>
      %35 = arith.truncf %34 : vector<40x16xf32> to vector<40x16xbf16>
      %c0_19 = arith.constant 0 : index
      %c0_20 = arith.constant 0 : index
      %36 = vector.load %arg8[%c0_19, %c0_20] : memref<40x16xbf16, #tpu.memory_space<vmem>>, vector<40x16xbf16>
      tpu.vector_store %arg8[%c0_19, %c0_20], %35 {strides = array<i32>} : memref<40x16xbf16, #tpu.memory_space<vmem>>, vector<40x16xbf16>,
    } else {
    }
    %c0 = arith.constant 0 : index
    %c0_1 = arith.constant 0 : index
    %3 = vector.load %arg8[%c0, %c0_1] : memref<40x16xbf16, #tpu.memory_space<vmem>>, vector<40x16xbf16>
    %c0_2 = arith.constant 0 : index
    %c0_3 = arith.constant 0 : index
    %4 = vector.load %arg5[%c0_2, %c0_3] : memref<16x128xbf16, #tpu.memory_space<vmem>>, vector<16x128xbf16>
    %cst = arith.constant dense<0.000000e+00> : vector<40x128xf32>
    %5 = tpu.matmul %3, %4, %cst {dimension_numbers = #tpu.dot_dimension_numbers<[1], [0], [0], [1], [0, 0, 1, 1], [], []>} : vector<40x16xbf16>, vector<16x128xbf16>, vector<40x128xf32> -> vector<40x128xf32>
    %c0_4 = arith.constant 0 : index
    %c0_5 = arith.constant 0 : index
    %6 = vector.load %arg6[%c0_4, %c0_5] : memref<1x128xf32, #tpu.memory_space<vmem>>, vector<1x128xf32>
    %7 = vector.broadcast %6 : vector<1x128xf32> to vector<40x128xf32>
    %8 = arith.addf %5, %7 : vector<40x128xf32>
    %9 = arith.truncf %8 : vector<40x128xf32> to vector<40x128xbf16>
    %c0_6 = arith.constant 0 : index
    %c0_7 = arith.constant 0 : index
    %10 = vector.load %arg7[%c0_6, %c0_7] : memref<40x128xbf16, #tpu.memory_space<vmem>>, vector<40x128xbf16>
    tpu.vector_store %arg7[%c0_6, %c0_7], %9 {strides = array<i32>} : memref<40x128xbf16, #tpu.memory_space<vmem>>, vector<40x128xbf16>,
    return
  }
  func.func @transform_0(%arg0: i32, %arg1: i32) -> (i32, i32) {
    %c0_i32 = arith.constant 0 : i32
    %c0_i32_0 = arith.constant 0 : i32
    return %arg0, %c0_i32 : i32, i32
  }
  func.func @transform_1(%arg0: i32, %arg1: i32) -> (i32, i32) {
    %c0_i32 = arith.constant 0 : i32
    %c0_i32_0 = arith.constant 0 : i32
    %c0_i32_1 = arith.constant 0 : i32
    return %c0_i32, %c0_i32_0 : i32, i32
  }
  func.func @transform_2(%arg0: i32, %arg1: i32) -> (i32, i32) {
    %c0_i32 = arith.constant 0 : i32
    %c0_i32_0 = arith.constant 0 : i32
    %c0_i32_1 = arith.constant 0 : i32
    return %c0_i32, %c0_i32_0 : i32, i32
  }
  func.func @transform_3(%arg0: i32, %arg1: i32) -> (i32, i32) {
    %c0_i32 = arith.constant 0 : i32
    %c0_i32_0 = arith.constant 0 : i32
    return %c0_i32, %arg1 : i32, i32
  }
  func.func @transform_4(%arg0: i32, %arg1: i32) -> (i32, i32) {
    %c0_i32 = arith.constant 0 : i32
    %c0_i32_0 = arith.constant 0 : i32
    return %c0_i32, %arg1 : i32, i32
  }
  func.func @transform_5(%arg0: i32, %arg1: i32) -> (i32, i32) {
    %c0_i32 = arith.constant 0 : i32
    return %arg0, %arg1 : i32, i32
  }
}

module attributes {stable_mosaic.version = 11 : i64} {
  func.func @_attn_kernel(%arg0: i32, %arg1: i32, %arg2: memref<1x2x128x8xbf16, #tpu.memory_space<vmem>>, %arg3: memref<1x2x128x8xbf16, #tpu.memory_space<vmem>>, %arg4: memref<1x2x128x8xbf16, #tpu.memory_space<vmem>>, %arg5: memref<1x2x128x8xbf16, #tpu.memory_space<vmem>>) attributes {dimension_semantics = [#tpu.dimension_semantics<parallel>, #tpu.dimension_semantics<parallel>], iteration_bounds = array<i64: 2, 1>, scalar_prefetch = 0 : i64, scratch_operands = 0 : i64, tpu.core_type = #tpu.core_type<tc>, window_params = [{transform_indices = @transform_0, window_bounds = array<i64: 1, 2, 128, 8>}, {transform_indices = @transform_1, window_bounds = array<i64: 1, 2, 128, 8>}, {transform_indices = @transform_2, window_bounds = array<i64: 1, 2, 128, 8>}, {transform_indices = @transform_3, window_bounds = array<i64: 1, 2, 128, 8>}]} {
    %c0 = arith.constant 0 : index
    %c0_0 = arith.constant 0 : index
    %c0_1 = arith.constant 0 : index
    %c0_2 = arith.constant 0 : index
    %0 = vector.load %arg2[%c0, %c0_0, %c0_1, %c0_2] : memref<1x2x128x8xbf16, #tpu.memory_space<vmem>>, vector<1x2x128x8xbf16>
    %1 = vector.shape_cast %0 : vector<1x2x128x8xbf16> to vector<2x128x8xbf16>
    %c0_3 = arith.constant 0 : index
    %c0_4 = arith.constant 0 : index
    %c0_5 = arith.constant 0 : index
    %c0_6 = arith.constant 0 : index
    %2 = vector.load %arg3[%c0_3, %c0_4, %c0_5, %c0_6] : memref<1x2x128x8xbf16, #tpu.memory_space<vmem>>, vector<1x2x128x8xbf16>
    %3 = vector.shape_cast %2 : vector<1x2x128x8xbf16> to vector<2x128x8xbf16>
    %c0_7 = arith.constant 0 : index
    %c0_8 = arith.constant 0 : index
    %c0_9 = arith.constant 0 : index
    %c0_10 = arith.constant 0 : index
    %4 = vector.load %arg4[%c0_7, %c0_8, %c0_9, %c0_10] : memref<1x2x128x8xbf16, #tpu.memory_space<vmem>>, vector<1x2x128x8xbf16>
    %5 = vector.shape_cast %4 : vector<1x2x128x8xbf16> to vector<2x128x8xbf16>
    %cst = arith.constant dense<0.000000e+00> : vector<2x128x128xf32>
    %6 = tpu.matmul %1, %3, %cst {dimension_numbers = #tpu.dot_dimension_numbers<[2], [2], [1], [1], [0, 0, 0, 1, 1, 1], [0], [0]>} : vector<2x128x8xbf16>, vector<2x128x8xbf16>, vector<2x128x128xf32> -> vector<2x128x128xf32>
    %7 = tpu.iota {dimensions = array<i32: 2>} : vector<1x1x128xi32>
    %c17_i32 = arith.constant 17 : i32
    %8 = vector.broadcast %c17_i32 : i32 to vector<1x1x128xi32>
    %9 = arith.cmpi slt, %7, %8 : vector<1x1x128xi32>
    %cst_11 = arith.constant -1.000000e+30 : f32
    %10 = vector.shape_cast %9 : vector<1x1x128xi1> to vector<1x1x128xi1>
    %11 = vector.broadcast %10 : vector<1x1x128xi1> to vector<2x128x128xi1>
    %12 = vector.broadcast %cst_11 : f32 to vector<2x128x128xf32>
    %13 = arith.select %11, %6, %12 : vector<2x128x128xi1>, vector<2x128x128xf32>
    %cst_12 = arith.constant dense<0xFF800000> : vector<2x128xf32>
    %14 = vector.multi_reduction <maximumf>, %13, %cst_12 [2] : vector<2x128x128xf32> to vector<2x128xf32>
    %15 = vector.shape_cast %14 : vector<2x128xf32> to vector<2x128x1xf32>
    %16 = vector.broadcast %15 : vector<2x128x1xf32> to vector<2x128x128xf32>
    %17 = arith.subf %13, %16 : vector<2x128x128xf32>
    %18 = math.exp %17 : vector<2x128x128xf32>
    %cst_13 = arith.constant dense<0.000000e+00> : vector<2x128xf32>
    %19 = vector.multi_reduction <add>, %18, %cst_13 [2] : vector<2x128x128xf32> to vector<2x128xf32>
    %20 = vector.shape_cast %19 : vector<2x128xf32> to vector<2x128x1xf32>
    %cst_14 = arith.constant 1.000000e+00 : f32
    %21 = vector.broadcast %cst_14 : f32 to vector<2x128x1xf32>
    %22 = arith.divf %21, %20 : vector<2x128x1xf32>
    %23 = vector.broadcast %22 : vector<2x128x1xf32> to vector<2x128x128xf32>
    %24 = arith.mulf %18, %23 : vector<2x128x128xf32>
    %25 = arith.truncf %24 : vector<2x128x128xf32> to vector<2x128x128xbf16>
    %cst_15 = arith.constant dense<0.000000e+00> : vector<2x128x8xf32>
    %26 = tpu.matmul %25, %5, %cst_15 {dimension_numbers = #tpu.dot_dimension_numbers<[2], [1], [1], [2], [0, 0, 0, 1, 1, 2], [0], [0]>} : vector<2x128x128xbf16>, vector<2x128x8xbf16>, vector<2x128x8xf32> -> vector<2x128x8xf32>
    %27 = arith.truncf %26 : vector<2x128x8xf32> to vector<2x128x8xbf16>
    %c0_16 = arith.constant 0 : index
    %c0_17 = arith.constant 0 : index
    %c0_18 = arith.constant 0 : index
    %c0_19 = arith.constant 0 : index
    %28 = vector.load %arg5[%c0_16, %c0_17, %c0_18, %c0_19] : memref<1x2x128x8xbf16, #tpu.memory_space<vmem>>, vector<1x2x128x8xbf16>
    %29 = vector.shape_cast %28 : vector<1x2x128x8xbf16> to vector<2x128x8xbf16>
    %30 = vector.shape_cast %27 : vector<2x128x8xbf16> to vector<1x2x128x8xbf16>
    tpu.vector_store %arg5[%c0_16, %c0_17, %c0_18, %c0_19], %30 {strides = array<i32>} : memref<1x2x128x8xbf16, #tpu.memory_space<vmem>>, vector<1x2x128x8xbf16>,
    return
  }
  func.func @transform_0(%arg0: i32, %arg1: i32) -> (i32, i32, i32, i32) {
    %c0_i32 = arith.constant 0 : i32
    %c0_i32_0 = arith.constant 0 : i32
    %c0_i32_1 = arith.constant 0 : i32
    return %arg0, %arg1, %c0_i32, %c0_i32_0 : i32, i32, i32, i32
  }
  func.func @transform_1(%arg0: i32, %arg1: i32) -> (i32, i32, i32, i32) {
    %c0_i32 = arith.constant 0 : i32
    %c0_i32_0 = arith.constant 0 : i32
    %c0_i32_1 = arith.constant 0 : i32
    return %arg0, %arg1, %c0_i32, %c0_i32_0 : i32, i32, i32, i32
  }
  func.func @transform_2(%arg0: i32, %arg1: i32) -> (i32, i32, i32, i32) {
    %c0_i32 = arith.constant 0 : i32
    %c0_i32_0 = arith.constant 0 : i32
    %c0_i32_1 = arith.constant 0 : i32
    return %arg0, %arg1, %c0_i32, %c0_i32_0 : i32, i32, i32, i32
  }
  func.func @transform_3(%arg0: i32, %arg1: i32) -> (i32, i32, i32, i32) {
    %c0_i32 = arith.constant 0 : i32
    %c0_i32_0 = arith.constant 0 : i32
    %c0_i32_1 = arith.constant 0 : i32
    return %arg0, %arg1, %c0_i32, %c0_i32_0 : i32, i32, i32, i32
  }
}

module attributes {stable_mosaic.version = 11 : i64} {
  func.func @_matmul_single_kernel(%arg0: i32, %arg1: i32, %arg2: memref<40x128xbf16, #tpu.memory_space<vmem>>, %arg3: memref<128x128xbf16, #tpu.memory_space<vmem>>, %arg4: memref<1x128xf32, #tpu.memory_space<vmem>>, %arg5: memref<40x128xbf16, #tpu.memory_space<vmem>>, %arg6: memref<40x128xbf16, #tpu.memory_space<vmem>>) attributes {dimension_semantics = [#tpu.dimension_semantics<parallel>, #tpu.dimension_semantics<parallel>], iteration_bounds = array<i64: 1, 1>, scalar_prefetch = 0 : i64, scratch_operands = 0 : i64, tpu.core_type = #tpu.core_type<tc>, window_params = [{transform_indices = @transform_0, window_bounds = array<i64: 40, 128>}, {transform_indices = @transform_1, window_bounds = array<i64: 128, 128>}, {transform_indices = @transform_2, window_bounds = array<i64: 1, 128>}, {transform_indices = @transform_3, window_bounds = array<i64: 40, 128>}, {transform_indices = @transform_4, window_bounds = array<i64: 40, 128>}]} {
    %c0 = arith.constant 0 : index
    %c0_0 = arith.constant 0 : index
    %0 = vector.load %arg2[%c0, %c0_0] : memref<40x128xbf16, #tpu.memory_space<vmem>>, vector<40x128xbf16>
    %c0_1 = arith.constant 0 : index
    %c0_2 = arith.constant 0 : index
    %1 = vector.load %arg3[%c0_1, %c0_2] : memref<128x128xbf16, #tpu.memory_space<vmem>>, vector<128x128xbf16>
    %cst = arith.constant dense<0.000000e+00> : vector<40x128xf32>
    %2 = tpu.matmul %0, %1, %cst {dimension_numbers = #tpu.dot_dimension_numbers<[1], [0], [0], [1], [0, 0, 1, 1], [], []>} : vector<40x128xbf16>, vector<128x128xbf16>, vector<40x128xf32> -> vector<40x128xf32>
    %c0_3 = arith.constant 0 : index
    %c0_4 = arith.constant 0 : index
    %3 = vector.load %arg4[%c0_3, %c0_4] : memref<1x128xf32, #tpu.memory_space<vmem>>, vector<1x128xf32>
    %4 = vector.broadcast %3 : vector<1x128xf32> to vector<40x128xf32>
    %5 = arith.addf %2, %4 : vector<40x128xf32>
    %c0_5 = arith.constant 0 : index
    %c0_6 = arith.constant 0 : index
    %6 = vector.load %arg5[%c0_5, %c0_6] : memref<40x128xbf16, #tpu.memory_space<vmem>>, vector<40x128xbf16>
    %7 = arith.extf %6 : vector<40x128xbf16> to vector<40x128xf32>
    %8 = arith.addf %5, %7 : vector<40x128xf32>
    %9 = arith.truncf %8 : vector<40x128xf32> to vector<40x128xbf16>
    %c0_7 = arith.constant 0 : index
    %c0_8 = arith.constant 0 : index
    %10 = vector.load %arg6[%c0_7, %c0_8] : memref<40x128xbf16, #tpu.memory_space<vmem>>, vector<40x128xbf16>
    tpu.vector_store %arg6[%c0_7, %c0_8], %9 {strides = array<i32>} : memref<40x128xbf16, #tpu.memory_space<vmem>>, vector<40x128xbf16>,
    return
  }
  func.func @transform_0(%arg0: i32, %arg1: i32) -> (i32, i32) {
    %c0_i32 = arith.constant 0 : i32
    %c0_i32_0 = arith.constant 0 : i32
    return %arg0, %c0_i32 : i32, i32
  }
  func.func @transform_1(%arg0: i32, %arg1: i32) -> (i32, i32) {
    %c0_i32 = arith.constant 0 : i32
    %c0_i32_0 = arith.constant 0 : i32
    return %c0_i32, %arg1 : i32, i32
  }
  func.func @transform_2(%arg0: i32, %arg1: i32) -> (i32, i32) {
    %c0_i32 = arith.constant 0 : i32
    %c0_i32_0 = arith.constant 0 : i32
    return %c0_i32, %arg1 : i32, i32
  }
  func.func @transform_3(%arg0: i32, %arg1: i32) -> (i32, i32) {
    %c0_i32 = arith.constant 0 : i32
    return %arg0, %arg1 : i32, i32
  }
  func.func @transform_4(%arg0: i32, %arg1: i32) -> (i32, i32) {
    %c0_i32 = arith.constant 0 : i32
    return %arg0, %arg1 : i32, i32
  }
}

module attributes {stable_mosaic.version = 11 : i64} {
  func.func @_ln_matmul_kernel(%arg0: i32, %arg1: i32, %arg2: memref<40x16xbf16, #tpu.memory_space<vmem>>, %arg3: memref<1x16xf32, #tpu.memory_space<vmem>>, %arg4: memref<1x16xf32, #tpu.memory_space<vmem>>, %arg5: memref<16x128xbf16, #tpu.memory_space<vmem>>, %arg6: memref<1x128xf32, #tpu.memory_space<vmem>>, %arg7: memref<40x128xbf16, #tpu.memory_space<vmem>>, %arg8: memref<40x16xbf16, #tpu.memory_space<vmem>>) attributes {dimension_semantics = [#tpu.dimension_semantics<parallel>, #tpu.dimension_semantics<arbitrary>], iteration_bounds = array<i64: 1, 1>, scalar_prefetch = 0 : i64, scratch_operands = 1 : i64, tpu.core_type = #tpu.core_type<tc>, window_params = [{transform_indices = @transform_0, window_bounds = array<i64: 40, 16>}, {pipeline_mode = #tpu.pipeline_mode<synchronous>, transform_indices = @transform_1, window_bounds = array<i64: 1, 16>}, {pipeline_mode = #tpu.pipeline_mode<synchronous>, transform_indices = @transform_2, window_bounds = array<i64: 1, 16>}, {transform_indices = @transform_3, window_bounds = array<i64: 16, 128>}, {transform_indices = @transform_4, window_bounds = array<i64: 1, 128>}, {transform_indices = @transform_5, window_bounds = array<i64: 40, 128>}]} {
    %c0_i32 = arith.constant 0 : i32
    %0 = arith.cmpi eq, %arg1, %c0_i32 : i32
    %1 = arith.extui %0 : i1 to i32
    %c0_i32_0 = arith.constant 0 : i32
    %2 = arith.cmpi ne, %1, %c0_i32_0 : i32
    scf.if %2 {
      %c0_12 = arith.constant 0 : index
      %c0_13 = arith.constant 0 : index
      %24 = vector.load %arg2[%c0_12, %c0_13] : memref<40x16xbf16, #tpu.memory_space<vmem>>, vector<40x16xbf16>
      %25 = arith.extf %24 : vector<40x16xbf16> to vector<40x16xf32>
      %cst_14 = arith.constant dense<0.000000e+00> : vector<40xf32>
      %26 = vector.multi_reduction <add>, %25, %cst_14 [1] : vector<40x16xf32> to vector<40xf32>
      %27 = vector.shape_cast %26 : vector<40xf32> to vector<40x1xf32>
      %cst_15 = arith.constant 1.600000e+01 : f32
      %28 = vector.broadcast %cst_15 : f32 to vector<40x1xf32>
      %29 = arith.divf %27, %28 : vector<40x1xf32>
      %30 = vector.broadcast %29 : vector<40x1xf32> to vector<40x16xf32>
      %31 = arith.subf %25, %30 : vector<40x16xf32>
      %32 = arith.mulf %31, %31 : vector<40x16xf32>
      %cst_16 = arith.constant dense<0.000000e+00> : vector<40xf32>
      %33 = vector.multi_reduction <add>, %32, %cst_16 [1] : vector<40x16xf32> to vector<40xf32>
      %34 = vector.shape_cast %33 : vector<40xf32> to vector<40x1xf32>
      %cst_17 = arith.constant 1.600000e+01 : f32
      %35 = vector.broadcast %cst_17 : f32 to vector<40x1xf32>
      %36 = arith.divf %34, %35 : vector<40x1xf32>
      %cst_18 = arith.constant 9.99999997E-7 : f32
      %37 = vector.broadcast %cst_18 : f32 to vector<40x1xf32>
      %38 = arith.addf %36, %37 : vector<40x1xf32>
      %39 = math.rsqrt %38 : vector<40x1xf32>
      %40 = vector.broadcast %39 : vector<40x1xf32> to vector<40x16xf32>
      %41 = arith.mulf %31, %40 : vector<40x16xf32>
      %c0_19 = arith.constant 0 : index
      %c0_20 = arith.constant 0 : index
      %42 = vector.load %arg3[%c0_19, %c0_20] : memref<1x16xf32, #tpu.memory_space<vmem>>, vector<1x16xf32>
      %43 = vector.broadcast %42 : vector<1x16xf32> to vector<40x16xf32>
      %44 = arith.mulf %41, %43 : vector<40x16xf32>
      %c0_21 = arith.constant 0 : index
      %c0_22 = arith.constant 0 : index
      %45 = vector.load %arg4[%c0_21, %c0_22] : memref<1x16xf32, #tpu.memory_space<vmem>>, vector<1x16xf32>
      %46 = vector.broadcast %45 : vector<1x16xf32> to vector<40x16xf32>
      %47 = arith.addf %44, %46 : vector<40x16xf32>
      %48 = arith.truncf %47 : vector<40x16xf32> to vector<40x16xbf16>
      %c0_23 = arith.constant 0 : index
      %c0_24 = arith.constant 0 : index
      %49 = vector.load %arg8[%c0_23, %c0_24] : memref<40x16xbf16, #tpu.memory_space<vmem>>, vector<40x16xbf16>
      tpu.vector_store %arg8[%c0_23, %c0_24], %48 {strides = array<i32>} : memref<40x16xbf16, #tpu.memory_space<vmem>>, vector<40x16xbf16>,
    } else {
    }
    %c0 = arith.constant 0 : index
    %c0_1 = arith.constant 0 : index
    %3 = vector.load %arg8[%c0, %c0_1] : memref<40x16xbf16, #tpu.memory_space<vmem>>, vector<40x16xbf16>
    %c0_2 = arith.constant 0 : index
    %c0_3 = arith.constant 0 : index
    %4 = vector.load %arg5[%c0_2, %c0_3] : memref<16x128xbf16, #tpu.memory_space<vmem>>, vector<16x128xbf16>
    %cst = arith.constant dense<0.000000e+00> : vector<40x128xf32>
    %5 = tpu.matmul %3, %4, %cst {dimension_numbers = #tpu.dot_dimension_numbers<[1], [0], [0], [1], [0, 0, 1, 1], [], []>} : vector<40x16xbf16>, vector<16x128xbf16>, vector<40x128xf32> -> vector<40x128xf32>
    %c0_4 = arith.constant 0 : index
    %c0_5 = arith.constant 0 : index
    %6 = vector.load %arg6[%c0_4, %c0_5] : memref<1x128xf32, #tpu.memory_space<vmem>>, vector<1x128xf32>
    %7 = vector.broadcast %6 : vector<1x128xf32> to vector<40x128xf32>
    %8 = arith.addf %5, %7 : vector<40x128xf32>
    %9 = arith.mulf %8, %8 : vector<40x128xf32>
    %10 = arith.mulf %8, %9 : vector<40x128xf32>
    %cst_6 = arith.constant 4.471500e-02 : f32
    %11 = vector.broadcast %cst_6 : f32 to vector<40x128xf32>
    %12 = arith.mulf %11, %10 : vector<40x128xf32>
    %13 = arith.addf %8, %12 : vector<40x128xf32>
    %cst_7 = arith.constant 0.797884583 : f32
    %14 = vector.broadcast %cst_7 : f32 to vector<40x128xf32>
    %15 = arith.mulf %14, %13 : vector<40x128xf32>
    %16 = math.tanh %15 : vector<40x128xf32>
    %cst_8 = arith.constant 1.000000e+00 : f32
    %17 = vector.broadcast %cst_8 : f32 to vector<40x128xf32>
    %18 = arith.addf %17, %16 : vector<40x128xf32>
    %cst_9 = arith.constant 5.000000e-01 : f32
    %19 = vector.broadcast %cst_9 : f32 to vector<40x128xf32>
    %20 = arith.mulf %19, %18 : vector<40x128xf32>
    %21 = arith.mulf %8, %20 : vector<40x128xf32>
    %22 = arith.truncf %21 : vector<40x128xf32> to vector<40x128xbf16>
    %c0_10 = arith.constant 0 : index
    %c0_11 = arith.constant 0 : index
    %23 = vector.load %arg7[%c0_10, %c0_11] : memref<40x128xbf16, #tpu.memory_space<vmem>>, vector<40x128xbf16>
    tpu.vector_store %arg7[%c0_10, %c0_11], %22 {strides = array<i32>} : memref<40x128xbf16, #tpu.memory_space<vmem>>, vector<40x128xbf16>,
    return
  }
  func.func @transform_0(%arg0: i32, %arg1: i32) -> (i32, i32) {
    %c0_i32 = arith.constant 0 : i32
    %c0_i32_0 = arith.constant 0 : i32
    return %arg0, %c0_i32 : i32, i32
  }
  func.func @transform_1(%arg0: i32, %arg1: i32) -> (i32, i32) {
    %c0_i32 = arith.constant 0 : i32
    %c0_i32_0 = arith.constant 0 : i32
    %c0_i32_1 = arith.constant 0 : i32
    return %c0_i32, %c0_i32_0 : i32, i32
  }
  func.func @transform_2(%arg0: i32, %arg1: i32) -> (i32, i32) {
    %c0_i32 = arith.constant 0 : i32
    %c0_i32_0 = arith.constant 0 : i32
    %c0_i32_1 = arith.constant 0 : i32
    return %c0_i32, %c0_i32_0 : i32, i32
  }
  func.func @transform_3(%arg0: i32, %arg1: i32) -> (i32, i32) {
    %c0_i32 = arith.constant 0 : i32
    %c0_i32_0 = arith.constant 0 : i32
    return %c0_i32, %arg1 : i32, i32
  }
  func.func @transform_4(%arg0: i32, %arg1: i32) -> (i32, i32) {
    %c0_i32 = arith.constant 0 : i32
    %c0_i32_0 = arith.constant 0 : i32
    return %c0_i32, %arg1 : i32, i32
  }
  func.func @transform_5(%arg0: i32, %arg1: i32) -> (i32, i32) {
    %c0_i32 = arith.constant 0 : i32
    return %arg0, %arg1 : i32, i32
  }
}

module attributes {stable_mosaic.version = 11 : i64} {
  func.func @_ln_matmul_kernel(%arg0: i32, %arg1: i32, %arg2: memref<40x16xbf16, #tpu.memory_space<vmem>>, %arg3: memref<1x16xf32, #tpu.memory_space<vmem>>, %arg4: memref<1x16xf32, #tpu.memory_space<vmem>>, %arg5: memref<16x128xbf16, #tpu.memory_space<vmem>>, %arg6: memref<1x128xf32, #tpu.memory_space<vmem>>, %arg7: memref<40x128xf32, #tpu.memory_space<vmem>>, %arg8: memref<40x16xbf16, #tpu.memory_space<vmem>>) attributes {dimension_semantics = [#tpu.dimension_semantics<parallel>, #tpu.dimension_semantics<arbitrary>], iteration_bounds = array<i64: 1, 1>, scalar_prefetch = 0 : i64, scratch_operands = 1 : i64, tpu.core_type = #tpu.core_type<tc>, window_params = [{transform_indices = @transform_0, window_bounds = array<i64: 40, 16>}, {pipeline_mode = #tpu.pipeline_mode<synchronous>, transform_indices = @transform_1, window_bounds = array<i64: 1, 16>}, {pipeline_mode = #tpu.pipeline_mode<synchronous>, transform_indices = @transform_2, window_bounds = array<i64: 1, 16>}, {transform_indices = @transform_3, window_bounds = array<i64: 16, 128>}, {transform_indices = @transform_4, window_bounds = array<i64: 1, 128>}, {transform_indices = @transform_5, window_bounds = array<i64: 40, 128>}]} {
    %c0_i32 = arith.constant 0 : i32
    %0 = arith.cmpi eq, %arg1, %c0_i32 : i32
    %1 = arith.extui %0 : i1 to i32
    %c0_i32_0 = arith.constant 0 : i32
    %2 = arith.cmpi ne, %1, %c0_i32_0 : i32
    scf.if %2 {
      %c0_8 = arith.constant 0 : index
      %c0_9 = arith.constant 0 : index
      %10 = vector.load %arg2[%c0_8, %c0_9] : memref<40x16xbf16, #tpu.memory_space<vmem>>, vector<40x16xbf16>
      %11 = arith.extf %10 : vector<40x16xbf16> to vector<40x16xf32>
      %cst_10 = arith.constant dense<0.000000e+00> : vector<40xf32>
      %12 = vector.multi_reduction <add>, %11, %cst_10 [1] : vector<40x16xf32> to vector<40xf32>
      %13 = vector.shape_cast %12 : vector<40xf32> to vector<40x1xf32>
      %cst_11 = arith.constant 1.600000e+01 : f32
      %14 = vector.broadcast %cst_11 : f32 to vector<40x1xf32>
      %15 = arith.divf %13, %14 : vector<40x1xf32>
      %16 = vector.broadcast %15 : vector<40x1xf32> to vector<40x16xf32>
      %17 = arith.subf %11, %16 : vector<40x16xf32>
      %18 = arith.mulf %17, %17 : vector<40x16xf32>
      %cst_12 = arith.constant dense<0.000000e+00> : vector<40xf32>
      %19 = vector.multi_reduction <add>, %18, %cst_12 [1] : vector<40x16xf32> to vector<40xf32>
      %20 = vector.shape_cast %19 : vector<40xf32> to vector<40x1xf32>
      %cst_13 = arith.constant 1.600000e+01 : f32
      %21 = vector.broadcast %cst_13 : f32 to vector<40x1xf32>
      %22 = arith.divf %20, %21 : vector<40x1xf32>
      %cst_14 = arith.constant 9.99999997E-7 : f32
      %23 = vector.broadcast %cst_14 : f32 to vector<40x1xf32>
      %24 = arith.addf %22, %23 : vector<40x1xf32>
      %25 = math.rsqrt %24 : vector<40x1xf32>
      %26 = vector.broadcast %25 : vector<40x1xf32> to vector<40x16xf32>
      %27 = arith.mulf %17, %26 : vector<40x16xf32>
      %c0_15 = arith.constant 0 : index
      %c0_16 = arith.constant 0 : index
      %28 = vector.load %arg3[%c0_15, %c0_16] : memref<1x16xf32, #tpu.memory_space<vmem>>, vector<1x16xf32>
      %29 = vector.broadcast %28 : vector<1x16xf32> to vector<40x16xf32>
      %30 = arith.mulf %27, %29 : vector<40x16xf32>
      %c0_17 = arith.constant 0 : index
      %c0_18 = arith.constant 0 : index
      %31 = vector.load %arg4[%c0_17, %c0_18] : memref<1x16xf32, #tpu.memory_space<vmem>>, vector<1x16xf32>
      %32 = vector.broadcast %31 : vector<1x16xf32> to vector<40x16xf32>
      %33 = arith.addf %30, %32 : vector<40x16xf32>
      %34 = arith.truncf %33 : vector<40x16xf32> to vector<40x16xbf16>
      %c0_19 = arith.constant 0 : index
      %c0_20 = arith.constant 0 : index
      %35 = vector.load %arg8[%c0_19, %c0_20] : memref<40x16xbf16, #tpu.memory_space<vmem>>, vector<40x16xbf16>
      tpu.vector_store %arg8[%c0_19, %c0_20], %34 {strides = array<i32>} : memref<40x16xbf16, #tpu.memory_space<vmem>>, vector<40x16xbf16>,
    } else {
    }
    %c0 = arith.constant 0 : index
    %c0_1 = arith.constant 0 : index
    %3 = vector.load %arg8[%c0, %c0_1] : memref<40x16xbf16, #tpu.memory_space<vmem>>, vector<40x16xbf16>
    %c0_2 = arith.constant 0 : index
    %c0_3 = arith.constant 0 : index
    %4 = vector.load %arg5[%c0_2, %c0_3] : memref<16x128xbf16, #tpu.memory_space<vmem>>, vector<16x128xbf16>
    %cst = arith.constant dense<0.000000e+00> : vector<40x128xf32>
    %5 = tpu.matmul %3, %4, %cst {dimension_numbers = #tpu.dot_dimension_numbers<[1], [0], [0], [1], [0, 0, 1, 1], [], []>} : vector<40x16xbf16>, vector<16x128xbf16>, vector<40x128xf32> -> vector<40x128xf32>
    %c0_4 = arith.constant 0 : index
    %c0_5 = arith.constant 0 : index
    %6 = vector.load %arg6[%c0_4, %c0_5] : memref<1x128xf32, #tpu.memory_space<vmem>>, vector<1x128xf32>
    %7 = vector.broadcast %6 : vector<1x128xf32> to vector<40x128xf32>
    %8 = arith.addf %5, %7 : vector<40x128xf32>
    %c0_6 = arith.constant 0 : index
    %c0_7 = arith.constant 0 : index
    %9 = vector.load %arg7[%c0_6, %c0_7] : memref<40x128xf32, #tpu.memory_space<vmem>>, vector<40x128xf32>
    tpu.vector_store %arg7[%c0_6, %c0_7], %8 {strides = array<i32>} : memref<40x128xf32, #tpu.memory_space<vmem>>, vector<40x128xf32>,
    return
  }
  func.func @transform_0(%arg0: i32, %arg1: i32) -> (i32, i32) {
    %c0_i32 = arith.constant 0 : i32
    %c0_i32_0 = arith.constant 0 : i32
    return %arg0, %c0_i32 : i32, i32
  }
  func.func @transform_1(%arg0: i32, %arg1: i32) -> (i32, i32) {
    %c0_i32 = arith.constant 0 : i32
    %c0_i32_0 = arith.constant 0 : i32
    %c0_i32_1 = arith.constant 0 : i32
    return %c0_i32, %c0_i32_0 : i32, i32
  }
  func.func @transform_2(%arg0: i32, %arg1: i32) -> (i32, i32) {
    %c0_i32 = arith.constant 0 : i32
    %c0_i32_0 = arith.constant 0 : i32
    %c0_i32_1 = arith.constant 0 : i32
    return %c0_i32, %c0_i32_0 : i32, i32
  }
  func.func @transform_3(%arg0: i32, %arg1: i32) -> (i32, i32) {
    %c0_i32 = arith.constant 0 : i32
    %c0_i32_0 = arith.constant 0 : i32
    return %c0_i32, %arg1 : i32, i32
  }
  func.func @transform_4(%arg0: i32, %arg1: i32) -> (i32, i32) {
    %c0_i32 = arith.constant 0 : i32
    %c0_i32_0 = arith.constant 0 : i32
    return %c0_i32, %arg1 : i32, i32
  }
  func.func @transform_5(%arg0: i32, %arg1: i32) -> (i32, i32) {
    %c0_i32 = arith.constant 0 : i32
    return %arg0, %arg1 : i32, i32
  }
}

</mosaic_0001>

<bundles_post_ra>
// kernel: _lambda_.24
= control target key start
LH: loop header
LB: loop body
LE: loop exit
PB: predicated region body
PF: predicated region fallthrough
CT: control target
= control target key end

     0   :  { %s304_s1 = inlined_call_operand.vmem [shape: bf16[128,128], index: 1, kind: input, shape index: {}]   ;;  %s305_s0 = inlined_call_operand.vmem [shape: bf16[32,128], index: 0, kind: input, shape index: {}]   ;;  %s306_s2 = inlined_call_operand.vmem [shape: f32[1,128], index: 2, kind: input, shape index: {}]   ;;  %s307_s3 = inlined_call_operand.vmem [shape: bf16[32,128], index: 3, kind: output, shape index: {}]  }
   0x1   :  { %v235_v0 = vld [vmem:[%s304_s1 + $0x38] sm:$0xff]   ;;  %v236_v1 = vld [vmem:[%s304_s1 + $0x30] sm:$0xff]   ;;  %v237_v2 = vld [vmem:[%s304_s1 + $0x28] sm:$0xff]  }
   0x2   :  { %215 = vmatprep.subr.bf16.mxu0 %v235_v0  ;;  %v238_v3 = vld [vmem:[%s304_s1 + $0x20] sm:$0xff]   ;;  %v239_v5 = vld [vmem:[%s304_s1 + $0x18] sm:$0xff]   ;;  %v240_v6 = vld [vmem:[%s304_s1 + $0x10] sm:$0xff]  }
   0x3   :  { %216 = vmatpush3.bf16.msra.mxu0 %v235_v0  ;;  %v243_v4 = vld [vmem:[%s305_s0] sm:$0xff]   ;;  %v241_v7 = vld [vmem:[%s304_s1 + $0x8] sm:$0xff]  }
   0x4   :  { %217 = vmatprep.subr.bf16.mxu0 %v236_v1  ;;  %231 = vmatprep.mubr.bf16.mxu0 %v243_v4  ;;  %v242_v8 = vld [vmem:[%s304_s1] sm:$0xff]   ;;  %v244_v9 = vld [vmem:[%s305_s0 + $0x8] sm:$0xff]  }
   0x5   :  { %v175_v11 = vld [vmem:[%s306_s2] ss:$0 sm:$0xff] }
   0x7   :  { %218 = vmatpush3.bf16.msra.mxu0 %v236_v1 }
   0x8   :  { %219 = vmatprep.subr.bf16.mxu0 %v237_v2 }
   0xb   :  { %220 = vmatpush3.bf16.msra.mxu0 %v237_v2 }
   0xc   :  { %221 = vmatprep.subr.bf16.mxu0 %v238_v3 }
   0xf   :  { %222 = vmatpush3.bf16.msra.mxu0 %v238_v3 }
  0x10   :  { %223 = vmatprep.subr.bf16.mxu0 %v239_v5 }
  0x13   :  { %224 = vmatpush3.bf16.msra.mxu0 %v239_v5 }
  0x14   :  { %225 = vmatprep.subr.bf16.mxu0 %v240_v6 }
  0x17   :  { %226 = vmatpush3.bf16.msra.mxu0 %v240_v6 }
  0x18   :  { %227 = vmatprep.subr.bf16.mxu0 %v241_v7 }
  0x1b   :  { %228 = vmatpush3.bf16.msra.mxu0 %v241_v7 }
  0x1c   :  { %229 = vmatprep.subr.bf16.mxu0 %v242_v8 }
  0x1f   :  { %230 = vmatpush3.bf16.msra.mxu0 %v242_v8 }
  0x22   :  { %232 = vmatmul.mubr.bf16.vlgmr.msra.gmra.mxu0 %v244_v9 }
  0xe2   :  { %v233_v10 = vpop.f32.mrf.mxu0 }
  0xe3   :  { %v145_v14 = vadd.f32 %v233_v10, %v175_v11 }
  0xe4   :  { %v136_v12 = vpop.f32.mrf.mxu0 }
  0xe5   :  { %v137_v17 = vadd.f32 %v175_v11, %v136_v12 }
  0xe6   :  { %v234_v13 = vpop.f32.mrf.mxu0 }
  0xe7   :  { %v148_v15 = vadd.f32 %v234_v13, %v175_v11 }
  0xe8   :  { %v139_v16 = vpop.f32.mrf.mxu0 }
  0xe9   :  { %v202_v18 = vpack.c.bf16 %v148_v15, %v145_v14  ;;  %v140_v19 = vadd.f32 %v175_v11, %v139_v16 }
  0xeb   :  { %204 = vst [vmem:[%s307_s3 + $0x8] sm:$0xff] %v202_v18   ;;  %v197_v20 = vpack.c.bf16 %v140_v19, %v137_v17 }
  0xed   :  { %198 = vst [vmem:[%s307_s3] sm:$0xff] %v197_v20  }

// kernel: _lambda_.25
= control target key start
LH: loop header
LB: loop body
LE: loop exit
PB: predicated region body
PF: predicated region fallthrough
CT: control target
= control target key end

     0   :  { %vm29_vm0 = vcmask 261120   ;;  %v219_v16 = vmov 0.0   ;;  %vm220_vm1 = vmmov 0   ;;  %vm83_vm2 = vcmask 257024   ;;  %s277_s0 = inlined_call_operand.vmem [shape: bf16[16,32], index: 0, kind: input, shape index: {}]   ;;  %s278_s3 = inlined_call_operand.vmem [shape: bf16[32,128], index: 3, kind: input, shape index: {}]   ;;  %s279_s1 = inlined_call_operand.vmem [shape: f32[1,32], index: 1, kind: input, shape index: {}]   ;;  %s280_s2 = inlined_call_operand.vmem [shape: f32[1,32], index: 2, kind: input, shape index: {}]   ;;  %s281_s4 = inlined_call_operand.vmem [shape: f32[1,128], index: 4, kind: input, shape index: {}]   ;;  %s282_s5 = inlined_call_operand.vmem [shape: bf16[16,128], index: 5, kind: output, shape index: {}]  }
   0x1   :  { %v191_v0 = vld [vmem:[%s277_s0] sm:$0xff]   ;;  %v212_v15 = vld [vmem:[%s278_s3 + $0x8] sm:$0xff]   ;;  %202 = vmatprep.subr.bf16.mxu0 %v219_v16  ;;  %206 = vmatprep.mubr.msk.bf16.mxu0 %vm220_vm1, %v219_v16 }
   0x2   :  { %v192_v1 = vunpack.c.l.bf16 %v191_v0  ;;  %v193_v2 = vunpack.c.h.bf16 %v191_v0  ;;  %203 = vmatpush3.bf16.msra.mxu0 %v212_v15  ;;  %v213_v17 = vld [vmem:[%s278_s3] sm:$0xff]  }
   0x3   :  { %204 = vmatprep.subr.bf16.mxu0 %v219_v16  ;;  %v175_v25 = vld [vmem:[%s279_s1] ss:$0 sm:$0xff] }
   0x4   :  { %v30_v3 = vsel %vm29_vm0, %v192_v1, 0.0  ;;  %v33_v4 = vsel %vm29_vm0, %v193_v2, 0.0  ;;  %v176_v27 = vld [vmem:[%s280_s2] ss:$0 sm:$0xff] }
   0x5   :  { %31 = vadd.xlane.f32.xlu0 %v30_v3  ;;  %v179_v38 = vld [vmem:[%s281_s4] ss:$0 sm:$0xff] }
   0x6   :  { %205 = vmatpush3.bf16.msra.mxu0 %v213_v17 }
   0x9   :  { %34 = vadd.xlane.f32.xlu0 %v33_v4 }
  0x8e   :  { %v32_v5 = vpop.xlane.xlu0 %31 }
  0x8f   :  { %v37_v6 = vmul.f32 0.03125, %v32_v5 }
  0x91   :  { %v39_v7 = vsub.f32 %v192_v1, %v37_v6 }
  0x92   :  { %v35_v8 = vpop.xlane.xlu0 %34 }
  0x93   :  { %v38_v9 = vmul.f32 0.03125, %v35_v8  ;;  %v41_v10 = vmul.f32 %v39_v7, %v39_v7 }
  0x95   :  { %v40_v11 = vsub.f32 %v193_v2, %v38_v9  ;;  %v43_v12 = vsel %vm29_vm0, %v41_v10, 0.0 }
  0x96   :  { %44 = vadd.xlane.f32.xlu1 %v43_v12 }
  0x97   :  { %v42_v13 = vmul.f32 %v40_v11, %v40_v11 }
  0x99   :  { %v46_v14 = vsel %vm29_vm0, %v42_v13, 0.0 }
  0x9a   :  { %47 = vadd.xlane.f32.xlu1 %v46_v14 }
 0x11f   :  { %v45_v18 = vpop.xlane.xlu1 %44 }
 0x120   :  { %v49_v19 = vmul.f32 0.03125, %v45_v18 }
 0x122   :  { %v51_v20 = vadd.f32 1e-06, %v49_v19 }
 0x123   :  { %v48_v21 = vpop.xlane.xlu1 %47 }
 0x124   :  { %215 = vrsqrt.f32 %v51_v20  ;;  %v50_v22 = vmul.f32 0.03125, %v48_v21 }
 0x126   :  { %v52_v23 = vadd.f32 1e-06, %v50_v22 }
 0x128   :  { %217 = vrsqrt.f32 %v52_v23 }
 0x131   :  { %v216_v24 = vpop.eup %215 }
 0x132   :  { %v55_v26 = vmul.f32 %v216_v24, %v39_v7 }
 0x134   :  { %v64_v28 = vmul.f32 %v175_v25, %v55_v26 }
 0x135   :  { %v218_v29 = vpop.eup %217 }
 0x136   :  { %v73_v30 = vadd.f32 %v176_v27, %v64_v28  ;;  %v56_v31 = vmul.f32 %v218_v29, %v40_v11 }
 0x138   :  { %v186_v32 = vpack.c.bf16 %v73_v30, %v73_v30  ;;  %v65_v33 = vmul.f32 %v175_v25, %v56_v31 }
 0x13a   :  { %84 = vst.msk [vmem:[#allocation2] sm:$0xf] %vm83_vm2, %v186_v32  ;;  %v74_v34 = vadd.f32 %v176_v27, %v65_v33 }
 0x13c   :  { %v187_v35 = vpack.c.bf16 %v74_v34, %v74_v34 }
 0x13e   :  { %85 = vst.msk [vmem:[#allocation2 + $0x4] sm:$0xf] %vm83_vm2, %v187_v35 }
 0x145   :  { %v214_v36 = vld [vmem:[#allocation2] sm:$0xff]  }
 0x146   :  { %207 = vmatmul.mubr.msk.bf16.vlgmr.msra.gmra.mxu0 %vm29_vm0, %v214_v36 }
 0x206   :  { %v154_v37 = vpop.f32.mrf.mxu0 }
 0x207   :  { %v155_v41 = vadd.f32 %v179_v38, %v154_v37 }
 0x208   :  { %v208_v39 = vpop.f32.mrf.mxu0 }
 0x20a   :  { %v157_v40 = vpop.f32.mrf.mxu0 }
 0x20b   :  { %v158_v42 = vadd.f32 %v179_v38, %v157_v40 }
 0x20c   :  { %v209_v43 = vpop.f32.mrf.mxu0 }
 0x20d   :  { %v197_v44 = vpack.c.bf16 %v158_v42, %v155_v41 }
 0x20f   :  { %198 = vst [vmem:[%s282_s5] sm:$0xff] %v197_v44  }

// kernel: _lambda_.27
= control target key start
LH: loop header
LB: loop body
LE: loop exit
PB: predicated region body
PF: predicated region fallthrough
CT: control target
= control target key end

     0   :  { %v221_v0 = vmov 0.0   ;;  %vm222_vm0 = vmmov 0   ;;  %s284_s1 = inlined_call_operand.vmem [shape: bf16[128,128], index: 1, kind: input, shape index: {}]   ;;  %s285_s0 = inlined_call_operand.vmem [shape: bf16[16,128], index: 0, kind: input, shape index: {}]   ;;  %s286_s2 = inlined_call_operand.vmem [shape: f32[1,128], index: 2, kind: input, shape index: {}]   ;;  %s287_s3 = inlined_call_operand.vmem [shape: bf16[16,128], index: 3, kind: input, shape index: {}]   ;;  %s288_s4 = inlined_call_operand.vmem [shape: bf16[16,128], index: 4, kind: output, shape index: {}]  }
   0x1   :  { %190 = vmatprep.subr.bf16.mxu0 %v221_v0  ;;  %v212_v1 = vld [vmem:[%s284_s1 + $0x38] sm:$0xff]   ;;  %206 = vmatprep.mubr.msk.bf16.mxu0 %vm222_vm0, %v221_v0  ;;  %v213_v2 = vld [vmem:[%s284_s1 + $0x30] sm:$0xff]   ;;  %v214_v3 = vld [vmem:[%s284_s1 + $0x28] sm:$0xff]  }
   0x2   :  { %191 = vmatpush3.bf16.msra.mxu0 %v212_v1  ;;  %v215_v4 = vld [vmem:[%s284_s1 + $0x20] sm:$0xff]   ;;  %v216_v5 = vld [vmem:[%s284_s1 + $0x18] sm:$0xff]   ;;  %v217_v6 = vld [vmem:[%s284_s1 + $0x10] sm:$0xff]  }
   0x3   :  { %192 = vmatprep.subr.bf16.mxu0 %v221_v0  ;;  %v218_v7 = vld [vmem:[%s284_s1 + $0x8] sm:$0xff]   ;;  %v219_v8 = vld [vmem:[%s284_s1] sm:$0xff]  }
   0x4   :  { %v220_v9 = vld [vmem:[%s285_s0] sm:$0xff]  }
   0x5   :  { %v158_v10 = vld [vmem:[%s286_s2] ss:$0 sm:$0xff] }
   0x6   :  { %193 = vmatpush3.bf16.msra.mxu0 %v213_v2  ;;  %v173_v12 = vld [vmem:[%s287_s3] sm:$0xff]  }
   0x7   :  { %194 = vmatprep.subr.bf16.mxu0 %v221_v0  ;;  %v174_v15 = vunpack.c.l.bf16 %v173_v12  ;;  %v175_v16 = vunpack.c.h.bf16 %v173_v12 }
   0xa   :  { %195 = vmatpush3.bf16.msra.mxu0 %v214_v3 }
   0xb   :  { %196 = vmatprep.subr.bf16.mxu0 %v221_v0 }
   0xe   :  { %197 = vmatpush3.bf16.msra.mxu0 %v215_v4 }
   0xf   :  { %198 = vmatprep.subr.bf16.mxu0 %v221_v0 }
  0x12   :  { %199 = vmatpush3.bf16.msra.mxu0 %v216_v5 }
  0x13   :  { %200 = vmatprep.subr.bf16.mxu0 %v221_v0 }
  0x16   :  { %201 = vmatpush3.bf16.msra.mxu0 %v217_v6 }
  0x17   :  { %202 = vmatprep.subr.bf16.mxu0 %v221_v0 }
  0x1a   :  { %203 = vmatpush3.bf16.msra.mxu0 %v218_v7 }
  0x1b   :  { %204 = vmatprep.subr.bf16.mxu0 %v221_v0 }
  0x1e   :  { %205 = vmatpush3.bf16.msra.mxu0 %v219_v8 }
  0x21   :  { %207 = vmatmul.mubr.bf16.vlgmr.msra.gmra.mxu0 %v220_v9 }
  0xe1   :  { %v131_v11 = vpop.f32.mrf.mxu0 }
  0xe2   :  { %v132_v14 = vadd.f32 %v158_v10, %v131_v11 }
  0xe3   :  { %v208_v13 = vpop.f32.mrf.mxu0 }
  0xe4   :  { %v142_v20 = vadd.f32 %v174_v15, %v132_v14 }
  0xe5   :  { %v134_v17 = vpop.f32.mrf.mxu0 }
  0xe6   :  { %v135_v18 = vadd.f32 %v158_v10, %v134_v17 }
  0xe7   :  { %v209_v19 = vpop.f32.mrf.mxu0 }
  0xe8   :  { %v143_v21 = vadd.f32 %v175_v16, %v135_v18 }
  0xea   :  { %v179_v22 = vpack.c.bf16 %v143_v21, %v142_v20 }
  0xec   :  { %180 = vst [vmem:[%s288_s4] sm:$0xff] %v179_v22  }

// kernel: _lambda_.28
= control target key start
LH: loop header
LB: loop body
LE: loop exit
PB: predicated region body
PF: predicated region fallthrough
CT: control target
= control target key end

     0   :  { %vm29_vm0 = vcmask 261120   ;;  %v241_v16 = vmov 0.0   ;;  %vm242_vm1 = vmmov 0   ;;  %vm83_vm2 = vcmask 257024   ;;  %s299_s0 = inlined_call_operand.vmem [shape: bf16[16,32], index: 0, kind: input, shape index: {}]   ;;  %s300_s3 = inlined_call_operand.vmem [shape: bf16[32,128], index: 3, kind: input, shape index: {}]   ;;  %s301_s1 = inlined_call_operand.vmem [shape: f32[1,32], index: 1, kind: input, shape index: {}]   ;;  %s302_s2 = inlined_call_operand.vmem [shape: f32[1,32], index: 2, kind: input, shape index: {}]   ;;  %s303_s4 = inlined_call_operand.vmem [shape: f32[1,128], index: 4, kind: input, shape index: {}]   ;;  %s304_s5 = inlined_call_operand.vmem [shape: bf16[16,128], index: 5, kind: output, shape index: {}]  }
   0x1   :  { %v209_v0 = vld [vmem:[%s299_s0] sm:$0xff]   ;;  %v230_v15 = vld [vmem:[%s300_s3 + $0x8] sm:$0xff]   ;;  %220 = vmatprep.subr.bf16.mxu0 %v241_v16  ;;  %224 = vmatprep.mubr.msk.bf16.mxu0 %vm242_vm1, %v241_v16 }
   0x2   :  { %v210_v1 = vunpack.c.l.bf16 %v209_v0  ;;  %v211_v2 = vunpack.c.h.bf16 %v209_v0  ;;  %221 = vmatpush3.bf16.msra.mxu0 %v230_v15  ;;  %v231_v17 = vld [vmem:[%s300_s3] sm:$0xff]  }
   0x3   :  { %222 = vmatprep.subr.bf16.mxu0 %v241_v16  ;;  %v193_v25 = vld [vmem:[%s301_s1] ss:$0 sm:$0xff] }
   0x4   :  { %v30_v3 = vsel %vm29_vm0, %v210_v1, 0.0  ;;  %v33_v4 = vsel %vm29_vm0, %v211_v2, 0.0  ;;  %v194_v27 = vld [vmem:[%s302_s2] ss:$0 sm:$0xff] }
   0x5   :  { %31 = vadd.xlane.f32.xlu0 %v30_v3  ;;  %v197_v37 = vld [vmem:[%s303_s4] ss:$0 sm:$0xff] }
   0x6   :  { %223 = vmatpush3.bf16.msra.mxu0 %v231_v17 }
   0x9   :  { %34 = vadd.xlane.f32.xlu0 %v33_v4 }
  0x8e   :  { %v32_v5 = vpop.xlane.xlu0 %31 }
  0x8f   :  { %v37_v6 = vmul.f32 0.03125, %v32_v5 }
  0x91   :  { %v39_v7 = vsub.f32 %v210_v1, %v37_v6 }
  0x92   :  { %v35_v8 = vpop.xlane.xlu0 %34 }
  0x93   :  { %v38_v9 = vmul.f32 0.03125, %v35_v8  ;;  %v41_v10 = vmul.f32 %v39_v7, %v39_v7 }
  0x95   :  { %v40_v11 = vsub.f32 %v211_v2, %v38_v9  ;;  %v43_v12 = vsel %vm29_vm0, %v41_v10, 0.0 }
  0x96   :  { %44 = vadd.xlane.f32.xlu1 %v43_v12 }
  0x97   :  { %v42_v13 = vmul.f32 %v40_v11, %v40_v11 }
  0x99   :  { %v46_v14 = vsel %vm29_vm0, %v42_v13, 0.0 }
  0x9a   :  { %47 = vadd.xlane.f32.xlu1 %v46_v14 }
 0x11f   :  { %v45_v18 = vpop.xlane.xlu1 %44 }
 0x120   :  { %v49_v19 = vmul.f32 0.03125, %v45_v18 }
 0x122   :  { %v51_v20 = vadd.f32 1e-06, %v49_v19 }
 0x123   :  { %v48_v21 = vpop.xlane.xlu1 %47 }
 0x124   :  { %233 = vrsqrt.f32 %v51_v20  ;;  %v50_v22 = vmul.f32 0.03125, %v48_v21 }
 0x126   :  { %v52_v23 = vadd.f32 1e-06, %v50_v22 }
 0x128   :  { %235 = vrsqrt.f32 %v52_v23 }
 0x131   :  { %v234_v24 = vpop.eup %233 }
 0x132   :  { %v55_v26 = vmul.f32 %v234_v24, %v39_v7 }
 0x134   :  { %v64_v28 = vmul.f32 %v193_v25, %v55_v26 }
 0x135   :  { %v236_v29 = vpop.eup %235 }
 0x136   :  { %v73_v30 = vadd.f32 %v194_v27, %v64_v28  ;;  %v56_v31 = vmul.f32 %v236_v29, %v40_v11 }
 0x138   :  { %v204_v32 = vpack.c.bf16 %v73_v30, %v73_v30  ;;  %v65_v33 = vmul.f32 %v193_v25, %v56_v31 }
 0x13a   :  { %84 = vst.msk [vmem:[#allocation2] sm:$0xf] %vm83_vm2, %v204_v32  ;;  %v74_v34 = vadd.f32 %v194_v27, %v65_v33 }
 0x13c   :  { %v205_v35 = vpack.c.bf16 %v74_v34, %v74_v34 }
 0x13e   :  { %85 = vst.msk [vmem:[#allocation2 + $0x4] sm:$0xf] %vm83_vm2, %v205_v35 }
 0x145   :  { %v232_v36 = vld [vmem:[#allocation2] sm:$0xff]  }
 0x146   :  { %225 = vmatmul.mubr.msk.bf16.vlgmr.msra.gmra.mxu0 %vm29_vm0, %v232_v36 }
 0x206   :  { %v154_v38 = vpop.f32.mrf.mxu0 }
 0x207   :  { %v155_v39 = vadd.f32 %v197_v37, %v154_v38 }
 0x208   :  { %v226_v40 = vpop.f32.mrf.mxu0 }
 0x209   :  { %v161_v41 = vmul.f32 %v155_v39, %v155_v39 }
 0x20a   :  { %v157_v42 = vpop.f32.mrf.mxu0 }
 0x20b   :  { %v163_v43 = vmul.f32 %v161_v41, %v155_v39  ;;  %v158_v44 = vadd.f32 %v197_v37, %v157_v42 }
 0x20c   :  { %v227_v45 = vpop.f32.mrf.mxu0 }
 0x20d   :  { %v165_v46 = vmul.f32 0.044715, %v163_v43  ;;  %v162_v47 = vmul.f32 %v158_v44, %v158_v44 }
 0x20f   :  { %v167_v48 = vadd.f32 %v165_v46, %v155_v39  ;;  %v164_v49 = vmul.f32 %v162_v47, %v158_v44 }
 0x211   :  { %v169_v50 = vmul.f32 0.7978846, %v167_v48  ;;  %v166_v51 = vmul.f32 0.044715, %v164_v49 }
 0x213   :  { %237 = vtanh.f32 %v169_v50  ;;  %v168_v52 = vadd.f32 %v166_v51, %v158_v44 }
 0x215   :  { %v170_v53 = vmul.f32 0.7978846, %v168_v52 }
 0x217   :  { %239 = vtanh.f32 %v170_v53 }
 0x220   :  { %v238_v54 = vpop.eup %237 }
 0x221   :  { %v173_v55 = vadd.f32 1.0, %v238_v54 }
 0x223   :  { %v175_v57 = vmul.f32 0.5, %v173_v55 }
 0x224   :  { %v240_v56 = vpop.eup %239 }
 0x225   :  { %v174_v58 = vadd.f32 1.0, %v240_v56  ;;  %v177_v60 = vmul.f32 %v175_v57, %v155_v39 }
 0x227   :  { %v176_v59 = vmul.f32 0.5, %v174_v58 }
 0x229   :  { %v178_v61 = vmul.f32 %v176_v59, %v158_v44 }
 0x22b   :  { %v215_v62 = vpack.c.bf16 %v178_v61, %v177_v60 }
 0x22d   :  { %216 = vst [vmem:[%s304_s5] sm:$0xff] %v215_v62  }

// kernel: _lambda_.47
= control target key start
LH: loop header
LB: loop body
LE: loop exit
PB: predicated region body
PF: predicated region fallthrough
CT: control target
= control target key end

     0   :  { %vm18_vm0 = vcmask 261120   ;;  %s121_s0 = inlined_call_operand.vmem [shape: bf16[16,32], index: 0, kind: input, shape index: {}]   ;;  %s122_s1 = inlined_call_operand.vmem [shape: f32[1,32], index: 1, kind: input, shape index: {}]   ;;  %s123_s2 = inlined_call_operand.vmem [shape: f32[1,32], index: 2, kind: input, shape index: {}]   ;;  %s124_s3 = inlined_call_operand.vmem [shape: f32[16,32], index: 3, kind: output, shape index: {}]  }
   0x1   :  { %v73_v0 = vld [vmem:[%s121_s0] sm:$0xff]  }
   0x2   :  { %v74_v1 = vunpack.c.l.bf16 %v73_v0  ;;  %v75_v2 = vunpack.c.h.bf16 %v73_v0  ;;  %v70_v22 = vld [vmem:[%s122_s1] ss:$0 sm:$0xff] }
   0x3   :  { %v71_v24 = vld [vmem:[%s123_s2] ss:$0 sm:$0xff] }
   0x4   :  { %v19_v3 = vsel %vm18_vm0, %v74_v1, 0.0  ;;  %v22_v4 = vsel %vm18_vm0, %v75_v2, 0.0 }
   0x5   :  { %20 = vadd.xlane.f32.xlu0 %v19_v3 }
   0x9   :  { %23 = vadd.xlane.f32.xlu0 %v22_v4 }
  0x8e   :  { %v21_v5 = vpop.xlane.xlu0 %20 }
  0x8f   :  { %v26_v6 = vmul.f32 0.03125, %v21_v5 }
  0x91   :  { %v28_v7 = vsub.f32 %v74_v1, %v26_v6 }
  0x92   :  { %v24_v8 = vpop.xlane.xlu0 %23 }
  0x93   :  { %v27_v9 = vmul.f32 0.03125, %v24_v8  ;;  %v30_v10 = vmul.f32 %v28_v7, %v28_v7 }
  0x95   :  { %v29_v11 = vsub.f32 %v75_v2, %v27_v9  ;;  %v32_v12 = vsel %vm18_vm0, %v30_v10, 0.0 }
  0x96   :  { %33 = vadd.xlane.f32.xlu1 %v32_v12 }
  0x97   :  { %v31_v13 = vmul.f32 %v29_v11, %v29_v11 }
  0x99   :  { %v35_v14 = vsel %vm18_vm0, %v31_v13, 0.0 }
  0x9a   :  { %36 = vadd.xlane.f32.xlu1 %v35_v14 }
 0x11f   :  { %v34_v15 = vpop.xlane.xlu1 %33 }
 0x120   :  { %v38_v16 = vmul.f32 0.03125, %v34_v15 }
 0x122   :  { %v40_v17 = vadd.f32 1e-06, %v38_v16 }
 0x123   :  { %v37_v18 = vpop.xlane.xlu1 %36 }
 0x124   :  { %76 = vrsqrt.f32 %v40_v17  ;;  %v39_v19 = vmul.f32 0.03125, %v37_v18 }
 0x126   :  { %v41_v20 = vadd.f32 1e-06, %v39_v19 }
 0x128   :  { %78 = vrsqrt.f32 %v41_v20 }
 0x131   :  { %v77_v21 = vpop.eup %76 }
 0x132   :  { %v44_v23 = vmul.f32 %v77_v21, %v28_v7 }
 0x134   :  { %v53_v25 = vmul.f32 %v70_v22, %v44_v23 }
 0x135   :  { %v79_v26 = vpop.eup %78 }
 0x136   :  { %v62_v27 = vadd.f32 %v71_v24, %v53_v25  ;;  %v45_v28 = vmul.f32 %v79_v26, %v29_v11 }
 0x138   :  { %64 = vst.msk [vmem:[%s124_s3] sm:$0xff] %vm18_vm0, %v62_v27  ;;  %v54_v29 = vmul.f32 %v70_v22, %v45_v28 }
 0x13a   :  { %v63_v30 = vadd.f32 %v71_v24, %v54_v29 }
 0x13c   :  { %65 = vst.msk [vmem:[%s124_s3 + $0x8] sm:$0xff] %vm18_vm0, %v63_v30 }

// kernel: _lambda_.26
= control target key start
LH: loop header
LB: loop body
LE: loop exit
PB: predicated region body
PF: predicated region fallthrough
CT: control target
= control target key end

     0   :  { %s4278_s12 = smov 0   ;;  %s4280_s13 = smov 0   ;;  %s5302_s0 = inlined_call_operand.vmem [shape: bf16[2,4,128,8], index: 0, kind: input, shape index: {}]   ;;  %s5303_s1 = inlined_call_operand.vmem [shape: bf16[2,4,128,8], index: 1, kind: input, shape index: {}]   ;;  %s5304_s2 = inlined_call_operand.vmem [shape: bf16[2,4,128,8], index: 2, kind: input, shape index: {}]   ;;  %s5305_s3 = inlined_call_operand.vmem [shape: bf16[2,4,128,8], index: 3, kind: output, shape index: {}]  }
   0x1   :  { %s4282_s14 = smov 0  }
   0x2 LB: > { %s25_s15 = sadd.s32 1, %s4252_s13  ;;  %p3171_p0 = scmp.ge.s32.totalorder %s4256_s14, 1  ;;  %s4256_s14 = sphi %s4282_s14, %s13_s14   ;;  %s4252_s13 = sphi %s4280_s13, %s5421_s13   ;;  %s4248_s12 = sphi %s4278_s12, %s5420_s12  }
   0x3   : > { %p27_p1 = scmp.ge.s32.totalorder %s25_s15, 2  ;;  %p195_p2 = scmp.lt.s32.totalorder %s4256_s14, 3 }
   0x5   : > { %s5423_s15 = smov (%p27_p1, %s25_s15), 0  ;;  %p196_p3 = pnand %p3171_p0, %p195_p2 }
   0x7   : > { %199 = sbr.rel (%p196_p3) target bundleno = 923 (0x39b), region = 32 }
   0xc   : > { %p250_p4 = scmp.lt.s32.totalorder %s4248_s12, 1  ;;  %vm566_vm0 = vcmask 64512   ;;  %vm2964_vm2 = vcmask 60416  }
   0xe   : > { %s5425_s12 = smov (!%p250_p4, %s4248_s12), 1 }
   0xf   : > { %s4296_s16 = sshll.u32 %s5425_s12, 8 }
  0x10   : > { %s4302_s19 = scalar_lea.vmem %s5303_s1, %s4296_s16  ;;  %s4324_s22 = scalar_lea.vmem %s5302_s0, %s4296_s16 }
  0x11   : > { %v3882_v0 = vld [vmem:[%s4302_s19 + $0x38] sm:$0xff]   ;;  %v3884_v3 = vld [vmem:[%s4302_s19 + $0x30] sm:$0xff]   ;;  %v3886_v7 = vld [vmem:[%s4302_s19 + $0x28] sm:$0xff]   ;;  %s4823_s25 = scalar_lea.vmem %s5304_s2, %s4296_s16  ;;  %s5163_s28 = scalar_lea.vmem %s5305_s3, %s4296_s16 }
  0x12   : > { %v3883_v1 = vld [vmem:[%s4302_s19 + $0x78] sm:$0xff]   ;;  %3826 = vmatprep.subr.msk.bf16.mxu0 %vm566_vm0, %v3882_v0  ;;  %v613_v2 = vsel %vm566_vm0, %v3882_v0, 0  ;;  %v3885_v5 = vld [vmem:[%s4302_s19 + $0x70] sm:$0xff]   ;;  %v610_v6 = vsel %vm566_vm0, %v3884_v3, 0  ;;  %v3887_v9 = vld [vmem:[%s4302_s19 + $0x68] sm:$0xff]   ;;  %v607_v12 = vsel %vm566_vm0, %v3886_v7, 0 }
  0x13   : > { %3834 = vmatprep.subr.msk.bf16.mxu1 %vm566_vm0, %v3883_v1  ;;  %3571 = vmatpush3.bf16.xpose.msra.mxu0 %v613_v2  ;;  %v838_v4 = vsel %vm566_vm0, %v3883_v1, 0  ;;  %v835_v8 = vsel %vm566_vm0, %v3885_v5, 0  ;;  %v3888_v10 = vld [vmem:[%s4302_s19 + $0x20] sm:$0xff]   ;;  %v832_v14 = vsel %vm566_vm0, %v3887_v9, 0  ;;  %v3890_v17 = vld [vmem:[%s4302_s19 + $0x18] sm:$0xff]   ;;  %v3892_v21 = vld [vmem:[%s4302_s19 + $0x10] sm:$0xff]  }
  0x14   : > { %3603 = vmatpush3.bf16.xpose.msra.mxu1 %v838_v4  ;;  %3827 = vmatprep.subr.msk.bf16.mxu0 %vm566_vm0, %v3884_v3  ;;  %v3889_v11 = vld [vmem:[%s4302_s19 + $0x60] sm:$0xff]   ;;  %v604_v16 = vsel %vm566_vm0, %v3888_v10, 0  ;;  %v3891_v19 = vld [vmem:[%s4302_s19 + $0x58] sm:$0xff]   ;;  %v601_v20 = vsel %vm566_vm0, %v3890_v17, 0  ;;  %v3893_v23 = vld [vmem:[%s4302_s19 + $0x50] sm:$0xff]   ;;  %v598_v24 = vsel %vm566_vm0, %v3892_v21, 0 }
  0x15   : > { %3835 = vmatprep.subr.msk.bf16.mxu1 %vm566_vm0, %v3885_v5  ;;  %v3898_v13 = vld [vmem:[%s4324_s22] sm:$0xff]   ;;  %v829_v18 = vsel %vm566_vm0, %v3889_v11, 0  ;;  %v826_v22 = vsel %vm566_vm0, %v3891_v19, 0  ;;  %v3894_v25 = vld [vmem:[%s4302_s19 + $0x8] sm:$0xff]   ;;  %v823_v26 = vsel %vm566_vm0, %v3893_v23, 0  ;;  %v3902_v33 = vld [vmem:[%s4302_s19 + $0xb8] sm:$0xff]  }
  0x16   : > { %v3899_v15 = vld [vmem:[%s4324_s22 + $0x40] sm:$0xff]   ;;  %3586 = vmatprep.mubr.msk.bf16.mxu0 %vm566_vm0, %v3898_v13  ;;  %v3895_v27 = vld [vmem:[%s4302_s19 + $0x48] sm:$0xff]   ;;  %v595_v28 = vsel %vm566_vm0, %v3894_v25, 0  ;;  %v3903_v35 = vld [vmem:[%s4302_s19 + $0xf8] sm:$0xff]   ;;  %v1063_v38 = vsel %vm566_vm0, %v3902_v33, 0 }
  0x17   : > { %3618 = vmatprep.mubr.msk.bf16.mxu1 %vm566_vm0, %v3899_v15  ;;  %v3896_v29 = vld [vmem:[%s4302_s19] sm:$0xff]   ;;  %v820_v30 = vsel %vm566_vm0, %v3895_v27, 0  ;;  %v3900_v36 = vld [vmem:[%s4324_s22 + $0x8] sm:$0xff]   ;;  %v3904_v39 = vld [vmem:[%s4302_s19 + $0xb0] sm:$0xff]   ;;  %v1288_v40 = vsel %vm566_vm0, %v3903_v35, 0 }
  0x18   : > { %v3897_v31 = vld [vmem:[%s4302_s19 + $0x40] sm:$0xff]   ;;  %v592_v32 = vsel %vm566_vm0, %v3896_v29, 0  ;;  %v3901_v37 = vld [vmem:[%s4324_s22 + $0x48] sm:$0xff]   ;;  %v3905_v41 = vld [vmem:[%s4302_s19 + $0xf0] sm:$0xff]   ;;  %v1060_v46 = vsel %vm566_vm0, %v3904_v39, 0 }
  0x19   : > { %v817_v34 = vsel %vm566_vm0, %v3897_v31, 0  ;;  %v3906_v42 = vld [vmem:[%s4324_s22 + $0x10] sm:$0xff]   ;;  %v3907_v44 = vld [vmem:[%s4324_s22 + $0x18] sm:$0xff]   ;;  %v3910_v47 = vld [vmem:[%s4302_s19 + $0xa8] sm:$0xff]   ;;  %v1285_v48 = vsel %vm566_vm0, %v3905_v41, 0 }
  0x1a   : > { %v3908_v43 = vld [vmem:[%s4324_s22 + $0x50] sm:$0xff]   ;;  %v3909_v45 = vld [vmem:[%s4324_s22 + $0x58] sm:$0xff]   ;;  %v3911_v49 = vld [vmem:[%s4302_s19 + $0xe8] sm:$0xff]   ;;  %v1057_v54 = vsel %vm566_vm0, %v3910_v47, 0 }
  0x1b   : > { %3573 = vmatpush3.bf16.xpose.msra.mxu0 %v610_v6  ;;  %v3914_v50 = vld [vmem:[%s4324_s22 + $0x20] sm:$0xff]   ;;  %v3915_v52 = vld [vmem:[%s4324_s22 + $0x28] sm:$0xff]   ;;  %v1282_v56 = vsel %vm566_vm0, %v3911_v49, 0  ;;  %v3922_v58 = vld [vmem:[%s4324_s22 + $0x30] sm:$0xff]  }
  0x1c   : > { %3605 = vmatpush3.bf16.xpose.msra.mxu1 %v835_v8  ;;  %3828 = vmatprep.subr.msk.bf16.mxu0 %vm566_vm0, %v3886_v7  ;;  %v3916_v51 = vld [vmem:[%s4324_s22 + $0x60] sm:$0xff]   ;;  %v3917_v53 = vld [vmem:[%s4324_s22 + $0x68] sm:$0xff]   ;;  %v3924_v59 = vld [vmem:[%s4324_s22 + $0x70] sm:$0xff]  }
  0x1d   : > { %3836 = vmatprep.subr.msk.bf16.mxu1 %vm566_vm0, %v3887_v9  ;;  %v3912_v55 = vld [vmem:[%s4302_s19 + $0xa0] sm:$0xff]   ;;  %v3923_v60 = vld [vmem:[%s4324_s22 + $0x38] sm:$0xff]   ;;  %v3920_v5 = vld [vmem:[%s4302_s19 + $0x90] sm:$0xff]  }
  0x1e   : > { %v3913_v57 = vld [vmem:[%s4302_s19 + $0xe0] sm:$0xff]   ;;  %v3925_v61 = vld [vmem:[%s4324_s22 + $0x78] sm:$0xff]   ;;  %v1054_v62 = vsel %vm566_vm0, %v3912_v55, 0  ;;  %v3921_v7 = vld [vmem:[%s4302_s19 + $0xd0] sm:$0xff]   ;;  %v1048_v8 = vsel %vm566_vm0, %v3920_v5, 0 }
  0x1f   : > { %v3918_v63 = vld [vmem:[%s4302_s19 + $0x98] sm:$0xff]   ;;  %v1279_v0 = vsel %vm566_vm0, %v3913_v57, 0  ;;  %v3930_v2 = vld [vmem:[%s4324_s22 + $0x80] sm:$0xff]   ;;  %v3926_v9 = vld [vmem:[%s4302_s19 + $0x88] sm:$0xff]  }
  0x20   : > { %v3919_v1 = vld [vmem:[%s4302_s19 + $0xd8] sm:$0xff]   ;;  %v3931_v3 = vld [vmem:[%s4324_s22 + $0xc0] sm:$0xff]   ;;  %v1051_v4 = vsel %vm566_vm0, %v3918_v63, 0 }
  0x21   : > { %v1276_v6 = vsel %vm566_vm0, %v3919_v1, 0  ;;  %v3928_v13 = vld [vmem:[%s4302_s19 + $0x80] sm:$0xff]  }
  0x22   : > { %v3929_v15 = vld [vmem:[%s4302_s19 + $0xc0] sm:$0xff]  }
  0x23   : > { %3575 = vmatpush3.bf16.xpose.msra.mxu0 %v607_v12  ;;  %v1045_v12 = vsel %vm566_vm0, %v3926_v9, 0 }
  0x24   : > { %3607 = vmatpush3.bf16.xpose.msra.mxu1 %v832_v14  ;;  %3829 = vmatprep.subr.msk.bf16.mxu0 %vm566_vm0, %v3888_v10  ;;  %v1273_v10 = vsel %vm566_vm0, %v3921_v7, 0 }
  0x25   : > { %3837 = vmatprep.subr.msk.bf16.mxu1 %vm566_vm0, %v3889_v11  ;;  %v3927_v11 = vld [vmem:[%s4302_s19 + $0xc8] sm:$0xff]  }
  0x26   : > { %v1270_v14 = vsel %vm566_vm0, %v3927_v11, 0 }
  0x2b   : > { %3577 = vmatpush3.bf16.xpose.msra.mxu0 %v604_v16  ;;  %v1042_v16 = vsel %vm566_vm0, %v3928_v13, 0 }
  0x2c   : > { %3609 = vmatpush3.bf16.xpose.msra.mxu1 %v829_v18  ;;  %3830 = vmatprep.subr.msk.bf16.mxu0 %vm566_vm0, %v3890_v17  ;;  %v1267_v17 = vsel %vm566_vm0, %v3929_v15, 0  ;;  %v3932_v18 = vld [vmem:[%s4324_s22 + $0x88] sm:$0xff]  }
  0x2d   : > { %3838 = vmatprep.subr.msk.bf16.mxu1 %vm566_vm0, %v3891_v19  ;;  %v3933_v19 = vld [vmem:[%s4324_s22 + $0xc8] sm:$0xff]  }
  0x33   : > { %3579 = vmatpush3.bf16.xpose.msra.mxu0 %v601_v20  ;;  %v3934_v20 = vld [vmem:[%s4324_s22 + $0x90] sm:$0xff]  }
  0x34   : > { %3611 = vmatpush3.bf16.xpose.msra.mxu1 %v826_v22  ;;  %3831 = vmatprep.subr.msk.bf16.mxu0 %vm566_vm0, %v3892_v21  ;;  %v3936_v21 = vld [vmem:[%s4324_s22 + $0xd0] sm:$0xff]   ;;  %v3935_v22 = vld [vmem:[%s4324_s22 + $0x98] sm:$0xff]  }
  0x35   : > { %3839 = vmatprep.subr.msk.bf16.mxu1 %vm566_vm0, %v3893_v23  ;;  %v3937_v23 = vld [vmem:[%s4324_s22 + $0xd8] sm:$0xff]  }
  0x3b   : > { %3581 = vmatpush3.bf16.xpose.msra.mxu0 %v598_v24  ;;  %v3938_v24 = vld [vmem:[%s4324_s22 + $0xa0] sm:$0xff]  }
  0x3c   : > { %3613 = vmatpush3.bf16.xpose.msra.mxu1 %v823_v26  ;;  %3832 = vmatprep.subr.msk.bf16.mxu0 %vm566_vm0, %v3894_v25  ;;  %v3940_v25 = vld [vmem:[%s4324_s22 + $0xe0] sm:$0xff]   ;;  %v3939_v26 = vld [vmem:[%s4324_s22 + $0xa8] sm:$0xff]  }
  0x3d   : > { %3840 = vmatprep.subr.msk.bf16.mxu1 %vm566_vm0, %v3895_v27  ;;  %v3941_v27 = vld [vmem:[%s4324_s22 + $0xe8] sm:$0xff]  }
  0x43   : > { %3583 = vmatpush3.bf16.xpose.msra.mxu0 %v595_v28  ;;  %v3942_v28 = vld [vmem:[%s4324_s22 + $0xb0] sm:$0xff]  }
  0x44   : > { %3615 = vmatpush3.bf16.xpose.msra.mxu1 %v820_v30  ;;  %3833 = vmatprep.subr.msk.bf16.mxu0 %vm566_vm0, %v3896_v29  ;;  %v3944_v29 = vld [vmem:[%s4324_s22 + $0xf0] sm:$0xff]   ;;  %v3943_v30 = vld [vmem:[%s4324_s22 + $0xb8] sm:$0xff]  }
  0x45   : > { %3841 = vmatprep.subr.msk.bf16.mxu1 %vm566_vm0, %v3897_v31  ;;  %v3945_v31 = vld [vmem:[%s4324_s22 + $0xf8] sm:$0xff]  }
  0x4b   : > { %3585 = vmatpush3.bf16.xpose.msra.mxu0 %v592_v32  ;;  %v1387_v32 = vlaneseq }
  0x4c   : > { %3617 = vmatpush3.bf16.xpose.msra.mxu1 %v817_v34  ;;  %3842 = vmatprep.subr.msk.bf16.mxu0 %vm566_vm0, %v3902_v33 }
  0x4d   : > { %3850 = vmatprep.subr.msk.bf16.mxu1 %vm566_vm0, %v3903_v35  ;;  %v4470_v33 = vand.u32 127, %v1387_v32 }
  0x4f   : > { %vm1389_vm1 = vcmp.lt.s32.totalorder %v4470_v33, 5 }
  0x52   : > { %3587 = vmatmul.mubr.msk.bf16.vlgmr.msra.gmra.mxu0 %vm566_vm0, %v3900_v36 }
  0x53   : > { %3619 = vmatmul.mubr.msk.bf16.vlgmr.msra.gmra.mxu1 %vm566_vm0, %v3901_v37  ;;  %3635 = vmatpush3.bf16.xpose.msra.mxu0 %v1063_v38 }
  0x54   : > { %3667 = vmatpush3.bf16.xpose.msra.mxu1 %v1288_v40  ;;  %3843 = vmatprep.subr.msk.bf16.mxu0 %vm566_vm0, %v3904_v39 }
  0x55   : > { %3851 = vmatprep.subr.msk.bf16.mxu1 %vm566_vm0, %v3905_v41  ;;  %3590 = vmatprep.mubr.msk.bf16.mxu0 %vm566_vm0, %v3906_v42 }
  0x56   : > { %3622 = vmatprep.mubr.msk.bf16.mxu1 %vm566_vm0, %v3908_v43 }
  0x5a   : > { %3591 = vmatmul.mubr.msk.bf16.gmra.mxu0 %vm566_vm0, %v3907_v44 }
  0x5b   : > { %3637 = vmatpush3.bf16.xpose.msra.mxu0 %v1060_v46  ;;  %3623 = vmatmul.mubr.msk.bf16.gmra.mxu1 %vm566_vm0, %v3909_v45 }
  0x5c   : > { %3669 = vmatpush3.bf16.xpose.msra.mxu1 %v1285_v48  ;;  %3844 = vmatprep.subr.msk.bf16.mxu0 %vm566_vm0, %v3910_v47 }
  0x5d   : > { %3852 = vmatprep.subr.msk.bf16.mxu1 %vm566_vm0, %v3911_v49  ;;  %3594 = vmatprep.mubr.msk.bf16.mxu0 %vm566_vm0, %v3914_v50 }
  0x5e   : > { %3626 = vmatprep.mubr.msk.bf16.mxu1 %vm566_vm0, %v3916_v51 }
  0x62   : > { %3595 = vmatmul.mubr.msk.bf16.gmra.mxu0 %vm566_vm0, %v3915_v52 }
  0x63   : > { %3639 = vmatpush3.bf16.xpose.msra.mxu0 %v1057_v54  ;;  %3627 = vmatmul.mubr.msk.bf16.gmra.mxu1 %vm566_vm0, %v3917_v53 }
  0x64   : > { %3671 = vmatpush3.bf16.xpose.msra.mxu1 %v1282_v56  ;;  %3845 = vmatprep.subr.msk.bf16.mxu0 %vm566_vm0, %v3912_v55 }
  0x65   : > { %3853 = vmatprep.subr.msk.bf16.mxu1 %vm566_vm0, %v3913_v57  ;;  %3598 = vmatprep.mubr.msk.bf16.mxu0 %vm566_vm0, %v3922_v58 }
  0x66   : > { %3630 = vmatprep.mubr.msk.bf16.mxu1 %vm566_vm0, %v3924_v59 }
  0x6a   : > { %3599 = vmatmul.mubr.msk.bf16.gmra.mxu0 %vm566_vm0, %v3923_v60 }
  0x6b   : > { %3641 = vmatpush3.bf16.xpose.msra.mxu0 %v1054_v62  ;;  %3631 = vmatmul.mubr.msk.bf16.gmra.mxu1 %vm566_vm0, %v3925_v61 }
  0x6c   : > { %3673 = vmatpush3.bf16.xpose.msra.mxu1 %v1279_v0  ;;  %3846 = vmatprep.subr.msk.bf16.mxu0 %vm566_vm0, %v3918_v63 }
  0x6d   : > { %3854 = vmatprep.subr.msk.bf16.mxu1 %vm566_vm0, %v3919_v1  ;;  %3650 = vmatprep.mubr.msk.bf16.mxu0 %vm566_vm0, %v3930_v2 }
  0x6e   : > { %3682 = vmatprep.mubr.msk.bf16.mxu1 %vm566_vm0, %v3931_v3 }
  0x73   : > { %3643 = vmatpush3.bf16.xpose.msra.mxu0 %v1051_v4 }
  0x74   : > { %3675 = vmatpush3.bf16.xpose.msra.mxu1 %v1276_v6  ;;  %3847 = vmatprep.subr.msk.bf16.mxu0 %vm566_vm0, %v3920_v5 }
  0x75   : > { %3855 = vmatprep.subr.msk.bf16.mxu1 %vm566_vm0, %v3921_v7 }
  0x7b   : > { %3645 = vmatpush3.bf16.xpose.msra.mxu0 %v1048_v8 }
  0x7c   : > { %3677 = vmatpush3.bf16.xpose.msra.mxu1 %v1273_v10  ;;  %3848 = vmatprep.subr.msk.bf16.mxu0 %vm566_vm0, %v3926_v9 }
  0x7d   : > { %3856 = vmatprep.subr.msk.bf16.mxu1 %vm566_vm0, %v3927_v11 }
  0x83   : > { %3647 = vmatpush3.bf16.xpose.msra.mxu0 %v1045_v12 }
  0x84   : > { %3679 = vmatpush3.bf16.xpose.msra.mxu1 %v1270_v14  ;;  %3849 = vmatprep.subr.msk.bf16.mxu0 %vm566_vm0, %v3928_v13 }
  0x85   : > { %3857 = vmatprep.subr.msk.bf16.mxu1 %vm566_vm0, %v3929_v15 }
  0x8b   : > { %3649 = vmatpush3.bf16.xpose.msra.mxu0 %v1042_v16 }
  0x8c   : > { %3681 = vmatpush3.bf16.xpose.msra.mxu1 %v1267_v17 }
  0x92   : > { %3651 = vmatmul.mubr.msk.bf16.vlgmr.msra.gmra.mxu0 %vm566_vm0, %v3932_v18 }
  0x93   : > { %3683 = vmatmul.mubr.msk.bf16.vlgmr.msra.gmra.mxu1 %vm566_vm0, %v3933_v19  ;;  %3654 = vmatprep.mubr.msk.bf16.mxu0 %vm566_vm0, %v3934_v20 }
  0x94   : > { %3686 = vmatprep.mubr.msk.bf16.mxu1 %vm566_vm0, %v3936_v21 }
  0x9a   : > { %3655 = vmatmul.mubr.msk.bf16.gmra.mxu0 %vm566_vm0, %v3935_v22 }
  0x9b   : > { %3687 = vmatmul.mubr.msk.bf16.gmra.mxu1 %vm566_vm0, %v3937_v23  ;;  %3658 = vmatprep.mubr.msk.bf16.mxu0 %vm566_vm0, %v3938_v24 }
  0x9c   : > { %3690 = vmatprep.mubr.msk.bf16.mxu1 %vm566_vm0, %v3940_v25 }
  0xa2   : > { %3659 = vmatmul.mubr.msk.bf16.gmra.mxu0 %vm566_vm0, %v3939_v26 }
  0xa3   : > { %3691 = vmatmul.mubr.msk.bf16.gmra.mxu1 %vm566_vm0, %v3941_v27  ;;  %3662 = vmatprep.mubr.msk.bf16.mxu0 %vm566_vm0, %v3942_v28 }
  0xa4   : > { %3694 = vmatprep.mubr.msk.bf16.mxu1 %vm566_vm0, %v3944_v29 }
  0xaa   : > { %3663 = vmatmul.mubr.msk.bf16.gmra.mxu0 %vm566_vm0, %v3943_v30 }
  0xab   : > { %3695 = vmatmul.mubr.msk.bf16.gmra.mxu1 %vm566_vm0, %v3945_v31 }
 0x112   : > { %v3588_v34 = vpop.f32.mrf.mxu0 }
 0x113   : > { %v3620_v35 = vpop.f32.mrf.mxu1  ;;  %v4475_v36 = vsel %vm1389_vm1, %v3588_v34, -1e+30 }
 0x114   : > { %1460 = vmax.xlane.f32.xlu0 %v4475_v36  ;;  %v649_v37 = vpop.f32.mrf.mxu0  ;;  %v4485_v41 = vsel %vm1389_vm1, %v3620_v35, -1e+30 }
 0x115   : > { %v874_v38 = vpop.f32.mrf.mxu1  ;;  %v4495_v45 = vsel %vm1389_vm1, %v649_v37, -1e+30 }
 0x116   : > { %v4480_v39 = vsel %vm1389_vm1, %v874_v38, -1e+30  ;;  %v3589_v40 = vpop.f32.mrf.mxu0 }
 0x117   : > { %1488 = vmax.xlane.f32.xlu1 %v4480_v39  ;;  %v4490_v42 = vsel %vm1389_vm1, %v3589_v40, -1e+30  ;;  %v3621_v43 = vpop.f32.mrf.mxu1 }
 0x118   : > { %1492 = vmax.xlane.f32.xlu0 %v4485_v41  ;;  %v652_v44 = vpop.f32.mrf.mxu0  ;;  %v4500_v47 = vsel %vm1389_vm1, %v3621_v43, -1e+30 }
 0x119   : > { %v877_v48 = vpop.f32.mrf.mxu1  ;;  %v4505_v49 = vsel %vm1389_vm1, %v652_v44, -1e+30 }
 0x11a   : > { %v3592_v46 = vpop.f32.mrf.mxu0  ;;  %v4514_v53 = vsel %vm1389_vm1, %v877_v48, -1e+30 }
 0x11b   : > { %1462 = vmax.xlane.f32.xlu1 %v4490_v42  ;;  %v3624_v51 = vpop.f32.mrf.mxu1  ;;  %v4510_v52 = vsel %vm1389_vm1, %v3592_v46, -1e+30 }
 0x11c   : > { %1456 = vmax.xlane.f32.xlu0 %v4495_v45  ;;  %v665_v50 = vpop.f32.mrf.mxu0  ;;  %v4520_v56 = vsel %vm1389_vm1, %v3624_v51, -1e+30 }
 0x11d   : > { %v890_v55 = vpop.f32.mrf.mxu1  ;;  %v4535_v61 = vsel %vm1389_vm1, %v665_v50, -1e+30 }
 0x11e   : > { %v3593_v54 = vpop.f32.mrf.mxu0  ;;  %v4545_v1 = vsel %vm1389_vm1, %v890_v55, -1e+30 }
 0x11f   : > { %1494 = vmax.xlane.f32.xlu1 %v4500_v47  ;;  %v4524_v57 = vsel %vm1389_vm1, %v3593_v54, -1e+30  ;;  %v3625_v58 = vpop.f32.mrf.mxu1 }
 0x120   : > { %1458 = vmax.xlane.f32.xlu0 %v4505_v49  ;;  %v4530_v59 = vsel %vm1389_vm1, %v3625_v58, -1e+30  ;;  %v668_v60 = vpop.f32.mrf.mxu0 }
 0x121   : > { %v4540_v63 = vsel %vm1389_vm1, %v668_v60, -1e+30  ;;  %v893_v0 = vpop.f32.mrf.mxu1 }
 0x122   : > { %v3596_v62 = vpop.f32.mrf.mxu0  ;;  %v4554_v5 = vsel %vm1389_vm1, %v893_v0, -1e+30 }
 0x123   : > { %1490 = vmax.xlane.f32.xlu1 %v4514_v53  ;;  %v3628_v3 = vpop.f32.mrf.mxu1  ;;  %v4550_v4 = vsel %vm1389_vm1, %v3596_v62, -1e+30 }
 0x124   : > { %1468 = vmax.xlane.f32.xlu0 %v4510_v52  ;;  %v681_v2 = vpop.f32.mrf.mxu0  ;;  %v4560_v8 = vsel %vm1389_vm1, %v3628_v3, -1e+30 }
 0x125   : > { %v906_v7 = vpop.f32.mrf.mxu1  ;;  %v4575_v13 = vsel %vm1389_vm1, %v681_v2, -1e+30 }
 0x126   : > { %v3597_v6 = vpop.f32.mrf.mxu0  ;;  %v4585_v17 = vsel %vm1389_vm1, %v906_v7, -1e+30 }
 0x127   : > { %1470 = vmax.xlane.f32.xlu1 %v4524_v57  ;;  %v4564_v9 = vsel %vm1389_vm1, %v3597_v6, -1e+30  ;;  %v3629_v10 = vpop.f32.mrf.mxu1 }
 0x128   : > { %1500 = vmax.xlane.f32.xlu0 %v4520_v56  ;;  %v4570_v11 = vsel %vm1389_vm1, %v3629_v10, -1e+30  ;;  %v684_v12 = vpop.f32.mrf.mxu0 }
 0x129   : > { %v4580_v15 = vsel %vm1389_vm1, %v684_v12, -1e+30  ;;  %v909_v16 = vpop.f32.mrf.mxu1 }
 0x12a   : > { %v3600_v14 = vpop.f32.mrf.mxu0  ;;  %v4594_v21 = vsel %vm1389_vm1, %v909_v16, -1e+30 }
 0x12b   : > { %1502 = vmax.xlane.f32.xlu1 %v4530_v59  ;;  %v3632_v19 = vpop.f32.mrf.mxu1  ;;  %v4590_v20 = vsel %vm1389_vm1, %v3600_v14, -1e+30 }
 0x12c   : > { %1464 = vmax.xlane.f32.xlu0 %v4535_v61  ;;  %v697_v18 = vpop.f32.mrf.mxu0  ;;  %v4600_v24 = vsel %vm1389_vm1, %v3632_v19, -1e+30 }
 0x12d   : > { %v922_v23 = vpop.f32.mrf.mxu1  ;;  %v4615_v29 = vsel %vm1389_vm1, %v697_v18, -1e+30 }
 0x12e   : > { %v3601_v22 = vpop.f32.mrf.mxu0  ;;  %v4625_v32 = vsel %vm1389_vm1, %v922_v23, -1e+30 }
 0x12f   : > { %1466 = vmax.xlane.f32.xlu1 %v4540_v63  ;;  %v4604_v25 = vsel %vm1389_vm1, %v3601_v22, -1e+30  ;;  %v3633_v26 = vpop.f32.mrf.mxu1 }
 0x130   : > { %1496 = vmax.xlane.f32.xlu0 %v4545_v1  ;;  %v4610_v27 = vsel %vm1389_vm1, %v3633_v26, -1e+30  ;;  %v700_v28 = vpop.f32.mrf.mxu0 }
 0x131   : > { %v4620_v30 = vsel %vm1389_vm1, %v700_v28, -1e+30  ;;  %v925_v31 = vpop.f32.mrf.mxu1 }
 0x132   : > { %v4630_v34 = vsel %vm1389_vm1, %v925_v31, -1e+30 }
 0x133   : > { %1498 = vmax.xlane.f32.xlu1 %v4554_v5 }
 0x134   : > { %1476 = vmax.xlane.f32.xlu0 %v4550_v4 }
 0x137   : > { %1478 = vmax.xlane.f32.xlu1 %v4564_v9 }
 0x138   : > { %1508 = vmax.xlane.f32.xlu0 %v4560_v8 }
 0x13b   : > { %1510 = vmax.xlane.f32.xlu1 %v4570_v11 }
 0x13c   : > { %1472 = vmax.xlane.f32.xlu0 %v4575_v13 }
 0x13f   : > { %1474 = vmax.xlane.f32.xlu1 %v4580_v15 }
 0x140   : > { %1504 = vmax.xlane.f32.xlu0 %v4585_v17 }
 0x143   : > { %1506 = vmax.xlane.f32.xlu1 %v4594_v21 }
 0x144   : > { %1484 = vmax.xlane.f32.xlu0 %v4590_v20 }
 0x147   : > { %1486 = vmax.xlane.f32.xlu1 %v4604_v25 }
 0x148   : > { %1516 = vmax.xlane.f32.xlu0 %v4600_v24 }
 0x14b   : > { %1518 = vmax.xlane.f32.xlu1 %v4610_v27 }
 0x14c   : > { %1480 = vmax.xlane.f32.xlu0 %v4615_v29 }
 0x14f   : > { %1482 = vmax.xlane.f32.xlu1 %v4620_v30 }
 0x150   : > { %1512 = vmax.xlane.f32.xlu0 %v4625_v32 }
 0x152   : > { %v3652_v35 = vpop.f32.mrf.mxu0 }
 0x153   : > { %v3684_v37 = vpop.f32.mrf.mxu1  ;;  %1514 = vmax.xlane.f32.xlu1 %v4630_v34  ;;  %v4635_v38 = vsel %vm1389_vm1, %v3652_v35, -1e+30 }
 0x154   : > { %1524 = vmax.xlane.f32.xlu0 %v4635_v38  ;;  %v1099_v40 = vpop.f32.mrf.mxu0  ;;  %v4640_v44 = vsel %vm1389_vm1, %v3684_v37, -1e+30 }
 0x155   : > { %v1324_v43 = vpop.f32.mrf.mxu1  ;;  %v4650_v51 = vsel %vm1389_vm1, %v1099_v40, -1e+30 }
 0x156   : > { %v3653_v46 = vpop.f32.mrf.mxu0  ;;  %v4660_v60 = vsel %vm1389_vm1, %v1324_v43, -1e+30 }
 0x157   : > { %v4644_v48 = vsel %vm1389_vm1, %v3653_v46, -1e+30  ;;  %v3685_v50 = vpop.f32.mrf.mxu1 }
 0x158   : > { %1556 = vmax.xlane.f32.xlu0 %v4640_v44  ;;  %1526 = vmax.xlane.f32.xlu1 %v4644_v48  ;;  %v4654_v54 = vsel %vm1389_vm1, %v3685_v50, -1e+30  ;;  %v1102_v55 = vpop.f32.mrf.mxu0 }
 0x159   : > { %v4664_v62 = vsel %vm1389_vm1, %v1102_v55, -1e+30  ;;  %v1327_v0 = vpop.f32.mrf.mxu1 }
 0x15a   : > { %v3656_v58 = vpop.f32.mrf.mxu0  ;;  %v4674_v7 = vsel %vm1389_vm1, %v1327_v0, -1e+30 }
 0x15b   : > { %v4670_v2 = vsel %vm1389_vm1, %v3656_v58, -1e+30  ;;  %v3688_v6 = vpop.f32.mrf.mxu1 }
 0x15c   : > { %1520 = vmax.xlane.f32.xlu0 %v4650_v51  ;;  %1558 = vmax.xlane.f32.xlu1 %v4654_v54  ;;  %v1115_v3 = vpop.f32.mrf.mxu0  ;;  %v4680_v10 = vsel %vm1389_vm1, %v3688_v6, -1e+30 }
 0x15d   : > { %v1340_v14 = vpop.f32.mrf.mxu1  ;;  %v4690_v19 = vsel %vm1389_vm1, %v1115_v3, -1e+30 }
 0x15e   : > { %v3657_v12 = vpop.f32.mrf.mxu0  ;;  %v4700_v28 = vsel %vm1389_vm1, %v1340_v14, -1e+30 }
 0x15f   : > { %v4684_v16 = vsel %vm1389_vm1, %v3657_v12, -1e+30  ;;  %v3689_v18 = vpop.f32.mrf.mxu1 }
 0x160   : > { %1552 = vmax.xlane.f32.xlu0 %v4660_v60  ;;  %1522 = vmax.xlane.f32.xlu1 %v4664_v62  ;;  %v4694_v22 = vsel %vm1389_vm1, %v3689_v18, -1e+30  ;;  %v1118_v23 = vpop.f32.mrf.mxu0 }
 0x161   : > { %v4704_v31 = vsel %vm1389_vm1, %v1118_v23, -1e+30  ;;  %v1343_v35 = vpop.f32.mrf.mxu1 }
 0x162   : > { %v3660_v26 = vpop.f32.mrf.mxu0  ;;  %v4714_v46 = vsel %vm1389_vm1, %v1343_v35, -1e+30 }
 0x163   : > { %v4710_v37 = vsel %vm1389_vm1, %v3660_v26, -1e+30  ;;  %v3692_v43 = vpop.f32.mrf.mxu1 }
 0x164   : > { %1554 = vmax.xlane.f32.xlu1 %v4674_v7  ;;  %1532 = vmax.xlane.f32.xlu0 %v4670_v2  ;;  %v1131_v40 = vpop.f32.mrf.mxu0  ;;  %v4720_v50 = vsel %vm1389_vm1, %v3692_v43, -1e+30 }
 0x165   : > { %5344 = vst [vmem:[#allocation2_spill] sm:$0xff] %v4720_v50  ;;  %v1356_v58 = vpop.f32.mrf.mxu1  ;;  %v4730_v6 = vsel %vm1389_vm1, %v1131_v40, -1e+30 }
 0x166   : > { %v3661_v55 = vpop.f32.mrf.mxu0  ;;  %5346 = vst [vmem:[#allocation4_spill] sm:$0xff] %v4730_v6  ;;  %v4740_v23 = vsel %vm1389_vm1, %v1356_v58, -1e+30 }
 0x167   : > { %v4724_v0 = vsel %vm1389_vm1, %v3661_v55, -1e+30  ;;  %v3693_v3 = vpop.f32.mrf.mxu1  ;;  %5348 = vst [vmem:[#allocation6_spill] sm:$0xff] %v4740_v23 }
 0x168   : > { %1564 = vmax.xlane.f32.xlu0 %v4680_v10  ;;  %1534 = vmax.xlane.f32.xlu1 %v4684_v16  ;;  %5345 = vst [vmem:[#allocation3_spill] sm:$0xff] %v4724_v0  ;;  %v4734_v12 = vsel %vm1389_vm1, %v3693_v3, -1e+30  ;;  %v1134_v14 = vpop.f32.mrf.mxu0 }
 0x169   : > { %5347 = vst [vmem:[#allocation5_spill] sm:$0xff] %v4734_v12  ;;  %v4744_v26 = vsel %vm1389_vm1, %v1134_v14, -1e+30  ;;  %v1359_v35 = vpop.f32.mrf.mxu1 }
 0x16a   : > { %v3664_v18 = vpop.f32.mrf.mxu0  ;;  %5349 = vst [vmem:[#allocation7_spill] sm:$0xff] %v4744_v26  ;;  %v4754_v3 = vsel %vm1389_vm1, %v1359_v35, -1e+30 }
 0x16b   : > { %v4750_v40 = vsel %vm1389_vm1, %v3664_v18, -1e+30  ;;  %v3696_v55 = vpop.f32.mrf.mxu1  ;;  %5351 = vst [vmem:[#allocation9_spill] sm:$0xff] %v4754_v3 }
 0x16c   : > { %1528 = vmax.xlane.f32.xlu0 %v4690_v19  ;;  %1566 = vmax.xlane.f32.xlu1 %v4694_v22  ;;  %5350 = vst [vmem:[#allocation8_spill] sm:$0xff] %v4750_v40  ;;  %v1147_v43 = vpop.f32.mrf.mxu0  ;;  %v4760_v58 = vsel %vm1389_vm1, %v3696_v55, -1e+30 }
 0x16d   : > { %5352 = vst [vmem:[#allocation10_spill] sm:$0xff] %v4760_v58 }
 0x16e   : > { %v3665_v14 = vpop.f32.mrf.mxu0 }
 0x16f   : > { %v4764_v18 = vsel %vm1389_vm1, %v3665_v14, -1e+30 }
 0x170   : > { %1560 = vmax.xlane.f32.xlu0 %v4700_v28  ;;  %1530 = vmax.xlane.f32.xlu1 %v4704_v31  ;;  %5353 = vst [vmem:[#allocation11_spill] sm:$0xff] %v4764_v18  ;;  %v1150_v55 = vpop.f32.mrf.mxu0 }
 0x174   : > { %1562 = vmax.xlane.f32.xlu1 %v4714_v46  ;;  %1540 = vmax.xlane.f32.xlu0 %v4710_v37 }
 0x178   : > { %1572 = vmax.xlane.f32.xlu0 %v4720_v50  ;;  %1542 = vmax.xlane.f32.xlu1 %v4724_v0 }
 0x17c   : > { %1536 = vmax.xlane.f32.xlu0 %v4730_v6  ;;  %1574 = vmax.xlane.f32.xlu1 %v4734_v12 }
 0x180   : > { %1568 = vmax.xlane.f32.xlu0 %v4740_v23  ;;  %1538 = vmax.xlane.f32.xlu1 %v4744_v26  ;;  %v1372_v26 = vpop.f32.mrf.mxu1 }
 0x181   : > { %v4780_v14 = vsel %vm1389_vm1, %v1372_v26, -1e+30 }
 0x182   : > { %v3697_v35 = vpop.f32.mrf.mxu1  ;;  %5356 = vst [vmem:[#allocation14_spill] sm:$0xff] %v4780_v14 }
 0x184   : > { %1570 = vmax.xlane.f32.xlu1 %v4754_v3  ;;  %1548 = vmax.xlane.f32.xlu0 %v4750_v40  ;;  %v4770_v3 = vsel %vm1389_vm1, %v1147_v43, -1e+30  ;;  %v4774_v40 = vsel %vm1389_vm1, %v3697_v35, -1e+30 }
 0x185   : > { %5354 = vst [vmem:[#allocation12_spill] sm:$0xff] %v4770_v3  ;;  %5355 = vst [vmem:[#allocation13_spill] sm:$0xff] %v4774_v40 }
 0x188   : > { %1580 = vmax.xlane.f32.xlu0 %v4760_v58  ;;  %1550 = vmax.xlane.f32.xlu1 %v4764_v18  ;;  %v4784_v58 = vsel %vm1389_vm1, %v1150_v55, -1e+30  ;;  %v1375_v18 = vpop.f32.mrf.mxu1 }
 0x189   : > { %5357 = vst [vmem:[#allocation15_spill] sm:$0xff] %v4784_v58  ;;  %v4790_v43 = vsel %vm1389_vm1, %v1375_v18, -1e+30 }
 0x18a   : > { %5358 = vst [vmem:[#allocation16_spill] sm:$0xff] %v4790_v43 }
 0x18c   : > { %1544 = vmax.xlane.f32.xlu0 %v4770_v3  ;;  %1582 = vmax.xlane.f32.xlu1 %v4774_v40 }
 0x190   : > { %1576 = vmax.xlane.f32.xlu0 %v4780_v14  ;;  %1546 = vmax.xlane.f32.xlu1 %v4784_v58 }
 0x194   : > { %1578 = vmax.xlane.f32.xlu1 %v4790_v43 }
 0x19d   : > { %v1461_v35 = vpop.xlane.xlu0 %1460 }
 0x19e   : > { %v1586_v40 = vsub.f32 %v4475_v36, %v1461_v35 }
 0x1a0   : > { %v1652_v26 = vmul.f32 1.442695, %v1586_v40  ;;  %v1489_v3 = vpop.xlane.xlu1 %1488 }
 0x1a1   : > { %v1493_v23 = vpop.xlane.xlu0 %1492  ;;  %v1600_v33 = vsub.f32 %v4480_v39, %v1489_v3 }
 0x1a2   : > { %3978 = vpow2.f32 %v1652_v26  ;;  %v1602_v55 = vsub.f32 %v4485_v41, %v1493_v23 }
 0x1a3   : > { %v1680_v35 = vmul.f32 1.442695, %v1600_v33 }
 0x1a4   : > { %v1684_v12 = vmul.f32 1.442695, %v1602_v55  ;;  %v1463_v6 = vpop.xlane.xlu1 %1462 }
 0x1a5   : > { %v1587_v14 = vsub.f32 %v4490_v42, %v1463_v6  ;;  %v1457_v58 = vpop.xlane.xlu0 %1456 }
 0x1a6   : > { %3980 = vpow2.f32 %v1684_v12  ;;  %v1584_v18 = vsub.f32 %v4495_v45, %v1457_v58 }
 0x1a7   : > { %v1654_v43 = vmul.f32 1.442695, %v1587_v14 }
 0x1a8   : > { %v1648_v0 = vmul.f32 1.442695, %v1584_v18  ;;  %v1495_v50 = vpop.xlane.xlu1 %1494 }
 0x1a9   : > { %3982 = vpow2.f32 %v1654_v43  ;;  %v1603_v36 = vsub.f32 %v4500_v47, %v1495_v50  ;;  %v1459_v40 = vpop.xlane.xlu0 %1458 }
 0x1aa   : > { %3984 = vpow2.f32 %v1648_v0  ;;  %v1585_v41 = vsub.f32 %v4505_v49, %v1459_v40 }
 0x1ab   : > { %v1686_v23 = vmul.f32 1.442695, %v1603_v36 }
 0x1ac   : > { %v1491_v26 = vpop.xlane.xlu1 %1490  ;;  %v1650_v42 = vmul.f32 1.442695, %v1585_v41 }
 0x1ad   : > { %3986 = vpow2.f32 %v1686_v23  ;;  %v1601_v39 = vsub.f32 %v4514_v53, %v1491_v26  ;;  %v1469_v6 = vpop.xlane.xlu0 %1468  ;;  %v3946_v26 = vld [vmem:[%s4823_s25 + $0x38] sm:$0xff]  }
 0x1ae   : > { %3988 = vpow2.f32 %v1680_v35  ;;  %v1590_v45 = vsub.f32 %v4510_v52, %v1469_v6  ;;  %3698 = vmatprep.subr.bf16.mxu0 %v3946_v26 }
 0x1af   : > { %v4802_v12 = vpop.eup %3978  ;;  %3990 = vpow2.f32 %v1650_v42  ;;  %v1682_v47 = vmul.f32 1.442695, %v1601_v39  ;;  %3699 = vmatpush3.bf16.msra.mxu0 %v3946_v26  ;;  %v3951_v26 = vld [vmem:[%s4823_s25 + $0x20] sm:$0xff]  }
 0x1b0   : > { %v1660_v3 = vmul.f32 1.442695, %v1590_v45  ;;  %v1471_v58 = vpop.xlane.xlu1 %1470  ;;  %1780 = vadd.xlane.f32.xlu0 %v4802_v12 }
 0x1b1   : > { %v1591_v49 = vsub.f32 %v4524_v57, %v1471_v58  ;;  %v1501_v50 = vpop.xlane.xlu0 %1500 }
 0x1b2   : > { %3992 = vpow2.f32 %v1660_v3  ;;  %v1606_v0 = vsub.f32 %v4520_v56, %v1501_v50 }
 0x1b3   : > { %v4807_v14 = vpop.eup %3980  ;;  %3994 = vpow2.f32 %v1682_v47  ;;  %v1662_v52 = vmul.f32 1.442695, %v1591_v49  ;;  %v3947_v47 = vld [vmem:[%s4823_s25 + $0x30] sm:$0xff]   ;;  %v3948_v49 = vld [vmem:[%s4823_s25 + $0x78] sm:$0xff]  }
 0x1b4   : > { %v1692_v53 = vmul.f32 1.442695, %v1606_v0  ;;  %v1503_v43 = vpop.xlane.xlu1 %1502  ;;  %1812 = vadd.xlane.f32.xlu0 %v4807_v14  ;;  %3700 = vmatprep.subr.bf16.mxu0 %v3947_v47 }
 0x1b5   : > { %v1607_v55 = vsub.f32 %v4530_v59, %v1503_v43  ;;  %v1465_v33 = vpop.xlane.xlu0 %1464  ;;  %3730 = vmatprep.subr.bf16.mxu1 %v3948_v49  ;;  %3701 = vmatpush3.bf16.msra.mxu0 %v3947_v47 }
 0x1b6   : > { %v4811_v18 = vpop.eup %3982  ;;  %3996 = vpow2.f32 %v1692_v53  ;;  %v1588_v57 = vsub.f32 %v4535_v61, %v1465_v33  ;;  %3731 = vmatpush3.bf16.msra.mxu1 %v3948_v49  ;;  %v3949_v33 = vld [vmem:[%s4823_s25 + $0x28] sm:$0xff]   ;;  %v3953_v49 = vld [vmem:[%s4823_s25 + $0x18] sm:$0xff]  }
 0x1b7   : > { %v4814_v36 = vpop.eup %3984  ;;  %1782 = vadd.xlane.f32.xlu1 %v4811_v18  ;;  %3998 = vpow2.f32 %v1662_v52  ;;  %v1694_v35 = vmul.f32 1.442695, %v1607_v55  ;;  %3702 = vmatprep.subr.bf16.mxu0 %v3949_v33 }
 0x1b8   : > { %v1656_v56 = vmul.f32 1.442695, %v1588_v57  ;;  %v1467_v40 = vpop.xlane.xlu1 %1466  ;;  %1776 = vadd.xlane.f32.xlu0 %v4814_v36  ;;  %v3950_v57 = vld [vmem:[%s4823_s25 + $0x70] sm:$0xff]  }
 0x1b9   : > { %v1589_v41 = vsub.f32 %v4540_v63, %v1467_v40  ;;  %v1497_v23 = vpop.xlane.xlu0 %1496  ;;  %3732 = vmatprep.subr.bf16.mxu1 %v3950_v57  ;;  %3703 = vmatpush3.bf16.msra.mxu0 %v3949_v33 }
 0x1ba   : > { %v4825_v59 = vpop.eup %3986  ;;  %4000 = vpow2.f32 %v1656_v56  ;;  %v1604_v61 = vsub.f32 %v4545_v1, %v1497_v23  ;;  %3733 = vmatpush3.bf16.msra.mxu1 %v3950_v57  ;;  %3704 = vmatprep.subr.bf16.mxu0 %v3951_v26  ;;  %v3955_v57 = vld [vmem:[%s4823_s25 + $0x10] sm:$0xff]  }
 0x1bb   : > { %v4829_v42 = vpop.eup %3988  ;;  %v1658_v39 = vmul.f32 1.442695, %v1589_v41  ;;  %1814 = vadd.xlane.f32.xlu1 %v4825_v59  ;;  %4002 = vpow2.f32 %v1694_v35 }
 0x1bc   : > { %v1688_v63 = vmul.f32 1.442695, %v1604_v61  ;;  %v1499_v6 = vpop.xlane.xlu1 %1498  ;;  %1808 = vadd.xlane.f32.xlu0 %v4829_v42  ;;  %v4834_v58 = vpop.eup %3990 }
 0x1bd   : > { %v1605_v45 = vsub.f32 %v4554_v5, %v1499_v6  ;;  %v1477_v3 = vpop.xlane.xlu0 %1476  ;;  %3705 = vmatpush3.bf16.msra.mxu0 %v3951_v26 }
 0x1be   : > { %4004 = vpow2.f32 %v1688_v63  ;;  %v1594_v1 = vsub.f32 %v4550_v4, %v1477_v3  ;;  %3706 = vmatprep.subr.bf16.mxu0 %v3953_v49 }
 0x1bf   : > { %v4839_v50 = vpop.eup %3992  ;;  %v1690_v0 = vmul.f32 1.442695, %v1605_v45  ;;  %1778 = vadd.xlane.f32.xlu1 %v4834_v58  ;;  %4006 = vpow2.f32 %v1658_v39  ;;  %v3952_v39 = vld [vmem:[%s4823_s25 + $0x68] sm:$0xff]  }
 0x1c0   : > { %v1668_v53 = vmul.f32 1.442695, %v1594_v1  ;;  %v1479_v43 = vpop.xlane.xlu1 %1478  ;;  %1788 = vadd.xlane.f32.xlu0 %v4839_v50  ;;  %v4844_v4 = vpop.eup %3994  ;;  %3734 = vmatprep.subr.bf16.mxu1 %v3952_v39 }
 0x1c1   : > { %v1595_v5 = vsub.f32 %v4564_v9, %v1479_v43  ;;  %v1509_v52 = vpop.xlane.xlu0 %1508  ;;  %3735 = vmatpush3.bf16.msra.mxu1 %v3952_v39  ;;  %3707 = vmatpush3.bf16.msra.mxu0 %v3953_v49  ;;  %v3957_v39 = vld [vmem:[%s4823_s25 + $0x8] sm:$0xff]  }
 0x1c2   : > { %4008 = vpow2.f32 %v1668_v53  ;;  %v1610_v55 = vsub.f32 %v4560_v8, %v1509_v52  ;;  %3708 = vmatprep.subr.bf16.mxu0 %v3955_v57 }
 0x1c3   : > { %v4849_v56 = vpop.eup %3996  ;;  %v1670_v40 = vmul.f32 1.442695, %v1595_v5  ;;  %1810 = vadd.xlane.f32.xlu1 %v4844_v4  ;;  %4010 = vpow2.f32 %v1690_v0  ;;  %v3954_v0 = vld [vmem:[%s4823_s25 + $0x60] sm:$0xff]  }
 0x1c4   : > { %v1700_v35 = vmul.f32 1.442695, %v1610_v55  ;;  %v1511_v9 = vpop.xlane.xlu1 %1510  ;;  %1820 = vadd.xlane.f32.xlu0 %v4849_v56  ;;  %v4854_v8 = vpop.eup %3998  ;;  %3736 = vmatprep.subr.bf16.mxu1 %v3954_v0 }
 0x1c5   : > { %v1611_v41 = vsub.f32 %v4570_v11, %v1511_v9  ;;  %v1473_v23 = vpop.xlane.xlu0 %1472  ;;  %3737 = vmatpush3.bf16.msra.mxu1 %v3954_v0  ;;  %3709 = vmatpush3.bf16.msra.mxu0 %v3955_v57  ;;  %v3959_v0 = vld [vmem:[%s4823_s25] sm:$0xff]  }
 0x1c6   : > { %4012 = vpow2.f32 %v1700_v35  ;;  %v1592_v61 = vsub.f32 %v4575_v13, %v1473_v23  ;;  %3710 = vmatprep.subr.bf16.mxu0 %v3957_v39 }
 0x1c7   : > { %v4859_v63 = vpop.eup %4000  ;;  %v1702_v6 = vmul.f32 1.442695, %v1611_v41  ;;  %1790 = vadd.xlane.f32.xlu1 %v4854_v8  ;;  %4014 = vpow2.f32 %v1670_v40  ;;  %v3956_v40 = vld [vmem:[%s4823_s25 + $0x58] sm:$0xff]  }
 0x1c8   : > { %v1664_v45 = vmul.f32 1.442695, %v1592_v61  ;;  %v1475_v11 = vpop.xlane.xlu1 %1474  ;;  %1784 = vadd.xlane.f32.xlu0 %v4859_v63  ;;  %v4864_v13 = vpop.eup %4002  ;;  %3738 = vmatprep.subr.bf16.mxu1 %v3956_v40 }
 0x1c9   : > { %v1593_v3 = vsub.f32 %v4580_v15, %v1475_v11  ;;  %v1505_v1 = vpop.xlane.xlu0 %1504  ;;  %3739 = vmatpush3.bf16.msra.mxu1 %v3956_v40  ;;  %3711 = vmatpush3.bf16.msra.mxu0 %v3957_v39  ;;  %v3961_v40 = vld [vmem:[%s4823_s25 + $0x40] sm:$0xff]  }
 0x1ca   : > { %4016 = vpow2.f32 %v1664_v45  ;;  %v1608_v47 = vsub.f32 %v4585_v17, %v1505_v1  ;;  %3712 = vmatprep.subr.bf16.mxu0 %v3959_v0 }
 0x1cb   : > { %v4869_v53 = vpop.eup %4004  ;;  %v1666_v43 = vmul.f32 1.442695, %v1593_v3  ;;  %1822 = vadd.xlane.f32.xlu1 %v4864_v13  ;;  %4018 = vpow2.f32 %v1702_v6  ;;  %v3958_v6 = vld [vmem:[%s4823_s25 + $0x50] sm:$0xff]  }
 0x1cc   : > { %v1696_v5 = vmul.f32 1.442695, %v1608_v47  ;;  %v1507_v15 = vpop.xlane.xlu1 %1506  ;;  %1816 = vadd.xlane.f32.xlu0 %v4869_v53  ;;  %v4874_v17 = vpop.eup %4006  ;;  %3740 = vmatprep.subr.bf16.mxu1 %v3958_v6 }
 0x1cd   : > { %v1609_v52 = vsub.f32 %v4594_v21, %v1507_v15  ;;  %v1485_v55 = vpop.xlane.xlu0 %1484  ;;  %3741 = vmatpush3.bf16.msra.mxu1 %v3958_v6  ;;  %3713 = vmatpush3.bf16.msra.mxu0 %v3959_v0 }
 0x1ce   : > { %4020 = vpow2.f32 %v1696_v5  ;;  %v1598_v33 = vsub.f32 %v4590_v20, %v1485_v55 }
 0x1cf   : > { %v4879_v35 = vpop.eup %4008  ;;  %v1698_v9 = vmul.f32 1.442695, %v1609_v52  ;;  %1786 = vadd.xlane.f32.xlu1 %v4874_v17  ;;  %4022 = vpow2.f32 %v1666_v43  ;;  %v3960_v43 = vld [vmem:[%s4823_s25 + $0x48] sm:$0xff]  }
 0x1d0   : > { %v1676_v41 = vmul.f32 1.442695, %v1598_v33  ;;  %v1487_v21 = vpop.xlane.xlu1 %1486  ;;  %1796 = vadd.xlane.f32.xlu0 %v4879_v35  ;;  %v4884_v20 = vpop.eup %4010  ;;  %3742 = vmatprep.subr.bf16.mxu1 %v3960_v43 }
 0x1d1   : > { %v1599_v23 = vsub.f32 %v4604_v25, %v1487_v21  ;;  %v1517_v61 = vpop.xlane.xlu0 %1516  ;;  %3743 = vmatpush3.bf16.msra.mxu1 %v3960_v43 }
 0x1d2   : > { %4024 = vpow2.f32 %v1676_v41  ;;  %v1614_v26 = vsub.f32 %v4600_v24, %v1517_v61  ;;  %3744 = vmatprep.subr.bf16.mxu1 %v3961_v40 }
 0x1d3   : > { %v4889_v45 = vpop.eup %4012  ;;  %v1678_v11 = vmul.f32 1.442695, %v1599_v23  ;;  %1818 = vadd.xlane.f32.xlu1 %v4884_v20  ;;  %4026 = vpow2.f32 %v1698_v9 }
 0x1d4   : > { %v1708_v3 = vmul.f32 1.442695, %v1614_v26  ;;  %v1519_v25 = vpop.xlane.xlu1 %1518  ;;  %1828 = vadd.xlane.f32.xlu0 %v4889_v45  ;;  %v4894_v24 = vpop.eup %4014 }
 0x1d5   : > { %v1615_v1 = vsub.f32 %v4610_v27, %v1519_v25  ;;  %v1481_v47 = vpop.xlane.xlu0 %1480  ;;  %3745 = vmatpush3.bf16.msra.mxu1 %v3961_v40 }
 0x1d6   : > { %4028 = vpow2.f32 %v1708_v3  ;;  %v1596_v49 = vsub.f32 %v4615_v29, %v1481_v47 }
 0x1d7   : > { %v4899_v5 = vpop.eup %4016  ;;  %1798 = vadd.xlane.f32.xlu1 %v4894_v24  ;;  %4030 = vpow2.f32 %v1678_v11  ;;  %v1710_v27 = vmul.f32 1.442695, %v1615_v1 }
 0x1d8   : > { %v1672_v15 = vmul.f32 1.442695, %v1596_v49  ;;  %v1483_v52 = vpop.xlane.xlu1 %1482  ;;  %1792 = vadd.xlane.f32.xlu0 %v4899_v5  ;;  %v4904_v29 = vpop.eup %4018 }
 0x1d9   : > { %v1597_v55 = vsub.f32 %v4620_v30, %v1483_v52  ;;  %v1513_v33 = vpop.xlane.xlu0 %1512 }
 0x1da   : > { %4032 = vpow2.f32 %v1672_v15  ;;  %v1612_v57 = vsub.f32 %v4625_v32, %v1513_v33 }
 0x1db   : > { %v4908_v9 = vpop.eup %4020  ;;  %1830 = vadd.xlane.f32.xlu1 %v4904_v29  ;;  %4034 = vpow2.f32 %v1710_v27  ;;  %v1674_v30 = vmul.f32 1.442695, %v1597_v55 }
 0x1dc   : > { %v1704_v41 = vmul.f32 1.442695, %v1612_v57  ;;  %v1515_v21 = vpop.xlane.xlu1 %1514  ;;  %1824 = vadd.xlane.f32.xlu0 %v4908_v9  ;;  %v4913_v26 = vpop.eup %4022 }
 0x1dd   : > { %v1613_v23 = vsub.f32 %v4630_v34, %v1515_v21  ;;  %v1525_v61 = vpop.xlane.xlu0 %1524 }
 0x1de   : > { %4036 = vpow2.f32 %v1704_v41  ;;  %v1618_v32 = vsub.f32 %v4635_v38, %v1525_v61 }
 0x1df   : > { %v4916_v39 = vpop.eup %4024  ;;  %1794 = vadd.xlane.f32.xlu1 %v4913_v26  ;;  %4038 = vpow2.f32 %v1674_v30  ;;  %v1706_v11 = vmul.f32 1.442695, %v1613_v23 }
 0x1e0   : > { %v1716_v6 = vmul.f32 1.442695, %v1618_v32  ;;  %1804 = vadd.xlane.f32.xlu0 %v4916_v39  ;;  %v4920_v1 = vpop.eup %4026 }
 0x1e1   : > { %v1557_v3 = vpop.xlane.xlu0 %1556  ;;  %v1527_v25 = vpop.xlane.xlu1 %1526 }
 0x1e2   : > { %4040 = vpow2.f32 %v1716_v6  ;;  %v1634_v34 = vsub.f32 %v4640_v44, %v1557_v3  ;;  %v1619_v47 = vsub.f32 %v4644_v48, %v1527_v25 }
 0x1e3   : > { %v4924_v38 = vpop.eup %4028  ;;  %1826 = vadd.xlane.f32.xlu1 %v4920_v1  ;;  %4042 = vpow2.f32 %v1706_v11 }
 0x1e4   : > { %v1748_v49 = vmul.f32 1.442695, %v1634_v34  ;;  %1836 = vadd.xlane.f32.xlu0 %v4924_v38  ;;  %v1718_v0 = vmul.f32 1.442695, %v1619_v47  ;;  %v4928_v52 = vpop.eup %4030 }
 0x1e5   : > { %v1521_v43 = vpop.xlane.xlu0 %1520  ;;  %v1559_v15 = vpop.xlane.xlu1 %1558 }
 0x1e6   : > { %4044 = vpow2.f32 %v1748_v49  ;;  %v1616_v27 = vsub.f32 %v4650_v51, %v1521_v43  ;;  %v1635_v44 = vsub.f32 %v4654_v54, %v1559_v15 }
 0x1e7   : > { %v4932_v55 = vpop.eup %4032  ;;  %1806 = vadd.xlane.f32.xlu1 %v4928_v52  ;;  %4046 = vpow2.f32 %v1718_v0 }
 0x1e8   : > { %v1712_v48 = vmul.f32 1.442695, %v1616_v27  ;;  %1800 = vadd.xlane.f32.xlu0 %v4932_v55  ;;  %v1750_v33 = vmul.f32 1.442695, %v1635_v44  ;;  %v4936_v41 = vpop.eup %4034 }
 0x1e9   : > { %v1553_v57 = vpop.xlane.xlu0 %1552  ;;  %v1523_v40 = vpop.xlane.xlu1 %1522 }
 0x1ea   : > { %4048 = vpow2.f32 %v1712_v48  ;;  %v1632_v21 = vsub.f32 %v4660_v60, %v1553_v57  ;;  %v1617_v51 = vsub.f32 %v4664_v62, %v1523_v40 }
 0x1eb   : > { %v4940_v30 = vpop.eup %4036  ;;  %1838 = vadd.xlane.f32.xlu1 %v4936_v41  ;;  %4050 = vpow2.f32 %v1750_v33 }
 0x1ec   : > { %v1744_v54 = vmul.f32 1.442695, %v1632_v21  ;;  %1832 = vadd.xlane.f32.xlu0 %v4940_v30  ;;  %v1714_v23 = vmul.f32 1.442695, %v1617_v51  ;;  %v4944_v6 = vpop.eup %4038 }
 0x1ed   : > { %v1555_v61 = vpop.xlane.xlu1 %1554  ;;  %v1533_v32 = vpop.xlane.xlu0 %1532 }
 0x1ee   : > { %4052 = vpow2.f32 %v1744_v54  ;;  %v1633_v11 = vsub.f32 %v4674_v7, %v1555_v61  ;;  %v1622_v60 = vsub.f32 %v4670_v2, %v1533_v32 }
 0x1ef   : > { %v4948_v3 = vpop.eup %4040  ;;  %1802 = vadd.xlane.f32.xlu1 %v4944_v6  ;;  %4054 = vpow2.f32 %v1714_v23 }
 0x1f0   : > { %v1724_v62 = vmul.f32 1.442695, %v1622_v60  ;;  %1844 = vadd.xlane.f32.xlu0 %v4948_v3  ;;  %v1746_v25 = vmul.f32 1.442695, %v1633_v11  ;;  %v4952_v49 = vpop.eup %4042 }
 0x1f1   : > { %v1565_v34 = vpop.xlane.xlu0 %1564  ;;  %v1535_v47 = vpop.xlane.xlu1 %1534 }
 0x1f2   : > { %v1638_v0 = vsub.f32 %v4680_v10, %v1565_v34  ;;  %v1623_v43 = vsub.f32 %v4684_v16, %v1535_v47  ;;  %4056 = vpow2.f32 %v1724_v62  ;;  %v4985_v34 = vld [vmem:[%s4823_s25 + $0xf8] sm:$0xff]  }
 0x1f3   : > { %v4956_v7 = vpop.eup %4044  ;;  %1834 = vadd.xlane.f32.xlu1 %v4952_v49  ;;  %4058 = vpow2.f32 %v1746_v25  ;;  %3794 = vmatprep.subr.bf16.mxu1 %v4985_v34 }
 0x1f4   : > { %v1756_v2 = vmul.f32 1.442695, %v1638_v0  ;;  %1876 = vadd.xlane.f32.xlu0 %v4956_v7  ;;  %v1726_v15 = vmul.f32 1.442695, %v1623_v43  ;;  %v4960_v48 = vpop.eup %4046 }
 0x1f5   : > { %v1529_v27 = vpop.xlane.xlu0 %1528  ;;  %v1567_v44 = vpop.xlane.xlu1 %1566 }
 0x1f6   : > { %4060 = vpow2.f32 %v1756_v2  ;;  %v1620_v10 = vsub.f32 %v4690_v19, %v1529_v27  ;;  %v1639_v16 = vsub.f32 %v4694_v22, %v1567_v44  ;;  %v4973_v22 = vld [vmem:[%s4823_s25 + $0xb8] sm:$0xff]  }
 0x1f7   : > { %v4964_v33 = vpop.eup %4048  ;;  %1846 = vadd.xlane.f32.xlu1 %v4960_v48  ;;  %4062 = vpow2.f32 %v1726_v15  ;;  %3762 = vmatprep.subr.bf16.mxu0 %v4973_v22 }
 0x1f8   : > { %v1720_v57 = vmul.f32 1.442695, %v1620_v10  ;;  %1840 = vadd.xlane.f32.xlu0 %v4964_v33  ;;  %v1758_v40 = vmul.f32 1.442695, %v1639_v16  ;;  %v4968_v54 = vpop.eup %4050 }
 0x1f9   : > { %v1561_v21 = vpop.xlane.xlu0 %1560  ;;  %v1531_v51 = vpop.xlane.xlu1 %1530 }
 0x1fa   : > { %4064 = vpow2.f32 %v1720_v57  ;;  %v1636_v23 = vsub.f32 %v4700_v28, %v1561_v21  ;;  %v1621_v19 = vsub.f32 %v4704_v31, %v1531_v51 }
 0x1fb   : > { %v4975_v61 = vpop.eup %4052  ;;  %1878 = vadd.xlane.f32.xlu1 %v4968_v54  ;;  %4066 = vpow2.f32 %v1758_v40 }
 0x1fc   : > { %v1752_v32 = vmul.f32 1.442695, %v1636_v23  ;;  %1872 = vadd.xlane.f32.xlu0 %v4975_v61  ;;  %v1722_v11 = vmul.f32 1.442695, %v1621_v19  ;;  %v4980_v25 = vpop.eup %4054  ;;  %v5363_v19 = vld [vmem:[#allocation4_spill] sm:$0xff] }
 0x1fd   : > { %v1563_v60 = vpop.xlane.xlu1 %1562  ;;  %v1541_v62 = vpop.xlane.xlu0 %1540 }
 0x1fe   : > { %4068 = vpow2.f32 %v1752_v32  ;;  %v1637_v28 = vsub.f32 %v4714_v46, %v1563_v60  ;;  %v1626_v31 = vsub.f32 %v4710_v37, %v1541_v62  ;;  %v5360_v46 = vld [vmem:[#allocation2_spill] sm:$0xff]  ;;  %v5361_v37 = vld [vmem:[#allocation3_spill] sm:$0xff] }
 0x1ff   : > { %1842 = vadd.xlane.f32.xlu1 %v4980_v25  ;;  %v4988_v47 = vpop.eup %4056  ;;  %4070 = vpow2.f32 %v1722_v11  ;;  %v5364_v11 = vld [vmem:[#allocation5_spill] sm:$0xff] }
 0x200   : > { %5359 = vst [vmem:[#allocation17_spill] sm:$0xff] %v4988_v47  ;;  %v1732_v0 = vmul.f32 1.442695, %v1626_v31  ;;  %v1754_v43 = vmul.f32 1.442695, %v1637_v28  ;;  %1852 = vadd.xlane.f32.xlu0 %v4988_v47  ;;  %v4992_v27 = vpop.eup %4058 }
 0x201   : > { %v1573_v2 = vpop.xlane.xlu0 %1572  ;;  %v1543_v15 = vpop.xlane.xlu1 %1542 }
 0x202   : > { %v1642_v44 = vsub.f32 %v5360_v46, %v1573_v2  ;;  %v1627_v10 = vsub.f32 %v5361_v37, %v1543_v15  ;;  %4072 = vpow2.f32 %v1732_v0  ;;  %v5367_v15 = vld [vmem:[#allocation6_spill] sm:$0xff] }
 0x203   : > { %v4996_v16 = vpop.eup %4060  ;;  %1874 = vadd.xlane.f32.xlu1 %v4992_v27  ;;  %4074 = vpow2.f32 %v1754_v43 }
 0x204   : > { %5362 = vst [vmem:[#allocation2_spill] sm:$0xff] %v4996_v16  ;;  %v1764_v57 = vmul.f32 1.442695, %v1642_v44  ;;  %v1734_v40 = vmul.f32 1.442695, %v1627_v10  ;;  %1884 = vadd.xlane.f32.xlu0 %v4996_v16  ;;  %v5000_v23 = vpop.eup %4062  ;;  %v5368_v44 = vld [vmem:[#allocation7_spill] sm:$0xff] }
 0x205   : > { %v1537_v21 = vpop.xlane.xlu0 %1536  ;;  %v1575_v51 = vpop.xlane.xlu1 %1574 }
 0x206   : > { %4076 = vpow2.f32 %v1764_v57  ;;  %v1624_v32 = vsub.f32 %v5363_v19, %v1537_v21  ;;  %v1643_v60 = vsub.f32 %v5364_v11, %v1575_v51 }
 0x207   : > { %v5004_v62 = vpop.eup %4064  ;;  %1854 = vadd.xlane.f32.xlu1 %v5000_v23  ;;  %4078 = vpow2.f32 %v1734_v40 }
 0x208   : > { %5365 = vst [vmem:[#allocation3_spill] sm:$0xff] %v5004_v62  ;;  %v1728_v28 = vmul.f32 1.442695, %v1624_v32  ;;  %v1766_v31 = vmul.f32 1.442695, %v1643_v60  ;;  %1848 = vadd.xlane.f32.xlu0 %v5004_v62  ;;  %v5008_v2 = vpop.eup %4066  ;;  %v5371_v32 = vld [vmem:[#allocation9_spill] sm:$0xff] }
 0x209   : > { %v1569_v0 = vpop.xlane.xlu0 %1568  ;;  %v1539_v43 = vpop.xlane.xlu1 %1538  ;;  %5366 = vst [vmem:[#allocation4_spill] sm:$0xff] %v5008_v2  ;;  %v5372_v60 = vld [vmem:[#allocation8_spill] sm:$0xff] }
 0x20a   : > { %4080 = vpow2.f32 %v1728_v28  ;;  %v1640_v46 = vsub.f32 %v5367_v15, %v1569_v0  ;;  %v1625_v37 = vsub.f32 %v5368_v44, %v1539_v43 }
 0x20b   : > { %v5012_v10 = vpop.eup %4068  ;;  %1886 = vadd.xlane.f32.xlu1 %v5008_v2  ;;  %4082 = vpow2.f32 %v1766_v31 }
 0x20c   : > { %5369 = vst [vmem:[#allocation5_spill] sm:$0xff] %v5012_v10  ;;  %v1760_v57 = vmul.f32 1.442695, %v1640_v46  ;;  %v1730_v21 = vmul.f32 1.442695, %v1625_v37  ;;  %1880 = vadd.xlane.f32.xlu0 %v5012_v10  ;;  %v5016_v19 = vpop.eup %4070  ;;  %v5375_v37 = vld [vmem:[#allocation11_spill] sm:$0xff] }
 0x20d   : > { %v1571_v40 = vpop.xlane.xlu1 %1570  ;;  %v1549_v51 = vpop.xlane.xlu0 %1548  ;;  %5370 = vst [vmem:[#allocation6_spill] sm:$0xff] %v5016_v19  ;;  %v5383_v10 = vld [vmem:[#allocation15_spill] sm:$0xff] }
 0x20e   : > { %4084 = vpow2.f32 %v1760_v57  ;;  %v1641_v11 = vsub.f32 %v5371_v32, %v1571_v40  ;;  %v1630_v28 = vsub.f32 %v5372_v60, %v1549_v51 }
 0x20f   : > { %1850 = vadd.xlane.f32.xlu1 %v5016_v19  ;;  %v5021_v0 = vpop.eup %4072  ;;  %4086 = vpow2.f32 %v1730_v21 }
 0x210   : > { %5373 = vst [vmem:[#allocation7_spill] sm:$0xff] %v5021_v0  ;;  %v1740_v43 = vmul.f32 1.442695, %v1630_v28  ;;  %v1762_v15 = vmul.f32 1.442695, %v1641_v11  ;;  %1860 = vadd.xlane.f32.xlu0 %v5021_v0  ;;  %v5024_v44 = vpop.eup %4074  ;;  %v5378_v11 = vld [vmem:[#allocation12_spill] sm:$0xff] }
 0x211   : > { %v1581_v31 = vpop.xlane.xlu0 %1580  ;;  %v1551_v46 = vpop.xlane.xlu1 %1550  ;;  %5374 = vst [vmem:[#allocation9_spill] sm:$0xff] %v5024_v44 }
 0x212   : > { %v1631_v16 = vsub.f32 %v5375_v37, %v1551_v46  ;;  %4088 = vpow2.f32 %v1740_v43  ;;  %v5380_v37 = vld [vmem:[#allocation10_spill] sm:$0xff] }
 0x213   : > { %v5027_v57 = vpop.eup %4076  ;;  %1882 = vadd.xlane.f32.xlu1 %v5024_v44  ;;  %4090 = vpow2.f32 %v1762_v15  ;;  %v1646_v0 = vsub.f32 %v5380_v37, %v1581_v31  ;;  %v5386_v37 = vld [vmem:[#allocation16_spill] sm:$0xff] }
 0x214   : > { %5376 = vst [vmem:[#allocation8_spill] sm:$0xff] %v5027_v57  ;;  %v1742_v40 = vmul.f32 1.442695, %v1631_v16  ;;  %1892 = vadd.xlane.f32.xlu0 %v5027_v57  ;;  %v5031_v32 = vpop.eup %4078  ;;  %v5382_v57 = vld [vmem:[#allocation14_spill] sm:$0xff] }
 0x215   : > { %v1545_v51 = vpop.xlane.xlu0 %1544  ;;  %v1583_v21 = vpop.xlane.xlu1 %1582  ;;  %5377 = vst [vmem:[#allocation11_spill] sm:$0xff] %v5031_v32 }
 0x216   : > { %v1628_v60 = vsub.f32 %v5378_v11, %v1545_v51  ;;  %4092 = vpow2.f32 %v1742_v40 }
 0x217   : > { %v5034_v28 = vpop.eup %4080  ;;  %1862 = vadd.xlane.f32.xlu1 %v5031_v32  ;;  %v1772_v32 = vmul.f32 1.442695, %v1646_v0 }
 0x218   : > { %5379 = vst [vmem:[#allocation12_spill] sm:$0xff] %v5034_v28  ;;  %v1736_v46 = vmul.f32 1.442695, %v1628_v60  ;;  %1856 = vadd.xlane.f32.xlu0 %v5034_v28  ;;  %v5039_v15 = vpop.eup %4082 }
 0x219   : > { %v1577_v43 = vpop.xlane.xlu0 %1576  ;;  %v1547_v16 = vpop.xlane.xlu1 %1546  ;;  %5381 = vst [vmem:[#allocation10_spill] sm:$0xff] %v5039_v15 }
 0x21a   : > { %4094 = vpow2.f32 %v1736_v46  ;;  %v1644_v44 = vsub.f32 %v5382_v57, %v1577_v43  ;;  %v1629_v2 = vsub.f32 %v5383_v10, %v1547_v16  ;;  %v5387_v46 = vld [vmem:[#allocation13_spill] sm:$0xff] }
 0x21b   : > { %v5043_v51 = vpop.eup %4084  ;;  %1894 = vadd.xlane.f32.xlu1 %v5039_v15  ;;  %v1647_v47 = vsub.f32 %v5387_v46, %v1583_v21 }
 0x21c   : > { %5384 = vst [vmem:[#allocation14_spill] sm:$0xff] %v5043_v51  ;;  %v1768_v11 = vmul.f32 1.442695, %v1644_v44  ;;  %v1738_v60 = vmul.f32 1.442695, %v1629_v2  ;;  %1888 = vadd.xlane.f32.xlu0 %v5043_v51  ;;  %v5047_v40 = vpop.eup %4086 }
 0x21d   : > { %v1579_v31 = vpop.xlane.xlu1 %1578  ;;  %5385 = vst [vmem:[#allocation15_spill] sm:$0xff] %v5047_v40  ;;  %v1774_v0 = vmul.f32 1.442695, %v1647_v47 }
 0x21e   : > { %4096 = vpow2.f32 %v1768_v11  ;;  %v1645_v28 = vsub.f32 %v5386_v37, %v1579_v31 }
 0x21f   : > { %4098 = vpow2.f32 %v1738_v60  ;;  %1858 = vadd.xlane.f32.xlu1 %v5047_v40  ;;  %v5052_v10 = vpop.eup %4088 }
 0x220   : > { %5388 = vst [vmem:[#allocation16_spill] sm:$0xff] %v5052_v10  ;;  %v1770_v57 = vmul.f32 1.442695, %v1645_v28  ;;  %4100 = vpow2.f32 %v1772_v32  ;;  %1868 = vadd.xlane.f32.xlu0 %v5052_v10  ;;  %v5055_v2 = vpop.eup %4090 }
 0x221   : > { %5389 = vst [vmem:[#allocation13_spill] sm:$0xff] %v5055_v2 }
 0x222   : > { %4102 = vpow2.f32 %v1770_v57 }
 0x223   : > { %1890 = vadd.xlane.f32.xlu1 %v5055_v2  ;;  %v5058_v44 = vpop.eup %4092  ;;  %4104 = vpow2.f32 %v1774_v0 }
 0x224   : > { %5390 = vst [vmem:[#allocation18_spill] sm:$0xff] %v5058_v44 }
 0x227   : > { %v5060_v43 = vpop.eup %4094  ;;  %1870 = vadd.xlane.f32.xlu1 %v5058_v44 }
 0x228   : > { %5391 = vst [vmem:[#allocation19_spill] sm:$0xff] %v5060_v43  ;;  %1864 = vadd.xlane.f32.xlu0 %v5060_v43 }
 0x22b   : > { %v5064_v21 = vpop.eup %4096 }
 0x22c   : > { %5392 = vst [vmem:[#allocation20_spill] sm:$0xff] %v5064_v21  ;;  %v5066_v32 = vpop.eup %4098  ;;  %1896 = vadd.xlane.f32.xlu0 %v5064_v21 }
 0x22d   : > { %5393 = vst [vmem:[#allocation21_spill] sm:$0xff] %v5066_v32  ;;  %1866 = vadd.xlane.f32.xlu1 %v5066_v32  ;;  %v5070_v47 = vpop.eup %4100 }
 0x22e   : > { %5394 = vst [vmem:[#allocation22_spill] sm:$0xff] %v5070_v47 }
 0x22f   : > { %v5072_v28 = vpop.eup %4102 }
 0x230   : > { %5395 = vst [vmem:[#allocation23_spill] sm:$0xff] %v5072_v28  ;;  %1900 = vadd.xlane.f32.xlu0 %v5070_v47  ;;  %v5076_v16 = vpop.eup %4104 }
 0x231   : > { %1898 = vadd.xlane.f32.xlu1 %v5072_v28  ;;  %5396 = vst [vmem:[#allocation24_spill] sm:$0xff] %v5076_v16 }
 0x235   : > { %1902 = vadd.xlane.f32.xlu1 %v5076_v16 }
 0x239   : > { %v1781_v11 = vpop.xlane.xlu0 %1780 }
 0x23d   : > { %v1813_v60 = vpop.xlane.xlu0 %1812 }
 0x240   : > { %v1783_v31 = vpop.xlane.xlu1 %1782 }
 0x241   : > { %v1777_v37 = vpop.xlane.xlu0 %1776  ;;  %4106 = vrcp.f32 %v1783_v31 }
 0x242   : > { %4108 = vrcp.f32 %v1777_v37 }
 0x243   : > { %4110 = vrcp.f32 %v1781_v11 }
 0x244   : > { %v1815_v46 = vpop.xlane.xlu1 %1814 }
 0x245   : > { %v1809_v57 = vpop.xlane.xlu0 %1808 }
 0x248   : > { %v1779_v0 = vpop.xlane.xlu1 %1778 }
 0x249   : > { %4112 = vrcp.f32 %v1779_v0  ;;  %v1789_v21 = vpop.xlane.xlu0 %1788 }
 0x24a   : > { %4114 = vrcp.f32 %v1815_v46 }
 0x24b   : > { %4116 = vrcp.f32 %v1809_v57 }
 0x24c   : > { %4118 = vrcp.f32 %v1813_v60  ;;  %v1811_v47 = vpop.xlane.xlu1 %1810 }
 0x24d   : > { %4120 = vrcp.f32 %v1811_v47  ;;  %v1821_v28 = vpop.xlane.xlu0 %1820 }
 0x24e   : > { %v4107_v32 = vpop.eup %4106 }
 0x24f   : > { %v4109_v43 = vpop.eup %4108  ;;  %v2035_v11 = vmul.f32 %v4107_v32, %v4811_v18  ;;  %v3963_v32 = vld [vmem:[%s4823_s25 + $0xb0] sm:$0xff]  }
 0x250   : > { %v1791_v10 = vpop.xlane.xlu1 %1790  ;;  %v4111_v2 = vpop.eup %4110  ;;  %v2032_v37 = vmul.f32 %v4109_v43, %v4814_v36 }
 0x251   : > { %v1785_v16 = vpop.xlane.xlu0 %1784  ;;  %4122 = vrcp.f32 %v1791_v10  ;;  %v2034_v57 = vmul.f32 %v4111_v2, %v4802_v12 }
 0x252   : > { %4124 = vrcp.f32 %v1785_v16 }
 0x253   : > { %4126 = vrcp.f32 %v1789_v21  ;;  %v2097_v10 = vpack.c.bf16 %v2035_v11, %v2034_v57 }
 0x254   : > { %v1823_v44 = vpop.xlane.xlu1 %1822 }
 0x255   : > { %v1817_v51 = vpop.xlane.xlu0 %1816 }
 0x256   : > { %v4113_v15 = vpop.eup %4112 }
 0x257   : > { %v4115_v31 = vpop.eup %4114  ;;  %v2033_v60 = vmul.f32 %v4113_v15, %v4834_v58 }
 0x258   : > { %v4117_v47 = vpop.eup %4116  ;;  %v1787_v46 = vpop.xlane.xlu1 %1786  ;;  %v2051_v18 = vmul.f32 %v4115_v31, %v4825_v59 }
 0x259   : > { %v4119_v0 = vpop.eup %4118  ;;  %4128 = vrcp.f32 %v1787_v46  ;;  %v1797_v40 = vpop.xlane.xlu0 %1796  ;;  %v2096_v19 = vpack.c.bf16 %v2033_v60, %v2032_v37  ;;  %v2048_v36 = vmul.f32 %v4117_v47, %v4829_v42  ;;  %v3970_v37 = vld [vmem:[%s4823_s25 + $0xe0] sm:$0xff]  }
 0x25a   : > { %v4121_v62 = vpop.eup %4120  ;;  %4130 = vrcp.f32 %v1823_v44  ;;  %v2050_v15 = vmul.f32 %v4119_v0, %v4807_v14  ;;  %v3967_v14 = vld [vmem:[%s4823_s25 + $0xa0] sm:$0xff]  }
 0x25b   : > { %4132 = vrcp.f32 %v1817_v51  ;;  %3714 = vmatprep.mubr.bf16.mxu0 %v2096_v19  ;;  %v2049_v58 = vmul.f32 %v4121_v62, %v4844_v4  ;;  %v3965_v51 = vld [vmem:[%s4823_s25 + $0xa8] sm:$0xff]   ;;  %v3966_v19 = vld [vmem:[%s4823_s25 + $0xf0] sm:$0xff]  }
 0x25c   : > { %4134 = vrcp.f32 %v1821_v28  ;;  %3715 = vmatmul.mubr.bf16.vlgmr.msra.gmra.mxu0 %v2097_v10  ;;  %v1819_v12 = vpop.xlane.xlu1 %1818  ;;  %v2105_v59 = vpack.c.bf16 %v2051_v18, %v2050_v15  ;;  %v3968_v62 = vld [vmem:[%s4823_s25 + $0xe8] sm:$0xff]  }
 0x25d   : > { %4136 = vrcp.f32 %v1819_v12  ;;  %v1829_v2 = vpop.xlane.xlu0 %1828  ;;  %v2104_v44 = vpack.c.bf16 %v2049_v58, %v2048_v36  ;;  %3763 = vmatpush3.bf16.msra.mxu0 %v4973_v22  ;;  %v3972_v12 = vld [vmem:[%s4823_s25 + $0xd8] sm:$0xff]  }
 0x25e   : > { %3764 = vmatprep.subr.bf16.mxu0 %v3963_v32  ;;  %v4123_v43 = vpop.eup %4122 }
 0x25f   : > { %3746 = vmatprep.mubr.bf16.mxu1 %v2104_v44  ;;  %v4125_v21 = vpop.eup %4124  ;;  %v2039_v31 = vmul.f32 %v4123_v43, %v4854_v8 }
 0x260   : > { %3747 = vmatmul.mubr.bf16.vlgmr.msra.gmra.mxu1 %v2105_v59  ;;  %v1799_v42 = vpop.xlane.xlu1 %1798  ;;  %v4127_v28 = vpop.eup %4126  ;;  %v2036_v47 = vmul.f32 %v4125_v21, %v4859_v63 }
 0x261   : > { %v1793_v4 = vpop.xlane.xlu0 %1792  ;;  %3765 = vmatpush3.bf16.msra.mxu0 %v3963_v32  ;;  %3795 = vmatpush3.bf16.msra.mxu1 %v4985_v34  ;;  %4138 = vrcp.f32 %v1799_v42  ;;  %v3969_v34 = vld [vmem:[%s4823_s25 + $0x98] sm:$0xff]   ;;  %v2038_v10 = vmul.f32 %v4127_v28, %v4839_v50  ;;  %v3974_v42 = vld [vmem:[%s4823_s25 + $0xd0] sm:$0xff]  }
 0x262   : > { %3766 = vmatprep.subr.bf16.mxu0 %v3965_v51  ;;  %3796 = vmatprep.subr.bf16.mxu1 %v3966_v19  ;;  %4140 = vrcp.f32 %v1793_v4 }
 0x263   : > { %4142 = vrcp.f32 %v1797_v40  ;;  %v2099_v58 = vpack.c.bf16 %v2039_v31, %v2038_v10 }
 0x264   : > { %v1831_v22 = vpop.xlane.xlu1 %1830 }
 0x265   : > { %v1825_v16 = vpop.xlane.xlu0 %1824  ;;  %3767 = vmatpush3.bf16.msra.mxu0 %v3965_v51  ;;  %3797 = vmatpush3.bf16.msra.mxu1 %v3966_v19  ;;  %v3973_v19 = vld [vmem:[%s4823_s25 + $0x88] sm:$0xff]  }
 0x266   : > { %v4129_v11 = vpop.eup %4128  ;;  %3768 = vmatprep.subr.bf16.mxu0 %v3967_v14  ;;  %3798 = vmatprep.subr.bf16.mxu1 %v3968_v62 }
 0x267   : > { %v4131_v60 = vpop.eup %4130  ;;  %v2037_v46 = vmul.f32 %v4129_v11, %v4874_v17  ;;  %v3971_v17 = vld [vmem:[%s4823_s25 + $0x90] sm:$0xff]  }
 0x268   : > { %v4133_v57 = vpop.eup %4132  ;;  %v1795_v0 = vpop.xlane.xlu1 %1794  ;;  %v2055_v63 = vmul.f32 %v4131_v60, %v4864_v13 }
 0x269   : > { %v4135_v18 = vpop.eup %4134  ;;  %4144 = vrcp.f32 %v1795_v0  ;;  %v1805_v8 = vpop.xlane.xlu0 %1804  ;;  %v2098_v32 = vpack.c.bf16 %v2037_v46, %v2036_v47  ;;  %3769 = vmatpush3.bf16.msra.mxu0 %v3967_v14  ;;  %3799 = vmatpush3.bf16.msra.mxu1 %v3968_v62  ;;  %v2052_v50 = vmul.f32 %v4133_v57, %v4869_v53 }
 0x26a   : > { %v4137_v36 = vpop.eup %4136  ;;  %4146 = vrcp.f32 %v1831_v22  ;;  %3770 = vmatprep.subr.bf16.mxu0 %v3969_v34  ;;  %3800 = vmatprep.subr.bf16.mxu1 %v3970_v37  ;;  %v2054_v44 = vmul.f32 %v4135_v18, %v4849_v56  ;;  %v3975_v56 = vld [vmem:[%s4823_s25 + $0x80] sm:$0xff]  }
 0x26b   : > { %4148 = vrcp.f32 %v1825_v16  ;;  %3718 = vmatprep.mubr.bf16.mxu0 %v2098_v32  ;;  %v2053_v40 = vmul.f32 %v4137_v36, %v4884_v20  ;;  %v3977_v16 = vld [vmem:[%s4823_s25 + $0xc0] sm:$0xff]  }
 0x26c   : > { %4150 = vrcp.f32 %v1829_v2  ;;  %3719 = vmatmul.mubr.bf16.gmra.mxu0 %v2099_v58  ;;  %v1827_v15 = vpop.xlane.xlu1 %1826  ;;  %v2107_v51 = vpack.c.bf16 %v2055_v63, %v2054_v44  ;;  %v3976_v2 = vld [vmem:[%s4823_s25 + $0xc8] sm:$0xff]  }
 0x26d   : > { %4152 = vrcp.f32 %v1827_v15  ;;  %v1837_v59 = vpop.xlane.xlu0 %1836  ;;  %v2106_v13 = vpack.c.bf16 %v2053_v40, %v2052_v50  ;;  %3771 = vmatpush3.bf16.msra.mxu0 %v3969_v34  ;;  %3801 = vmatpush3.bf16.msra.mxu1 %v3970_v37 }
 0x26e   : > { %3772 = vmatprep.subr.bf16.mxu0 %v3971_v17  ;;  %3802 = vmatprep.subr.bf16.mxu1 %v3972_v12  ;;  %v4139_v4 = vpop.eup %4138 }
 0x26f   : > { %3750 = vmatprep.mubr.bf16.mxu1 %v2106_v13  ;;  %v4141_v14 = vpop.eup %4140  ;;  %v2043_v28 = vmul.f32 %v4139_v4, %v4894_v24 }
 0x270   : > { %3751 = vmatmul.mubr.bf16.gmra.mxu1 %v2107_v51  ;;  %v1807_v53 = vpop.xlane.xlu1 %1806  ;;  %v4143_v43 = vpop.eup %4142  ;;  %v2040_v31 = vmul.f32 %v4141_v14, %v4899_v5 }
 0x271   : > { %v1801_v20 = vpop.xlane.xlu0 %1800  ;;  %3773 = vmatpush3.bf16.msra.mxu0 %v3971_v17  ;;  %3803 = vmatpush3.bf16.msra.mxu1 %v3972_v12  ;;  %4154 = vrcp.f32 %v1807_v53  ;;  %v2042_v47 = vmul.f32 %v4143_v43, %v4879_v35 }
 0x272   : > { %3774 = vmatprep.subr.bf16.mxu0 %v3973_v19  ;;  %3804 = vmatprep.subr.bf16.mxu1 %v3974_v42  ;;  %4156 = vrcp.f32 %v1801_v20 }
 0x273   : > { %4158 = vrcp.f32 %v1805_v8  ;;  %v2101_v10 = vpack.c.bf16 %v2043_v28, %v2042_v47 }
 0x274   : > { %v1839_v62 = vpop.xlane.xlu1 %1838 }
 0x275   : > { %v1833_v21 = vpop.xlane.xlu0 %1832  ;;  %3775 = vmatpush3.bf16.msra.mxu0 %v3973_v19  ;;  %3805 = vmatpush3.bf16.msra.mxu1 %v3974_v42 }
 0x276   : > { %v4145_v22 = vpop.eup %4144  ;;  %3776 = vmatprep.subr.bf16.mxu0 %v3975_v56  ;;  %3806 = vmatprep.subr.bf16.mxu1 %v3976_v2 }
 0x277   : > { %v4147_v11 = vpop.eup %4146  ;;  %v2041_v34 = vmul.f32 %v4145_v22, %v4913_v26 }
 0x278   : > { %v4149_v37 = vpop.eup %4148  ;;  %v1803_v60 = vpop.xlane.xlu1 %1802  ;;  %v2059_v18 = vmul.f32 %v4147_v11, %v4904_v29 }
 0x279   : > { %v4151_v46 = vpop.eup %4150  ;;  %4160 = vrcp.f32 %v1803_v60  ;;  %v1845_v57 = vpop.xlane.xlu0 %1844  ;;  %v2100_v0 = vpack.c.bf16 %v2041_v34, %v2040_v31  ;;  %3777 = vmatpush3.bf16.msra.mxu0 %v3975_v56  ;;  %3807 = vmatpush3.bf16.msra.mxu1 %v3976_v2  ;;  %v2056_v5 = vmul.f32 %v4149_v37, %v4908_v9 }
 0x27a   : > { %v4153_v24 = vpop.eup %4152  ;;  %4162 = vrcp.f32 %v1839_v62  ;;  %3808 = vmatprep.subr.bf16.mxu1 %v3977_v16  ;;  %v2058_v8 = vmul.f32 %v4151_v46, %v4889_v45 }
 0x27b   : > { %4164 = vrcp.f32 %v1833_v21  ;;  %3722 = vmatprep.mubr.bf16.mxu0 %v2100_v0  ;;  %v2057_v26 = vmul.f32 %v4153_v24, %v4920_v1 }
 0x27c   : > { %4166 = vrcp.f32 %v1837_v59  ;;  %3723 = vmatmul.mubr.bf16.gmra.mxu0 %v2101_v10  ;;  %v1835_v35 = vpop.xlane.xlu1 %1834  ;;  %v2109_v58 = vpack.c.bf16 %v2059_v18, %v2058_v8 }
 0x27d   : > { %4168 = vrcp.f32 %v1835_v35  ;;  %v1877_v32 = vpop.xlane.xlu0 %1876  ;;  %v2108_v36 = vpack.c.bf16 %v2057_v26, %v2056_v5  ;;  %3809 = vmatpush3.bf16.msra.mxu1 %v3977_v16 }
 0x27e   : > { %v4155_v17 = vpop.eup %4154 }
 0x27f   : > { %3754 = vmatprep.mubr.bf16.mxu1 %v2108_v36  ;;  %v4157_v12 = vpop.eup %4156  ;;  %v2047_v15 = vmul.f32 %v4155_v17, %v4928_v52 }
 0x280   : > { %3755 = vmatmul.mubr.bf16.gmra.mxu1 %v2109_v58  ;;  %v1847_v29 = vpop.xlane.xlu1 %1846  ;;  %v4159_v9 = vpop.eup %4158  ;;  %v2044_v45 = vmul.f32 %v4157_v12, %v4932_v55 }
 0x281   : > { %v1841_v63 = vpop.xlane.xlu0 %1840  ;;  %4170 = vrcp.f32 %v1847_v29  ;;  %v2046_v19 = vmul.f32 %v4159_v9, %v4916_v39  ;;  %v5398_v9 = vld [vmem:[#allocation6_spill] sm:$0xff] }
 0x282   : > { %4172 = vrcp.f32 %v1841_v63 }
 0x283   : > { %4174 = vrcp.f32 %v1845_v57  ;;  %v2103_v2 = vpack.c.bf16 %v2047_v15, %v2046_v19 }
 0x284   : > { %v1879_v50 = vpop.xlane.xlu1 %1878 }
 0x285   : > { %v1873_v40 = vpop.xlane.xlu0 %1872 }
 0x286   : > { %v4161_v1 = vpop.eup %4160 }
 0x287   : > { %v4163_v44 = vpop.eup %4162  ;;  %v2045_v59 = vmul.f32 %v4161_v1, %v4944_v6 }
 0x288   : > { %v4165_v13 = vpop.eup %4164  ;;  %v1843_v51 = vpop.xlane.xlu1 %1842  ;;  %v2063_v52 = vmul.f32 %v4163_v44, %v4936_v41  ;;  %v5399_v44 = vld [vmem:[#allocation17_spill] sm:$0xff] }
 0x289   : > { %v4167_v42 = vpop.eup %4166  ;;  %4176 = vrcp.f32 %v1843_v51  ;;  %v2102_v53 = vpack.c.bf16 %v2045_v59, %v2044_v45  ;;  %v1853_v56 = vpop.xlane.xlu0 %1852  ;;  %v2060_v55 = vmul.f32 %v4165_v13, %v4940_v30 }
 0x28a   : > { %v4169_v20 = vpop.eup %4168  ;;  %4178 = vrcp.f32 %v1879_v50  ;;  %v2062_v39 = vmul.f32 %v4167_v42, %v4924_v38  ;;  %v5400_v42 = vld [vmem:[#allocation4_spill] sm:$0xff] }
 0x28b   : > { %4180 = vrcp.f32 %v1873_v40  ;;  %3726 = vmatprep.mubr.bf16.mxu0 %v2102_v53  ;;  %v2061_v6 = vmul.f32 %v4169_v20, %v4952_v49  ;;  %v5401_v53 = vld [vmem:[#allocation5_spill] sm:$0xff] }
 0x28c   : > { %4182 = vrcp.f32 %v1877_v32  ;;  %3727 = vmatmul.mubr.bf16.gmra.mxu0 %v2103_v2  ;;  %v1875_v4 = vpop.xlane.xlu1 %1874  ;;  %v2111_v43 = vpack.c.bf16 %v2063_v52, %v2062_v39 }
 0x28d   : > { %4184 = vrcp.f32 %v1875_v4  ;;  %v2110_v14 = vpack.c.bf16 %v2061_v6, %v2060_v55  ;;  %v1885_v62 = vpop.xlane.xlu0 %1884  ;;  %v5403_v55 = vld [vmem:[#allocation2_spill] sm:$0xff] }
 0x28e   : > { %v4171_v41 = vpop.eup %4170 }
 0x28f   : > { %3758 = vmatprep.mubr.bf16.mxu1 %v2110_v14  ;;  %v4173_v28 = vpop.eup %4172  ;;  %v2067_v31 = vmul.f32 %v4171_v41, %v4960_v48 }
 0x290   : > { %3759 = vmatmul.mubr.bf16.gmra.mxu1 %v2111_v43  ;;  %v1855_v21 = vpop.xlane.xlu1 %1854  ;;  %v4175_v11 = vpop.eup %4174  ;;  %v2064_v38 = vmul.f32 %v4173_v28, %v4964_v33 }
 0x291   : > { %v1849_v22 = vpop.xlane.xlu0 %1848  ;;  %4186 = vrcp.f32 %v1855_v21  ;;  %v2066_v46 = vmul.f32 %v4175_v11, %v4948_v3 }
 0x292   : > { %4188 = vrcp.f32 %v1849_v22 }
 0x293   : > { %4190 = vrcp.f32 %v1853_v56  ;;  %v2113_v18 = vpack.c.bf16 %v2067_v31, %v2066_v46  ;;  %v5402_v56 = vld [vmem:[#allocation9_spill] sm:$0xff]  ;;  %v5407_v46 = vld [vmem:[#allocation7_spill] sm:$0xff] }
 0x294   : > { %v1887_v16 = vpop.xlane.xlu1 %1886 }
 0x295   : > { %v1881_v49 = vpop.xlane.xlu0 %1880 }
 0x296   : > { %v4177_v30 = vpop.eup %4176 }
 0x297   : > { %v4179_v34 = vpop.eup %4178  ;;  %v2065_v37 = vmul.f32 %v4177_v30, %v4980_v25  ;;  %v5404_v30 = vld [vmem:[#allocation11_spill] sm:$0xff] }
 0x298   : > { %v4181_v60 = vpop.eup %4180  ;;  %v1851_v47 = vpop.xlane.xlu1 %1850  ;;  %v2083_v48 = vmul.f32 %v4179_v34, %v4968_v54  ;;  %v5405_v34 = vld [vmem:[#allocation12_spill] sm:$0xff] }
 0x299   : > { %v4183_v57 = vpop.eup %4182  ;;  %4192 = vrcp.f32 %v1851_v47  ;;  %v2112_v0 = vpack.c.bf16 %v2065_v37, %v2064_v38  ;;  %v1861_v10 = vpop.xlane.xlu0 %1860  ;;  %v2080_v33 = vmul.f32 %v4181_v60, %v4975_v61  ;;  %v5406_v37 = vld [vmem:[#allocation15_spill] sm:$0xff] }
 0x29a   : > { %v4185_v24 = vpop.eup %4184  ;;  %4194 = vrcp.f32 %v1887_v16  ;;  %v2082_v3 = vmul.f32 %v4183_v57, %v4956_v7  ;;  %v5397_v7 = vld [vmem:[#allocation3_spill] sm:$0xff] }
 0x29b   : > { %4196 = vrcp.f32 %v1881_v49  ;;  %3778 = vmatprep.mubr.bf16.mxu0 %v2112_v0  ;;  %v2081_v25 = vmul.f32 %v4185_v24, %v4992_v27 }
 0x29c   : > { %4198 = vrcp.f32 %v1885_v62  ;;  %3779 = vmatmul.mubr.bf16.vlgmr.msra.gmra.mxu0 %v2113_v18  ;;  %v1883_v5 = vpop.xlane.xlu1 %1882  ;;  %v2121_v8 = vpack.c.bf16 %v2083_v48, %v2082_v3  ;;  %v5409_v3 = vld [vmem:[#allocation14_spill] sm:$0xff] }
 0x29d   : > { %4200 = vrcp.f32 %v1883_v5  ;;  %v2120_v26 = vpack.c.bf16 %v2081_v25, %v2080_v33  ;;  %v1893_v35 = vpop.xlane.xlu0 %1892  ;;  %v5408_v25 = vld [vmem:[#allocation10_spill] sm:$0xff] }
 0x29e   : > { %v4187_v54 = vpop.eup %4186 }
 0x29f   : > { %3810 = vmatprep.mubr.bf16.mxu1 %v2120_v26  ;;  %v4189_v58 = vpop.eup %4188  ;;  %v2071_v27 = vmul.f32 %v4187_v54, %v5000_v23 }
 0x2a0   : > { %3811 = vmatmul.mubr.bf16.vlgmr.msra.gmra.mxu1 %v2121_v8  ;;  %v1863_v32 = vpop.xlane.xlu1 %1862  ;;  %v4191_v63 = vpop.eup %4190  ;;  %v2068_v50 = vmul.f32 %v4189_v58, %v5397_v7 }
 0x2a1   : > { %v1857_v36 = vpop.xlane.xlu0 %1856  ;;  %4202 = vrcp.f32 %v1863_v32  ;;  %v2070_v45 = vmul.f32 %v4191_v63, %v5399_v44  ;;  %v5411_v32 = vld [vmem:[#allocation8_spill] sm:$0xff] }
 0x2a2   : > { %4204 = vrcp.f32 %v1857_v36  ;;  %v5415_v44 = vld [vmem:[#allocation16_spill] sm:$0xff] }
 0x2a3   : > { %4206 = vrcp.f32 %v1861_v10  ;;  %v2115_v19 = vpack.c.bf16 %v2071_v27, %v2070_v45 }
 0x2a4   : > { %v1895_v29 = vpop.xlane.xlu1 %1894 }
 0x2a5   : > { %v1889_v12 = vpop.xlane.xlu0 %1888 }
 0x2a6   : > { %v4193_v61 = vpop.eup %4192 }
 0x2a7   : > { %v4195_v17 = vpop.eup %4194  ;;  %v2069_v40 = vmul.f32 %v4193_v61, %v5398_v9 }
 0x2a8   : > { %v4197_v1 = vpop.eup %4196  ;;  %v1859_v15 = vpop.xlane.xlu1 %1858  ;;  %v2087_v23 = vmul.f32 %v4195_v17, %v5400_v42 }
 0x2a9   : > { %v4199_v59 = vpop.eup %4198  ;;  %4208 = vrcp.f32 %v1859_v15  ;;  %v2114_v13 = vpack.c.bf16 %v2069_v40, %v2068_v50  ;;  %v2084_v20 = vmul.f32 %v4197_v1, %v5401_v53  ;;  %v1869_v4 = vpop.xlane.xlu0 %1868  ;;  %v5413_v50 = vld [vmem:[#allocation19_spill] sm:$0xff]  ;;  %v5414_v40 = vld [vmem:[#allocation21_spill] sm:$0xff] }
 0x2aa   : > { %v4201_v51 = vpop.eup %4200  ;;  %4210 = vrcp.f32 %v1895_v29  ;;  %v2086_v6 = vmul.f32 %v4199_v59, %v5403_v55 }
 0x2ab   : > { %4212 = vrcp.f32 %v1889_v12  ;;  %3782 = vmatprep.mubr.bf16.mxu0 %v2114_v13  ;;  %v2085_v2 = vmul.f32 %v4201_v51, %v5402_v56  ;;  %v5412_v12 = vld [vmem:[#allocation18_spill] sm:$0xff] }
 0x2ac   : > { %4214 = vrcp.f32 %v1893_v35  ;;  %3783 = vmatmul.mubr.bf16.gmra.mxu0 %v2115_v19  ;;  %v1891_v52 = vpop.xlane.xlu1 %1890  ;;  %v2123_v14 = vpack.c.bf16 %v2087_v23, %v2086_v6  ;;  %v5410_v35 = vld [vmem:[#allocation13_spill] sm:$0xff]  ;;  %v5416_v19 = vld [vmem:[#allocation20_spill] sm:$0xff]  ;;  %v5417_v23 = vld [vmem:[#allocation23_spill] sm:$0xff] }
 0x2ad   : > { %4216 = vrcp.f32 %v1891_v52  ;;  %v2122_v39 = vpack.c.bf16 %v2085_v2, %v2084_v20  ;;  %v5418_v52 = vld [vmem:[#allocation22_spill] sm:$0xff]  ;;  %v5419_v6 = vld [vmem:[#allocation24_spill] sm:$0xff] }
 0x2ae   : > { %v4203_v21 = vpop.eup %4202 }
 0x2af   : > { %3814 = vmatprep.mubr.bf16.mxu1 %v2122_v39  ;;  %v4205_v22 = vpop.eup %4204  ;;  %v2075_v49 = vmul.f32 %v4203_v21, %v5404_v30 }
 0x2b0   : > { %3815 = vmatmul.mubr.bf16.gmra.mxu1 %v2123_v14  ;;  %v1871_v62 = vpop.xlane.xlu1 %1870  ;;  %v4207_v41 = vpop.eup %4206  ;;  %v2072_v38 = vmul.f32 %v4205_v22, %v5405_v34 }
 0x2b1   : > { %v1865_v43 = vpop.xlane.xlu0 %1864  ;;  %4218 = vrcp.f32 %v1871_v62  ;;  %v2074_v57 = vmul.f32 %v4207_v41, %v5407_v46 }
 0x2b2   : > { %4220 = vrcp.f32 %v1865_v43 }
 0x2b3   : > { %4222 = vrcp.f32 %v1869_v4  ;;  %v2117_v33 = vpack.c.bf16 %v2075_v49, %v2074_v57 }
 0x2b5   : > { %v1897_v28 = vpop.xlane.xlu0 %1896 }
 0x2b6   : > { %v4209_v16 = vpop.eup %4208  ;;  %v1867_v11 = vpop.xlane.xlu1 %1866 }
 0x2b7   : > { %v4211_v31 = vpop.eup %4210  ;;  %4224 = vrcp.f32 %v1867_v11  ;;  %v2073_v60 = vmul.f32 %v4209_v16, %v5406_v37 }
 0x2b8   : > { %v4213_v47 = vpop.eup %4212  ;;  %4226 = vrcp.f32 %v1897_v28  ;;  %v2091_v5 = vmul.f32 %v4211_v31, %v5408_v25 }
 0x2b9   : > { %v4215_v0 = vpop.eup %4214  ;;  %v2116_v24 = vpack.c.bf16 %v2073_v60, %v2072_v38  ;;  %v1901_v18 = vpop.xlane.xlu0 %1900  ;;  %v2088_v26 = vmul.f32 %v4213_v47, %v5409_v3 }
 0x2ba   : > { %v4217_v10 = vpop.eup %4216  ;;  %v1899_v48 = vpop.xlane.xlu1 %1898  ;;  %v2090_v36 = vmul.f32 %v4215_v0, %v5411_v32 }
 0x2bb   : > { %4228 = vrcp.f32 %v1899_v48  ;;  %3786 = vmatprep.mubr.bf16.mxu0 %v2116_v24  ;;  %v2089_v8 = vmul.f32 %v4217_v10, %v5410_v35 }
 0x2bc   : > { %3787 = vmatmul.mubr.bf16.gmra.mxu0 %v2117_v33  ;;  %4230 = vrcp.f32 %v1901_v18  ;;  %v2125_v29 = vpack.c.bf16 %v2091_v5, %v2090_v36 }
 0x2bd   : > { %v2124_v54 = vpack.c.bf16 %v2089_v8, %v2088_v26 }
 0x2be   : > { %v1903_v58 = vpop.xlane.xlu1 %1902  ;;  %v4219_v63 = vpop.eup %4218 }
 0x2bf   : > { %4232 = vrcp.f32 %v1903_v58  ;;  %3818 = vmatprep.mubr.bf16.mxu1 %v2124_v54  ;;  %v4221_v61 = vpop.eup %4220  ;;  %v2079_v7 = vmul.f32 %v4219_v63, %v5412_v12 }
 0x2c0   : > { %3819 = vmatmul.mubr.bf16.gmra.mxu1 %v2125_v29  ;;  %v4223_v27 = vpop.eup %4222  ;;  %v2076_v9 = vmul.f32 %v4221_v61, %v5413_v50 }
 0x2c1   : > { %v2078_v45 = vmul.f32 %v4223_v27, %v5415_v44 }
 0x2c3   : > { %v2119_v51 = vpack.c.bf16 %v2079_v7, %v2078_v45 }
 0x2c4   : > { %v4225_v17 = vpop.eup %4224 }
 0x2c5   : > { %v2077_v1 = vmul.f32 %v4225_v17, %v5414_v40  ;;  %v4227_v15 = vpop.eup %4226 }
 0x2c6   : > { %v2092_v42 = vmul.f32 %v4227_v15, %v5416_v19 }
 0x2c7   : > { %v2118_v59 = vpack.c.bf16 %v2077_v1, %v2076_v9 }
 0x2c8   : > { %v4229_v13 = vpop.eup %4228 }
 0x2c9   : > { %3790 = vmatprep.mubr.bf16.mxu0 %v2118_v59  ;;  %v2093_v53 = vmul.f32 %v4229_v13, %v5417_v23  ;;  %v4231_v20 = vpop.eup %4230 }
 0x2ca   : > { %3791 = vmatmul.mubr.bf16.gmra.mxu0 %v2119_v51  ;;  %v2094_v55 = vmul.f32 %v4231_v20, %v5418_v52 }
 0x2cb   : > { %v2126_v56 = vpack.c.bf16 %v2093_v53, %v2092_v42 }
 0x2cc   : > { %v4233_v2 = vpop.eup %4232 }
 0x2cd   : > { %3822 = vmatprep.mubr.bf16.mxu1 %v2126_v56  ;;  %v2095_v4 = vmul.f32 %v4233_v2, %v5419_v6 }
 0x2cf   : > { %v2127_v39 = vpack.c.bf16 %v2095_v4, %v2094_v55 }
 0x2d1   : > { %3823 = vmatmul.mubr.bf16.gmra.mxu1 %v2127_v39 }
 0x31c   : > { %v3716_v14 = vpop.f32.mrf.mxu0 }
 0x31d   : > { %v3380_v62 = vpack.c.bf16 %v3716_v14, %v3716_v14 }
 0x31e   : > { %v2210_v43 = vpop.f32.mrf.mxu0 }
 0x31f   : > { %2967 = vst.msk [vmem:[%s5163_s28 + $0x8] sm:$0xf] %vm2964_vm2, %v3380_v62  ;;  %v3378_v21 = vpack.c.bf16 %v2210_v43, %v2210_v43 }
 0x320   : > { %v3717_v22 = vpop.f32.mrf.mxu0  ;;  %v3748_v41 = vpop.f32.mrf.mxu1 }
 0x321   : > { %2965 = vst.msk [vmem:[%s5163_s28] sm:$0xf] %vm2964_vm2, %v3378_v21  ;;  %v3381_v28 = vpack.c.bf16 %v3717_v22, %v3717_v22  ;;  %v3396_v16 = vpack.c.bf16 %v3748_v41, %v3748_v41 }
 0x322   : > { %v2213_v11 = vpop.f32.mrf.mxu0  ;;  %v2355_v30 = vpop.f32.mrf.mxu1 }
 0x323   : > { %2968 = vst.msk [vmem:[%s5163_s28 + $0xc] sm:$0xf] %vm2964_vm2, %v3381_v28  ;;  %2983 = vst.msk [vmem:[%s5163_s28 + $0x48] sm:$0xf] %vm2964_vm2, %v3396_v16  ;;  %v3379_v49 = vpack.c.bf16 %v2213_v11, %v2213_v11  ;;  %v3394_v31 = vpack.c.bf16 %v2355_v30, %v2355_v30 }
 0x324   : > { %v3749_v34 = vpop.f32.mrf.mxu1 }
 0x325   : > { %2966 = vst.msk [vmem:[%s5163_s28 + $0x4] sm:$0xf] %vm2964_vm2, %v3379_v49  ;;  %2981 = vst.msk [vmem:[%s5163_s28 + $0x40] sm:$0xf] %vm2964_vm2, %v3394_v31  ;;  %v3397_v38 = vpack.c.bf16 %v3749_v34, %v3749_v34 }
 0x326   : > { %v2358_v37 = vpop.f32.mrf.mxu1 }
 0x327   : > { %2984 = vst.msk [vmem:[%s5163_s28 + $0x4c] sm:$0xf] %vm2964_vm2, %v3397_v38  ;;  %v3395_v60 = vpack.c.bf16 %v2358_v37, %v2358_v37 }
 0x329   : > { %2982 = vst.msk [vmem:[%s5163_s28 + $0x44] sm:$0xf] %vm2964_vm2, %v3395_v60 }
 0x32c   : > { %v3720_v47 = vpop.f32.mrf.mxu0 }
 0x32d   : > { %v3384_v46 = vpack.c.bf16 %v3720_v47, %v3720_v47 }
 0x32e   : > { %v2226_v57 = vpop.f32.mrf.mxu0 }
 0x32f   : > { %2971 = vst.msk [vmem:[%s5163_s28 + $0x18] sm:$0xf] %vm2964_vm2, %v3384_v46  ;;  %v3382_v0 = vpack.c.bf16 %v2226_v57, %v2226_v57 }
 0x330   : > { %v3721_v24 = vpop.f32.mrf.mxu0  ;;  %v3752_v10 = vpop.f32.mrf.mxu1 }
 0x331   : > { %2969 = vst.msk [vmem:[%s5163_s28 + $0x10] sm:$0xf] %vm2964_vm2, %v3382_v0  ;;  %v3385_v18 = vpack.c.bf16 %v3721_v24, %v3721_v24  ;;  %v3400_v48 = vpack.c.bf16 %v3752_v10, %v3752_v10 }
 0x332   : > { %v2229_v33 = vpop.f32.mrf.mxu0  ;;  %v2371_v25 = vpop.f32.mrf.mxu1 }
 0x333   : > { %2972 = vst.msk [vmem:[%s5163_s28 + $0x1c] sm:$0xf] %vm2964_vm2, %v3385_v18  ;;  %2987 = vst.msk [vmem:[%s5163_s28 + $0x58] sm:$0xf] %vm2964_vm2, %v3400_v48  ;;  %v3383_v5 = vpack.c.bf16 %v2229_v33, %v2229_v33  ;;  %v3398_v3 = vpack.c.bf16 %v2371_v25, %v2371_v25 }
 0x334   : > { %v3753_v26 = vpop.f32.mrf.mxu1 }
 0x335   : > { %2970 = vst.msk [vmem:[%s5163_s28 + $0x14] sm:$0xf] %vm2964_vm2, %v3383_v5  ;;  %2985 = vst.msk [vmem:[%s5163_s28 + $0x50] sm:$0xf] %vm2964_vm2, %v3398_v3  ;;  %v3401_v35 = vpack.c.bf16 %v3753_v26, %v3753_v26 }
 0x336   : > { %v2374_v8 = vpop.f32.mrf.mxu1 }
 0x337   : > { %2988 = vst.msk [vmem:[%s5163_s28 + $0x5c] sm:$0xf] %vm2964_vm2, %v3401_v35  ;;  %v3399_v32 = vpack.c.bf16 %v2374_v8, %v2374_v8 }
 0x339   : > { %2986 = vst.msk [vmem:[%s5163_s28 + $0x54] sm:$0xf] %vm2964_vm2, %v3399_v32 }
 0x33c   : > { %v3724_v36 = vpop.f32.mrf.mxu0 }
 0x33d   : > { %v3388_v54 = vpack.c.bf16 %v3724_v36, %v3724_v36 }
 0x33e   : > { %v2242_v58 = vpop.f32.mrf.mxu0 }
 0x33f   : > { %2975 = vst.msk [vmem:[%s5163_s28 + $0x28] sm:$0xf] %vm2964_vm2, %v3388_v54  ;;  %v3386_v29 = vpack.c.bf16 %v2242_v58, %v2242_v58 }
 0x340   : > { %v3725_v63 = vpop.f32.mrf.mxu0  ;;  %v3756_v61 = vpop.f32.mrf.mxu1 }
 0x341   : > { %2973 = vst.msk [vmem:[%s5163_s28 + $0x20] sm:$0xf] %vm2964_vm2, %v3386_v29  ;;  %v3389_v27 = vpack.c.bf16 %v3725_v63, %v3725_v63  ;;  %v3404_v17 = vpack.c.bf16 %v3756_v61, %v3756_v61 }
 0x342   : > { %v2245_v12 = vpop.f32.mrf.mxu0  ;;  %v2387_v7 = vpop.f32.mrf.mxu1 }
 0x343   : > { %2976 = vst.msk [vmem:[%s5163_s28 + $0x2c] sm:$0xf] %vm2964_vm2, %v3389_v27  ;;  %2991 = vst.msk [vmem:[%s5163_s28 + $0x68] sm:$0xf] %vm2964_vm2, %v3404_v17  ;;  %v3387_v50 = vpack.c.bf16 %v2245_v12, %v2245_v12  ;;  %v3402_v9 = vpack.c.bf16 %v2387_v7, %v2387_v7 }
 0x344   : > { %v3757_v40 = vpop.f32.mrf.mxu1 }
 0x345   : > { %2974 = vst.msk [vmem:[%s5163_s28 + $0x24] sm:$0xf] %vm2964_vm2, %v3387_v50  ;;  %2989 = vst.msk [vmem:[%s5163_s28 + $0x60] sm:$0xf] %vm2964_vm2, %v3402_v9  ;;  %v3405_v1 = vpack.c.bf16 %v3757_v40, %v3757_v40 }
 0x346   : > { %v2390_v15 = vpop.f32.mrf.mxu1 }
 0x347   : > { %2992 = vst.msk [vmem:[%s5163_s28 + $0x6c] sm:$0xf] %vm2964_vm2, %v3405_v1  ;;  %v3403_v44 = vpack.c.bf16 %v2390_v15, %v2390_v15 }
 0x349   : > { %2990 = vst.msk [vmem:[%s5163_s28 + $0x64] sm:$0xf] %vm2964_vm2, %v3403_v44 }
 0x34c   : > { %v3728_v45 = vpop.f32.mrf.mxu0 }
 0x34d   : > { %v3392_v59 = vpack.c.bf16 %v3728_v45, %v3728_v45 }
 0x34e   : > { %v2258_v13 = vpop.f32.mrf.mxu0 }
 0x34f   : > { %2979 = vst.msk [vmem:[%s5163_s28 + $0x38] sm:$0xf] %vm2964_vm2, %v3392_v59  ;;  %v3390_v51 = vpack.c.bf16 %v2258_v13, %v2258_v13 }
 0x350   : > { %v3729_v19 = vpop.f32.mrf.mxu0  ;;  %v3760_v42 = vpop.f32.mrf.mxu1 }
 0x351   : > { %2977 = vst.msk [vmem:[%s5163_s28 + $0x30] sm:$0xf] %vm2964_vm2, %v3390_v51  ;;  %v3393_v23 = vpack.c.bf16 %v3729_v19, %v3729_v19  ;;  %v3408_v53 = vpack.c.bf16 %v3760_v42, %v3760_v42 }
 0x352   : > { %v2261_v20 = vpop.f32.mrf.mxu0  ;;  %v2403_v56 = vpop.f32.mrf.mxu1 }
 0x353   : > { %2980 = vst.msk [vmem:[%s5163_s28 + $0x3c] sm:$0xf] %vm2964_vm2, %v3393_v23  ;;  %2995 = vst.msk [vmem:[%s5163_s28 + $0x78] sm:$0xf] %vm2964_vm2, %v3408_v53  ;;  %v3391_v2 = vpack.c.bf16 %v2261_v20, %v2261_v20  ;;  %v3406_v52 = vpack.c.bf16 %v2403_v56, %v2403_v56 }
 0x354   : > { %v3761_v55 = vpop.f32.mrf.mxu1 }
 0x355   : > { %2978 = vst.msk [vmem:[%s5163_s28 + $0x34] sm:$0xf] %vm2964_vm2, %v3391_v2  ;;  %2993 = vst.msk [vmem:[%s5163_s28 + $0x70] sm:$0xf] %vm2964_vm2, %v3406_v52  ;;  %v3409_v6 = vpack.c.bf16 %v3761_v55, %v3761_v55 }
 0x356   : > { %v2406_v4 = vpop.f32.mrf.mxu1 }
 0x357   : > { %2996 = vst.msk [vmem:[%s5163_s28 + $0x7c] sm:$0xf] %vm2964_vm2, %v3409_v6  ;;  %v3407_v39 = vpack.c.bf16 %v2406_v4, %v2406_v4 }
 0x359   : > { %2994 = vst.msk [vmem:[%s5163_s28 + $0x74] sm:$0xf] %vm2964_vm2, %v3407_v39 }
 0x35c   : > { %v3780_v14 = vpop.f32.mrf.mxu0 }
 0x35d   : > { %v3412_v62 = vpack.c.bf16 %v3780_v14, %v3780_v14 }
 0x35e   : > { %v2500_v43 = vpop.f32.mrf.mxu0 }
 0x35f   : > { %2999 = vst.msk [vmem:[%s5163_s28 + $0x88] sm:$0xf] %vm2964_vm2, %v3412_v62  ;;  %v3410_v21 = vpack.c.bf16 %v2500_v43, %v2500_v43 }
 0x360   : > { %v3781_v22 = vpop.f32.mrf.mxu0  ;;  %v3812_v41 = vpop.f32.mrf.mxu1 }
 0x361   : > { %2997 = vst.msk [vmem:[%s5163_s28 + $0x80] sm:$0xf] %vm2964_vm2, %v3410_v21  ;;  %v3413_v28 = vpack.c.bf16 %v3781_v22, %v3781_v22  ;;  %v3428_v16 = vpack.c.bf16 %v3812_v41, %v3812_v41 }
 0x362   : > { %v2503_v11 = vpop.f32.mrf.mxu0  ;;  %v2645_v30 = vpop.f32.mrf.mxu1 }
 0x363   : > { %3000 = vst.msk [vmem:[%s5163_s28 + $0x8c] sm:$0xf] %vm2964_vm2, %v3413_v28  ;;  %3015 = vst.msk [vmem:[%s5163_s28 + $0xc8] sm:$0xf] %vm2964_vm2, %v3428_v16  ;;  %v3411_v49 = vpack.c.bf16 %v2503_v11, %v2503_v11  ;;  %v3426_v31 = vpack.c.bf16 %v2645_v30, %v2645_v30 }
 0x364   : > { %v3813_v34 = vpop.f32.mrf.mxu1 }
 0x365   : > { %2998 = vst.msk [vmem:[%s5163_s28 + $0x84] sm:$0xf] %vm2964_vm2, %v3411_v49  ;;  %3013 = vst.msk [vmem:[%s5163_s28 + $0xc0] sm:$0xf] %vm2964_vm2, %v3426_v31  ;;  %v3429_v38 = vpack.c.bf16 %v3813_v34, %v3813_v34 }
 0x366   : > { %v2648_v37 = vpop.f32.mrf.mxu1 }
 0x367   : > { %3016 = vst.msk [vmem:[%s5163_s28 + $0xcc] sm:$0xf] %vm2964_vm2, %v3429_v38  ;;  %v3427_v60 = vpack.c.bf16 %v2648_v37, %v2648_v37 }
 0x369   : > { %3014 = vst.msk [vmem:[%s5163_s28 + $0xc4] sm:$0xf] %vm2964_vm2, %v3427_v60 }
 0x36c   : > { %v3784_v47 = vpop.f32.mrf.mxu0 }
 0x36d   : > { %v3416_v46 = vpack.c.bf16 %v3784_v47, %v3784_v47 }
 0x36e   : > { %v2516_v57 = vpop.f32.mrf.mxu0 }
 0x36f   : > { %3003 = vst.msk [vmem:[%s5163_s28 + $0x98] sm:$0xf] %vm2964_vm2, %v3416_v46  ;;  %v3414_v0 = vpack.c.bf16 %v2516_v57, %v2516_v57 }
 0x370   : > { %v3785_v24 = vpop.f32.mrf.mxu0  ;;  %v3816_v10 = vpop.f32.mrf.mxu1 }
 0x371   : > { %3001 = vst.msk [vmem:[%s5163_s28 + $0x90] sm:$0xf] %vm2964_vm2, %v3414_v0  ;;  %v3417_v18 = vpack.c.bf16 %v3785_v24, %v3785_v24  ;;  %v3432_v48 = vpack.c.bf16 %v3816_v10, %v3816_v10 }
 0x372   : > { %v2519_v33 = vpop.f32.mrf.mxu0  ;;  %v2661_v25 = vpop.f32.mrf.mxu1 }
 0x373   : > { %3004 = vst.msk [vmem:[%s5163_s28 + $0x9c] sm:$0xf] %vm2964_vm2, %v3417_v18  ;;  %3019 = vst.msk [vmem:[%s5163_s28 + $0xd8] sm:$0xf] %vm2964_vm2, %v3432_v48  ;;  %v3415_v5 = vpack.c.bf16 %v2519_v33, %v2519_v33  ;;  %v3430_v3 = vpack.c.bf16 %v2661_v25, %v2661_v25 }
 0x374   : > { %v3817_v26 = vpop.f32.mrf.mxu1 }
 0x375   : > { %3002 = vst.msk [vmem:[%s5163_s28 + $0x94] sm:$0xf] %vm2964_vm2, %v3415_v5  ;;  %3017 = vst.msk [vmem:[%s5163_s28 + $0xd0] sm:$0xf] %vm2964_vm2, %v3430_v3  ;;  %v3433_v35 = vpack.c.bf16 %v3817_v26, %v3817_v26 }
 0x376   : > { %v2664_v8 = vpop.f32.mrf.mxu1 }
 0x377   : > { %3020 = vst.msk [vmem:[%s5163_s28 + $0xdc] sm:$0xf] %vm2964_vm2, %v3433_v35  ;;  %v3431_v32 = vpack.c.bf16 %v2664_v8, %v2664_v8 }
 0x379   : > { %3018 = vst.msk [vmem:[%s5163_s28 + $0xd4] sm:$0xf] %vm2964_vm2, %v3431_v32 }
 0x37c   : > { %v3788_v36 = vpop.f32.mrf.mxu0 }
 0x37d   : > { %v3420_v54 = vpack.c.bf16 %v3788_v36, %v3788_v36 }
 0x37e   : > { %v2532_v58 = vpop.f32.mrf.mxu0 }
 0x37f   : > { %3007 = vst.msk [vmem:[%s5163_s28 + $0xa8] sm:$0xf] %vm2964_vm2, %v3420_v54  ;;  %v3418_v29 = vpack.c.bf16 %v2532_v58, %v2532_v58 }
 0x380   : > { %v3789_v63 = vpop.f32.mrf.mxu0  ;;  %v3820_v61 = vpop.f32.mrf.mxu1 }
 0x381   : > { %3005 = vst.msk [vmem:[%s5163_s28 + $0xa0] sm:$0xf] %vm2964_vm2, %v3418_v29  ;;  %v3421_v27 = vpack.c.bf16 %v3789_v63, %v3789_v63  ;;  %v3436_v17 = vpack.c.bf16 %v3820_v61, %v3820_v61 }
 0x382   : > { %v2535_v12 = vpop.f32.mrf.mxu0  ;;  %v2677_v7 = vpop.f32.mrf.mxu1 }
 0x383   : > { %3008 = vst.msk [vmem:[%s5163_s28 + $0xac] sm:$0xf] %vm2964_vm2, %v3421_v27  ;;  %3023 = vst.msk [vmem:[%s5163_s28 + $0xe8] sm:$0xf] %vm2964_vm2, %v3436_v17  ;;  %v3419_v50 = vpack.c.bf16 %v2535_v12, %v2535_v12  ;;  %v3434_v9 = vpack.c.bf16 %v2677_v7, %v2677_v7 }
 0x384   : > { %v3821_v40 = vpop.f32.mrf.mxu1 }
 0x385   : > { %3006 = vst.msk [vmem:[%s5163_s28 + $0xa4] sm:$0xf] %vm2964_vm2, %v3419_v50  ;;  %3021 = vst.msk [vmem:[%s5163_s28 + $0xe0] sm:$0xf] %vm2964_vm2, %v3434_v9  ;;  %v3437_v1 = vpack.c.bf16 %v3821_v40, %v3821_v40 }
 0x386   : > { %v2680_v15 = vpop.f32.mrf.mxu1 }
 0x387   : > { %3024 = vst.msk [vmem:[%s5163_s28 + $0xec] sm:$0xf] %vm2964_vm2, %v3437_v1  ;;  %v3435_v44 = vpack.c.bf16 %v2680_v15, %v2680_v15 }
 0x389   : > { %3022 = vst.msk [vmem:[%s5163_s28 + $0xe4] sm:$0xf] %vm2964_vm2, %v3435_v44 }
 0x38a   : > { %v3792_v45 = vpop.f32.mrf.mxu0 }
 0x38b   : > { %v3424_v59 = vpack.c.bf16 %v3792_v45, %v3792_v45 }
 0x38c   : > { %v2548_v13 = vpop.f32.mrf.mxu0 }
 0x38d   : > { %3011 = vst.msk [vmem:[%s5163_s28 + $0xb8] sm:$0xf] %vm2964_vm2, %v3424_v59  ;;  %v3422_v51 = vpack.c.bf16 %v2548_v13, %v2548_v13 }
 0x38e   : > { %v3793_v19 = vpop.f32.mrf.mxu0 }
 0x38f   : > { %3009 = vst.msk [vmem:[%s5163_s28 + $0xb0] sm:$0xf] %vm2964_vm2, %v3422_v51  ;;  %v3425_v42 = vpack.c.bf16 %v3793_v19, %v3793_v19 }
 0x390   : > { %v2551_v23 = vpop.f32.mrf.mxu0 }
 0x391   : > { %3012 = vst.msk [vmem:[%s5163_s28 + $0xbc] sm:$0xf] %vm2964_vm2, %v3425_v42  ;;  %v3423_v53 = vpack.c.bf16 %v2551_v23, %v2551_v23  ;;  %v3824_v20 = vpop.f32.mrf.mxu1 }
 0x392   : > { %v3440_v56 = vpack.c.bf16 %v3824_v20, %v3824_v20 }
 0x393   : > { %3010 = vst.msk [vmem:[%s5163_s28 + $0xb4] sm:$0xf] %vm2964_vm2, %v3423_v53  ;;  %v2693_v2 = vpop.f32.mrf.mxu1 }
 0x394   : > { %3027 = vst.msk [vmem:[%s5163_s28 + $0xf8] sm:$0xf] %vm2964_vm2, %v3440_v56  ;;  %v3438_v52 = vpack.c.bf16 %v2693_v2, %v2693_v2 }
 0x395   : > { %v3825_v55 = vpop.f32.mrf.mxu1 }
 0x396   : > { %3025 = vst.msk [vmem:[%s5163_s28 + $0xf0] sm:$0xf] %vm2964_vm2, %v3438_v52  ;;  %v3441_v6 = vpack.c.bf16 %v3825_v55, %v3825_v55 }
 0x397   : > { %v2696_v4 = vpop.f32.mrf.mxu1 }
 0x398   : > { %3028 = vst.msk [vmem:[%s5163_s28 + $0xfc] sm:$0xf] %vm2964_vm2, %v3441_v6  ;;  %v3439_v39 = vpack.c.bf16 %v2696_v4, %v2696_v4 }
 0x39a   : > { %3026 = vst.msk [vmem:[%s5163_s28 + $0xf4] sm:$0xf] %vm2964_vm2, %v3439_v39 }
 0x39b PF: > { %s13_s14 = sadd.s32 1, %s4256_s14   ;;  %s5420_s12 = smov %s4252_s13 }
 0x39c   : > { %p10_p5 = scmp.ge.s32.totalorder %s13_s14, 4   ;;  %s5421_s13 = smov %s5423_s15 }
 0x39e   :  { %12 = sbr.rel (!%p10_p5) target bundleno = 2 (0x2), region = 68 }

// kernel: _lambda_.36
= control target key start
LH: loop header
LB: loop body
LE: loop exit
PB: predicated region body
PF: predicated region fallthrough
CT: control target
= control target key end

     0   :  { %vm35_vm0 = vcmask 130048   ;;  %v368_v39 = vmov 0.0   ;;  %vm369_vm1 = vmmov 0   ;;  %vm147_vm2 = vcmask 125952   ;;  %s466_s0 = inlined_call_operand.vmem [shape: bf16[40,16], index: 0, kind: input, shape index: {}]   ;;  %s467_s3 = inlined_call_operand.vmem [shape: bf16[16,128], index: 3, kind: input, shape index: {}]   ;;  %s468_s1 = inlined_call_operand.vmem [shape: f32[1,16], index: 1, kind: input, shape index: {}]   ;;  %s469_s2 = inlined_call_operand.vmem [shape: f32[1,16], index: 2, kind: input, shape index: {}]   ;;  %s470_s4 = inlined_call_operand.vmem [shape: f32[1,128], index: 4, kind: input, shape index: {}]   ;;  %s471_s5 = inlined_call_operand.vmem [shape: bf16[40,128], index: 5, kind: output, shape index: {}]  }
   0x1   :  { %v330_v0 = vld [vmem:[%s466_s0 + $0x8] sm:$0xff]   ;;  %v313_v1 = vld [vmem:[%s466_s0] sm:$0xff]   ;;  %v29_v5 = vld [vmem:[%s466_s0 + $0x10] sm:$0xf]  ;;  %350 = vmatprep.subr.bf16.mxu1 %v368_v39  ;;  %336 = vmatprep.subr.bf16.mxu0 %v368_v39 }
   0x2   :  { %v318_v2 = vunpack.c.l.bf16 %v330_v0  ;;  %v319_v3 = vunpack.c.h.bf16 %v330_v0  ;;  %v314_v4 = vunpack.c.l.bf16 %v313_v1  ;;  %v315_v6 = vunpack.c.h.bf16 %v313_v1  ;;  %v354_v38 = vld [vmem:[%s467_s3] sm:$0xff]   ;;  %342 = vmatprep.mubr.msk.bf16.mxu1 %vm369_vm1, %v368_v39  ;;  %338 = vmatprep.mubr.msk.bf16.mxu0 %vm369_vm1, %v368_v39 }
   0x3   :  { %v34_v10 = vunpack.c.l.bf16 %v29_v5  ;;  %351 = vmatpush3.bf16.msra.mxu1 %v354_v38  ;;  %337 = vmatpush3.bf16.msra.mxu0 %v354_v38  ;;  %v282_v56 = vld [vmem:[%s468_s1] ss:$0 sm:$0xff] }
   0x4   :  { %v42_v7 = vsel %vm35_vm0, %v318_v2, 0.0  ;;  %v36_v8 = vsel %vm35_vm0, %v314_v4, 0.0  ;;  %v45_v9 = vsel %vm35_vm0, %v319_v3, 0.0  ;;  %v39_v11 = vsel %vm35_vm0, %v315_v6, 0.0  ;;  %v283_v58 = vld [vmem:[%s469_s2] ss:$0 sm:$0xff] }
   0x5   :  { %43 = vadd.xlane.f32.xlu0 %v42_v7  ;;  %37 = vadd.xlane.f32.xlu1 %v36_v8  ;;  %v48_v12 = vsel %vm35_vm0, %v34_v10, 0.0 }
   0x9   :  { %46 = vadd.xlane.f32.xlu0 %v45_v9  ;;  %40 = vadd.xlane.f32.xlu1 %v39_v11 }
   0xd   :  { %49 = vadd.xlane.f32.xlu0 %v48_v12 }
  0x8e   :  { %v44_v13 = vpop.xlane.xlu0 %43  ;;  %v38_v14 = vpop.xlane.xlu1 %37 }
  0x8f   :  { %v54_v15 = vmul.f32 0.0625, %v44_v13  ;;  %v52_v16 = vmul.f32 0.0625, %v38_v14 }
  0x91   :  { %v59_v17 = vsub.f32 %v318_v2, %v54_v15  ;;  %v414_v18 = vsub.f32 %v314_v4, %v52_v16 }
  0x92   :  { %v47_v19 = vpop.xlane.xlu0 %46  ;;  %v41_v20 = vpop.xlane.xlu1 %40 }
  0x93   :  { %v55_v21 = vmul.f32 0.0625, %v47_v19  ;;  %v64_v22 = vmul.f32 %v59_v17, %v59_v17  ;;  %v53_v23 = vmul.f32 0.0625, %v41_v20  ;;  %v62_v24 = vmul.f32 %v414_v18, %v414_v18 }
  0x95   :  { %v60_v25 = vsub.f32 %v319_v3, %v55_v21  ;;  %v73_v26 = vsel %vm35_vm0, %v64_v22, 0.0  ;;  %v419_v27 = vsub.f32 %v315_v6, %v53_v23  ;;  %v67_v31 = vsel %vm35_vm0, %v62_v24, 0.0  ;;  %v289_v22 = vld [vmem:[%s470_s4] ss:$0 sm:$0xff] }
  0x96   :  { %v50_v28 = vpop.xlane.xlu0 %49  ;;  %74 = vadd.xlane.f32.xlu1 %v73_v26 }
  0x97   :  { %v56_v29 = vmul.f32 0.0625, %v50_v28  ;;  %v65_v30 = vmul.f32 %v60_v25, %v60_v25  ;;  %v63_v32 = vmul.f32 %v419_v27, %v419_v27 }
  0x99   :  { %v61_v33 = vsub.f32 %v34_v10, %v56_v29  ;;  %v76_v34 = vsel %vm35_vm0, %v65_v30, 0.0  ;;  %v70_v36 = vsel %vm35_vm0, %v63_v32, 0.0 }
  0x9a   :  { %77 = vadd.xlane.f32.xlu0 %v76_v34  ;;  %68 = vadd.xlane.f32.xlu1 %v67_v31 }
  0x9b   :  { %v66_v35 = vmul.f32 %v61_v33, %v61_v33 }
  0x9d   :  { %v79_v37 = vsel %vm35_vm0, %v66_v35, 0.0 }
  0x9e   :  { %80 = vadd.xlane.f32.xlu1 %v79_v37  ;;  %71 = vadd.xlane.f32.xlu0 %v70_v36 }
 0x11f   :  { %v75_v40 = vpop.xlane.xlu1 %74 }
 0x120   :  { %v84_v41 = vmul.f32 0.0625, %v75_v40 }
 0x122   :  { %v89_v42 = vadd.f32 1e-06, %v84_v41 }
 0x123   :  { %v78_v43 = vpop.xlane.xlu0 %77  ;;  %v69_v44 = vpop.xlane.xlu1 %68 }
 0x124   :  { %358 = vrsqrt.f32 %v89_v42  ;;  %v85_v45 = vmul.f32 0.0625, %v78_v43  ;;  %v82_v46 = vmul.f32 0.0625, %v69_v44 }
 0x126   :  { %v90_v47 = vadd.f32 1e-06, %v85_v45  ;;  %v87_v48 = vadd.f32 1e-06, %v82_v46 }
 0x127   :  { %v72_v49 = vpop.xlane.xlu0 %71  ;;  %v81_v50 = vpop.xlane.xlu1 %80 }
 0x128   :  { %360 = vrsqrt.f32 %v90_v47  ;;  %v83_v51 = vmul.f32 0.0625, %v72_v49  ;;  %v86_v52 = vmul.f32 0.0625, %v81_v50 }
 0x129   :  { %362 = vrsqrt.f32 %v87_v48 }
 0x12a   :  { %v88_v53 = vadd.f32 1e-06, %v83_v51  ;;  %v91_v54 = vadd.f32 1e-06, %v86_v52 }
 0x12c   :  { %364 = vrsqrt.f32 %v88_v53 }
 0x12d   :  { %366 = vrsqrt.f32 %v91_v54 }
 0x131   :  { %v359_v55 = vpop.eup %358 }
 0x132   :  { %v99_v57 = vmul.f32 %v359_v55, %v59_v17 }
 0x134   :  { %v111_v59 = vmul.f32 %v282_v56, %v99_v57 }
 0x135   :  { %v361_v60 = vpop.eup %360 }
 0x136   :  { %v363_v61 = vpop.eup %362  ;;  %v123_v62 = vadd.f32 %v283_v58, %v111_v59  ;;  %v100_v63 = vmul.f32 %v361_v60, %v60_v25 }
 0x137   :  { %v97_v0 = vmul.f32 %v363_v61, %v414_v18 }
 0x138   :  { %v304_v1 = vpack.c.bf16 %v123_v62, %v123_v62  ;;  %v112_v2 = vmul.f32 %v282_v56, %v100_v63 }
 0x139   :  { %v365_v3 = vpop.eup %364  ;;  %v109_v4 = vmul.f32 %v282_v56, %v97_v0 }
 0x13a   :  { %v367_v5 = vpop.eup %366  ;;  %150 = vst.msk [vmem:[#allocation2 + $0x8] sm:$0xf] %vm147_vm2, %v304_v1  ;;  %v124_v6 = vadd.f32 %v283_v58, %v112_v2  ;;  %v98_v7 = vmul.f32 %v365_v3, %v419_v27 }
 0x13b   :  { %v121_v8 = vadd.f32 %v283_v58, %v109_v4  ;;  %v101_v9 = vmul.f32 %v367_v5, %v61_v33 }
 0x13c   :  { %v305_v10 = vpack.c.bf16 %v124_v6, %v124_v6  ;;  %v110_v11 = vmul.f32 %v282_v56, %v98_v7 }
 0x13d   :  { %v302_v12 = vpack.c.bf16 %v121_v8, %v121_v8  ;;  %v113_v13 = vmul.f32 %v282_v56, %v101_v9 }
 0x13e   :  { %151 = vst.msk [vmem:[#allocation2 + $0xc] sm:$0xf] %vm147_vm2, %v305_v10  ;;  %v122_v14 = vadd.f32 %v283_v58, %v110_v11 }
 0x13f   :  { %148 = vst.msk [vmem:[#allocation2] sm:$0xf] %vm147_vm2, %v302_v12  ;;  %v125_v15 = vadd.f32 %v283_v58, %v113_v13 }
 0x140   :  { %v303_v16 = vpack.c.bf16 %v122_v14, %v122_v14 }
 0x141   :  { %v306_v17 = vpack.c.bf16 %v125_v15, %v125_v15 }
 0x142   :  { %149 = vst.msk [vmem:[#allocation2 + $0x4] sm:$0xf] %vm147_vm2, %v303_v16 }
 0x143   :  { %152 = vst.msk [vmem:[#allocation2 + $0x10] sm:$0xf] %vm147_vm2, %v306_v17 }
 0x145   :  { %v355_v18 = vld [vmem:[#allocation2 + $0x8] sm:$0xff]  }
 0x146   :  { %343 = vmatmul.mubr.msk.bf16.vlgmr.msra.gmra.mxu1 %vm35_vm0, %v355_v18 }
 0x147   :  { %346 = vmatprep.mubr.msk.bf16.mxu1 %vm369_vm1, %v368_v39 }
 0x149   :  { %v356_v19 = vld [vmem:[#allocation2] sm:$0xff]  }
 0x14a   :  { %339 = vmatmul.mubr.msk.bf16.vlgmr.msra.gmra.mxu0 %vm35_vm0, %v356_v19  ;;  %v357_v20 = vld [vmem:[#allocation2 + $0x10] ss:$0 sps:$4 sm:$0xff]  }
 0x14e   :  { %347 = vmatmul.mubr.msk.bf16.gmra.mxu1 %vm35_vm0, %v357_v20 }
 0x206   :  { %v238_v21 = vpop.f32.mrf.mxu1 }
 0x207   :  { %v239_v26 = vadd.f32 %v289_v22, %v238_v21 }
 0x208   :  { %v344_v23 = vpop.f32.mrf.mxu1 }
 0x20a   :  { %v230_v24 = vpop.f32.mrf.mxu0  ;;  %v241_v25 = vpop.f32.mrf.mxu1 }
 0x20b   :  { %v242_v27 = vadd.f32 %v289_v22, %v241_v25  ;;  %v231_v33 = vadd.f32 %v289_v22, %v230_v24 }
 0x20c   :  { %v340_v28 = vpop.f32.mrf.mxu0  ;;  %v345_v29 = vpop.f32.mrf.mxu1 }
 0x20d   :  { %v328_v30 = vpack.c.bf16 %v242_v27, %v239_v26 }
 0x20e   :  { %v233_v31 = vpop.f32.mrf.mxu0  ;;  %v246_v32 = vpop.f32.mrf.mxu1 }
 0x20f   :  { %331 = vst [vmem:[%s471_s5 + $0x8] sm:$0xff] %v328_v30   ;;  %v234_v34 = vadd.f32 %v289_v22, %v233_v31  ;;  %v247_v35 = vadd.f32 %v289_v22, %v246_v32 }
 0x210   :  { %v341_v36 = vpop.f32.mrf.mxu0  ;;  %v348_v37 = vpop.f32.mrf.mxu1 }
 0x211   :  { %v323_v38 = vpack.c.bf16 %v234_v34, %v231_v33  ;;  %v311_v39 = vpack.c.bf16 %v247_v35, %v247_v35 }
 0x212   :  { %v249_v40 = vpop.f32.mrf.mxu1 }
 0x213   :  { %324 = vst [vmem:[%s471_s5] sm:$0xff] %v323_v38   ;;  %277 = vst [vmem:[%s471_s5 + $0x10] sm:$0xf] %v311_v39 }
 0x214   :  { %v349_v41 = vpop.f32.mrf.mxu1 }

// kernel: _lambda_.38
= control target key start
LH: loop header
LB: loop body
LE: loop exit
PB: predicated region body
PF: predicated region fallthrough
CT: control target
= control target key end

     0   :  { %v321_v0 = vmov 0.0   ;;  %vm322_vm0 = vmmov 0   ;;  %s405_s1 = inlined_call_operand.vmem [shape: bf16[128,128], index: 1, kind: input, shape index: {}]   ;;  %s406_s0 = inlined_call_operand.vmem [shape: bf16[40,128], index: 0, kind: input, shape index: {}]   ;;  %s407_s2 = inlined_call_operand.vmem [shape: f32[1,128], index: 2, kind: input, shape index: {}]   ;;  %s408_s3 = inlined_call_operand.vmem [shape: bf16[40,128], index: 3, kind: input, shape index: {}]   ;;  %s409_s4 = inlined_call_operand.vmem [shape: bf16[40,128], index: 4, kind: output, shape index: {}]  }
   0x1   :  { %264 = vmatprep.subr.bf16.mxu0 %v321_v0  ;;  %292 = vmatprep.subr.bf16.mxu1 %v321_v0  ;;  %v310_v1 = vld [vmem:[%s405_s1 + $0x38] sm:$0xff]   ;;  %v311_v2 = vld [vmem:[%s405_s1 + $0x30] sm:$0xff]   ;;  %v312_v3 = vld [vmem:[%s405_s1 + $0x28] sm:$0xff]  }
   0x2   :  { %280 = vmatprep.mubr.msk.bf16.mxu0 %vm322_vm0, %v321_v0  ;;  %284 = vmatprep.mubr.msk.bf16.mxu1 %vm322_vm0, %v321_v0  ;;  %v313_v4 = vld [vmem:[%s405_s1 + $0x20] sm:$0xff]   ;;  %v314_v5 = vld [vmem:[%s405_s1 + $0x18] sm:$0xff]   ;;  %v315_v6 = vld [vmem:[%s405_s1 + $0x10] sm:$0xff]  }
   0x3   :  { %265 = vmatpush3.bf16.msra.mxu0 %v310_v1  ;;  %300 = vmatpush3.bf16.msra.mxu1 %v310_v1  ;;  %v316_v7 = vld [vmem:[%s405_s1 + $0x8] sm:$0xff]   ;;  %v317_v8 = vld [vmem:[%s405_s1] sm:$0xff]   ;;  %v320_v11 = vld [vmem:[%s406_s0 + $0x10] ss:$0 sps:$4 sm:$0xff]  }
   0x4   :  { %266 = vmatprep.subr.bf16.mxu0 %v321_v0  ;;  %293 = vmatprep.subr.bf16.mxu1 %v321_v0  ;;  %v318_v9 = vld [vmem:[%s406_s0] sm:$0xff]   ;;  %v319_v10 = vld [vmem:[%s406_s0 + $0x8] sm:$0xff]   ;;  %v170_v27 = vld [vmem:[%s408_s3 + $0x10] sm:$0xf] }
   0x5   :  { %v234_v12 = vld [vmem:[%s408_s3] sm:$0xff]   ;;  %v251_v16 = vld [vmem:[%s408_s3 + $0x8] sm:$0xff]   ;;  %v175_v36 = vunpack.c.l.bf16 %v170_v27 }
   0x6   :  { %v211_v13 = vld [vmem:[%s407_s2] ss:$0 sm:$0xff]  ;;  %v235_v18 = vunpack.c.l.bf16 %v234_v12  ;;  %v239_v22 = vunpack.c.l.bf16 %v251_v16  ;;  %v236_v23 = vunpack.c.h.bf16 %v234_v12  ;;  %v240_v24 = vunpack.c.h.bf16 %v251_v16 }
   0x7   :  { %267 = vmatpush3.bf16.msra.mxu0 %v311_v2  ;;  %301 = vmatpush3.bf16.msra.mxu1 %v311_v2 }
   0x8   :  { %268 = vmatprep.subr.bf16.mxu0 %v321_v0  ;;  %294 = vmatprep.subr.bf16.mxu1 %v321_v0 }
   0xb   :  { %269 = vmatpush3.bf16.msra.mxu0 %v312_v3  ;;  %302 = vmatpush3.bf16.msra.mxu1 %v312_v3 }
   0xc   :  { %270 = vmatprep.subr.bf16.mxu0 %v321_v0  ;;  %295 = vmatprep.subr.bf16.mxu1 %v321_v0 }
   0xf   :  { %271 = vmatpush3.bf16.msra.mxu0 %v313_v4  ;;  %303 = vmatpush3.bf16.msra.mxu1 %v313_v4 }
  0x10   :  { %272 = vmatprep.subr.bf16.mxu0 %v321_v0  ;;  %296 = vmatprep.subr.bf16.mxu1 %v321_v0 }
  0x13   :  { %273 = vmatpush3.bf16.msra.mxu0 %v314_v5  ;;  %304 = vmatpush3.bf16.msra.mxu1 %v314_v5 }
  0x14   :  { %274 = vmatprep.subr.bf16.mxu0 %v321_v0  ;;  %297 = vmatprep.subr.bf16.mxu1 %v321_v0 }
  0x17   :  { %275 = vmatpush3.bf16.msra.mxu0 %v315_v6  ;;  %305 = vmatpush3.bf16.msra.mxu1 %v315_v6 }
  0x18   :  { %276 = vmatprep.subr.bf16.mxu0 %v321_v0  ;;  %298 = vmatprep.subr.bf16.mxu1 %v321_v0 }
  0x1b   :  { %277 = vmatpush3.bf16.msra.mxu0 %v316_v7  ;;  %306 = vmatpush3.bf16.msra.mxu1 %v316_v7 }
  0x1c   :  { %278 = vmatprep.subr.bf16.mxu0 %v321_v0  ;;  %299 = vmatprep.subr.bf16.mxu1 %v321_v0 }
  0x1f   :  { %279 = vmatpush3.bf16.msra.mxu0 %v317_v8  ;;  %307 = vmatpush3.bf16.msra.mxu1 %v317_v8 }
  0x22   :  { %281 = vmatmul.mubr.bf16.vlgmr.msra.gmra.mxu0 %v318_v9  ;;  %285 = vmatmul.mubr.bf16.vlgmr.msra.gmra.mxu1 %v319_v10 }
  0x23   :  { %288 = vmatprep.mubr.msk.bf16.mxu1 %vm322_vm0, %v321_v0 }
  0x2a   :  { %289 = vmatmul.mubr.bf16.gmra.mxu1 %v320_v11 }
  0xe2   :  { %v144_v14 = vpop.f32.mrf.mxu0  ;;  %v152_v15 = vpop.f32.mrf.mxu1 }
  0xe3   :  { %v145_v17 = vadd.f32 %v211_v13, %v144_v14  ;;  %v153_v21 = vadd.f32 %v211_v13, %v152_v15 }
  0xe4   :  { %v282_v19 = vpop.f32.mrf.mxu0  ;;  %v286_v20 = vpop.f32.mrf.mxu1 }
  0xe5   :  { %v176_v28 = vadd.f32 %v235_v18, %v145_v17  ;;  %v178_v33 = vadd.f32 %v239_v22, %v153_v21 }
  0xe6   :  { %v147_v25 = vpop.f32.mrf.mxu0  ;;  %v155_v26 = vpop.f32.mrf.mxu1 }
  0xe7   :  { %v148_v29 = vadd.f32 %v211_v13, %v147_v25  ;;  %v156_v30 = vadd.f32 %v211_v13, %v155_v26 }
  0xe8   :  { %v283_v31 = vpop.f32.mrf.mxu0  ;;  %v287_v32 = vpop.f32.mrf.mxu1 }
  0xe9   :  { %v177_v34 = vadd.f32 %v236_v23, %v148_v29  ;;  %v179_v35 = vadd.f32 %v240_v24, %v156_v30 }
  0xea   :  { %v160_v37 = vpop.f32.mrf.mxu1 }
  0xeb   :  { %v244_v38 = vpack.c.bf16 %v177_v34, %v176_v28  ;;  %v249_v39 = vpack.c.bf16 %v179_v35, %v178_v33  ;;  %v161_v40 = vadd.f32 %v211_v13, %v160_v37 }
  0xec   :  { %v290_v41 = vpop.f32.mrf.mxu1 }
  0xed   :  { %245 = vst [vmem:[%s409_s4] sm:$0xff] %v244_v38   ;;  %252 = vst [vmem:[%s409_s4 + $0x8] sm:$0xff] %v249_v39   ;;  %v180_v42 = vadd.f32 %v175_v36, %v161_v40 }
  0xee   :  { %v163_v43 = vpop.f32.mrf.mxu1 }
  0xef   :  { %v232_v44 = vpack.c.bf16 %v180_v42, %v180_v42 }
  0xf0   :  { %v291_v45 = vpop.f32.mrf.mxu1 }
  0xf1   :  { %206 = vst [vmem:[%s409_s4 + $0x10] sm:$0xf] %v232_v44 }

// kernel: _lambda_.46
= control target key start
LH: loop header
LB: loop body
LE: loop exit
PB: predicated region body
PF: predicated region fallthrough
CT: control target
= control target key end

     0   :  { %vm35_vm0 = vcmask 130048   ;;  %v326_v39 = vmov 0.0   ;;  %vm327_vm1 = vmmov 0   ;;  %vm147_vm2 = vcmask 125952   ;;  %s430_s0 = inlined_call_operand.vmem [shape: bf16[40,16], index: 0, kind: input, shape index: {}]   ;;  %s431_s3 = inlined_call_operand.vmem [shape: bf16[16,128], index: 3, kind: input, shape index: {}]   ;;  %s432_s1 = inlined_call_operand.vmem [shape: f32[1,16], index: 1, kind: input, shape index: {}]   ;;  %s433_s2 = inlined_call_operand.vmem [shape: f32[1,16], index: 2, kind: input, shape index: {}]   ;;  %s434_s4 = inlined_call_operand.vmem [shape: f32[1,128], index: 4, kind: input, shape index: {}]   ;;  %s435_s5 = inlined_call_operand.vmem [shape: f32[40,128], index: 5, kind: output, shape index: {}]  }
   0x1   :  { %v289_v0 = vld [vmem:[%s430_s0 + $0x8] sm:$0xff]   ;;  %v282_v1 = vld [vmem:[%s430_s0] sm:$0xff]   ;;  %v29_v5 = vld [vmem:[%s430_s0 + $0x10] sm:$0xf]  ;;  %308 = vmatprep.subr.bf16.mxu1 %v326_v39  ;;  %294 = vmatprep.subr.bf16.mxu0 %v326_v39 }
   0x2   :  { %v287_v2 = vunpack.c.l.bf16 %v289_v0  ;;  %v288_v3 = vunpack.c.h.bf16 %v289_v0  ;;  %v283_v4 = vunpack.c.l.bf16 %v282_v1  ;;  %v284_v6 = vunpack.c.h.bf16 %v282_v1  ;;  %v312_v38 = vld [vmem:[%s431_s3] sm:$0xff]   ;;  %300 = vmatprep.mubr.msk.bf16.mxu1 %vm327_vm1, %v326_v39  ;;  %296 = vmatprep.mubr.msk.bf16.mxu0 %vm327_vm1, %v326_v39 }
   0x3   :  { %v34_v10 = vunpack.c.l.bf16 %v29_v5  ;;  %309 = vmatpush3.bf16.msra.mxu1 %v312_v38  ;;  %295 = vmatpush3.bf16.msra.mxu0 %v312_v38  ;;  %v261_v56 = vld [vmem:[%s432_s1] ss:$0 sm:$0xff] }
   0x4   :  { %v42_v7 = vsel %vm35_vm0, %v287_v2, 0.0  ;;  %v36_v8 = vsel %vm35_vm0, %v283_v4, 0.0  ;;  %v45_v9 = vsel %vm35_vm0, %v288_v3, 0.0  ;;  %v39_v11 = vsel %vm35_vm0, %v284_v6, 0.0  ;;  %v262_v58 = vld [vmem:[%s433_s2] ss:$0 sm:$0xff] }
   0x5   :  { %43 = vadd.xlane.f32.xlu0 %v42_v7  ;;  %37 = vadd.xlane.f32.xlu1 %v36_v8  ;;  %v48_v12 = vsel %vm35_vm0, %v34_v10, 0.0 }
   0x9   :  { %46 = vadd.xlane.f32.xlu0 %v45_v9  ;;  %40 = vadd.xlane.f32.xlu1 %v39_v11 }
   0xd   :  { %49 = vadd.xlane.f32.xlu0 %v48_v12 }
  0x8e   :  { %v44_v13 = vpop.xlane.xlu0 %43  ;;  %v38_v14 = vpop.xlane.xlu1 %37 }
  0x8f   :  { %v54_v15 = vmul.f32 0.0625, %v44_v13  ;;  %v52_v16 = vmul.f32 0.0625, %v38_v14 }
  0x91   :  { %v59_v17 = vsub.f32 %v287_v2, %v54_v15  ;;  %v372_v18 = vsub.f32 %v283_v4, %v52_v16 }
  0x92   :  { %v47_v19 = vpop.xlane.xlu0 %46  ;;  %v41_v20 = vpop.xlane.xlu1 %40 }
  0x93   :  { %v55_v21 = vmul.f32 0.0625, %v47_v19  ;;  %v64_v22 = vmul.f32 %v59_v17, %v59_v17  ;;  %v53_v23 = vmul.f32 0.0625, %v41_v20  ;;  %v62_v24 = vmul.f32 %v372_v18, %v372_v18 }
  0x95   :  { %v60_v25 = vsub.f32 %v288_v3, %v55_v21  ;;  %v73_v26 = vsel %vm35_vm0, %v64_v22, 0.0  ;;  %v377_v27 = vsub.f32 %v284_v6, %v53_v23  ;;  %v67_v31 = vsel %vm35_vm0, %v62_v24, 0.0  ;;  %v268_v21 = vld [vmem:[%s434_s4] ss:$0 sm:$0xff] }
  0x96   :  { %v50_v28 = vpop.xlane.xlu0 %49  ;;  %74 = vadd.xlane.f32.xlu1 %v73_v26 }
  0x97   :  { %v56_v29 = vmul.f32 0.0625, %v50_v28  ;;  %v65_v30 = vmul.f32 %v60_v25, %v60_v25  ;;  %v63_v32 = vmul.f32 %v377_v27, %v377_v27 }
  0x99   :  { %v61_v33 = vsub.f32 %v34_v10, %v56_v29  ;;  %v76_v34 = vsel %vm35_vm0, %v65_v30, 0.0  ;;  %v70_v36 = vsel %vm35_vm0, %v63_v32, 0.0 }
  0x9a   :  { %77 = vadd.xlane.f32.xlu0 %v76_v34  ;;  %68 = vadd.xlane.f32.xlu1 %v67_v31 }
  0x9b   :  { %v66_v35 = vmul.f32 %v61_v33, %v61_v33 }
  0x9d   :  { %v79_v37 = vsel %vm35_vm0, %v66_v35, 0.0 }
  0x9e   :  { %80 = vadd.xlane.f32.xlu1 %v79_v37  ;;  %71 = vadd.xlane.f32.xlu0 %v70_v36 }
 0x11f   :  { %v75_v40 = vpop.xlane.xlu1 %74 }
 0x120   :  { %v84_v41 = vmul.f32 0.0625, %v75_v40 }
 0x122   :  { %v89_v42 = vadd.f32 1e-06, %v84_v41 }
 0x123   :  { %v78_v43 = vpop.xlane.xlu0 %77  ;;  %v69_v44 = vpop.xlane.xlu1 %68 }
 0x124   :  { %316 = vrsqrt.f32 %v89_v42  ;;  %v85_v45 = vmul.f32 0.0625, %v78_v43  ;;  %v82_v46 = vmul.f32 0.0625, %v69_v44 }
 0x126   :  { %v90_v47 = vadd.f32 1e-06, %v85_v45  ;;  %v87_v48 = vadd.f32 1e-06, %v82_v46 }
 0x127   :  { %v72_v49 = vpop.xlane.xlu0 %71  ;;  %v81_v50 = vpop.xlane.xlu1 %80 }
 0x128   :  { %318 = vrsqrt.f32 %v90_v47  ;;  %v83_v51 = vmul.f32 0.0625, %v72_v49  ;;  %v86_v52 = vmul.f32 0.0625, %v81_v50 }
 0x129   :  { %320 = vrsqrt.f32 %v87_v48 }
 0x12a   :  { %v88_v53 = vadd.f32 1e-06, %v83_v51  ;;  %v91_v54 = vadd.f32 1e-06, %v86_v52 }
 0x12c   :  { %322 = vrsqrt.f32 %v88_v53 }
 0x12d   :  { %324 = vrsqrt.f32 %v91_v54 }
 0x131   :  { %v317_v55 = vpop.eup %316 }
 0x132   :  { %v99_v57 = vmul.f32 %v317_v55, %v59_v17 }
 0x134   :  { %v111_v59 = vmul.f32 %v261_v56, %v99_v57 }
 0x135   :  { %v319_v60 = vpop.eup %318 }
 0x136   :  { %v321_v61 = vpop.eup %320  ;;  %v123_v62 = vadd.f32 %v262_v58, %v111_v59  ;;  %v100_v63 = vmul.f32 %v319_v60, %v60_v25 }
 0x137   :  { %v97_v0 = vmul.f32 %v321_v61, %v372_v18 }
 0x138   :  { %v278_v1 = vpack.c.bf16 %v123_v62, %v123_v62  ;;  %v112_v2 = vmul.f32 %v261_v56, %v100_v63 }
 0x139   :  { %v323_v3 = vpop.eup %322  ;;  %v109_v4 = vmul.f32 %v261_v56, %v97_v0 }
 0x13a   :  { %v325_v5 = vpop.eup %324  ;;  %150 = vst.msk [vmem:[#allocation2 + $0x8] sm:$0xf] %vm147_vm2, %v278_v1  ;;  %v124_v6 = vadd.f32 %v262_v58, %v112_v2  ;;  %v98_v7 = vmul.f32 %v323_v3, %v377_v27 }
 0x13b   :  { %v121_v8 = vadd.f32 %v262_v58, %v109_v4  ;;  %v101_v9 = vmul.f32 %v325_v5, %v61_v33 }
 0x13c   :  { %v279_v10 = vpack.c.bf16 %v124_v6, %v124_v6  ;;  %v110_v11 = vmul.f32 %v261_v56, %v98_v7 }
 0x13d   :  { %v276_v12 = vpack.c.bf16 %v121_v8, %v121_v8  ;;  %v113_v13 = vmul.f32 %v261_v56, %v101_v9 }
 0x13e   :  { %151 = vst.msk [vmem:[#allocation2 + $0xc] sm:$0xf] %vm147_vm2, %v279_v10  ;;  %v122_v14 = vadd.f32 %v262_v58, %v110_v11 }
 0x13f   :  { %148 = vst.msk [vmem:[#allocation2] sm:$0xf] %vm147_vm2, %v276_v12  ;;  %v125_v15 = vadd.f32 %v262_v58, %v113_v13 }
 0x140   :  { %v277_v16 = vpack.c.bf16 %v122_v14, %v122_v14 }
 0x141   :  { %v280_v17 = vpack.c.bf16 %v125_v15, %v125_v15 }
 0x142   :  { %149 = vst.msk [vmem:[#allocation2 + $0x4] sm:$0xf] %vm147_vm2, %v277_v16 }
 0x143   :  { %152 = vst.msk [vmem:[#allocation2 + $0x10] sm:$0xf] %vm147_vm2, %v280_v17 }
 0x145   :  { %v313_v18 = vld [vmem:[#allocation2 + $0x8] sm:$0xff]  }
 0x146   :  { %301 = vmatmul.mubr.msk.bf16.vlgmr.msra.gmra.mxu1 %vm35_vm0, %v313_v18 }
 0x147   :  { %304 = vmatprep.mubr.msk.bf16.mxu1 %vm327_vm1, %v326_v39 }
 0x149   :  { %v314_v19 = vld [vmem:[#allocation2] sm:$0xff]  }
 0x14a   :  { %297 = vmatmul.mubr.msk.bf16.vlgmr.msra.gmra.mxu0 %vm35_vm0, %v314_v19  ;;  %v315_v20 = vld [vmem:[#allocation2 + $0x10] ss:$0 sps:$4 sm:$0xff]  }
 0x14e   :  { %305 = vmatmul.mubr.msk.bf16.gmra.mxu1 %vm35_vm0, %v315_v20 }
 0x206   :  { %v238_v22 = vpop.f32.mrf.mxu1 }
 0x207   :  { %v239_v23 = vadd.f32 %v268_v21, %v238_v22 }
 0x208   :  { %v302_v24 = vpop.f32.mrf.mxu1 }
 0x209   :  { %254 = vst [vmem:[%s435_s5 + $0x10] sm:$0xff] %v239_v23 }
 0x20a   :  { %v230_v25 = vpop.f32.mrf.mxu0  ;;  %v241_v26 = vpop.f32.mrf.mxu1 }
 0x20b   :  { %v231_v27 = vadd.f32 %v268_v21, %v230_v25  ;;  %v242_v28 = vadd.f32 %v268_v21, %v241_v26 }
 0x20c   :  { %v298_v29 = vpop.f32.mrf.mxu0  ;;  %v303_v30 = vpop.f32.mrf.mxu1 }
 0x20d   :  { %252 = vst [vmem:[%s435_s5] sm:$0xff] %v231_v27  ;;  %255 = vst [vmem:[%s435_s5 + $0x18] sm:$0xff] %v242_v28 }
 0x20e   :  { %v233_v31 = vpop.f32.mrf.mxu0  ;;  %v246_v32 = vpop.f32.mrf.mxu1 }
 0x20f   :  { %v234_v33 = vadd.f32 %v268_v21, %v233_v31  ;;  %v247_v34 = vadd.f32 %v268_v21, %v246_v32 }
 0x210   :  { %v299_v35 = vpop.f32.mrf.mxu0  ;;  %v306_v36 = vpop.f32.mrf.mxu1 }
 0x211   :  { %253 = vst [vmem:[%s435_s5 + $0x8] sm:$0xff] %v234_v33  ;;  %256 = vst [vmem:[%s435_s5 + $0x20] sm:$0xff] %v247_v34 }
 0x212   :  { %v249_v37 = vpop.f32.mrf.mxu1 }
 0x214   :  { %v307_v38 = vpop.f32.mrf.mxu1 }

// kernel: _lambda_.39
= control target key start
LH: loop header
LB: loop body
LE: loop exit
PB: predicated region body
PF: predicated region fallthrough
CT: control target
= control target key end

     0   :  { %vm35_vm0 = vcmask 130048   ;;  %v423_v39 = vmov 0.0   ;;  %vm424_vm1 = vmmov 0   ;;  %vm147_vm2 = vcmask 125952   ;;  %s521_s0 = inlined_call_operand.vmem [shape: bf16[40,16], index: 0, kind: input, shape index: {}]   ;;  %s522_s3 = inlined_call_operand.vmem [shape: bf16[16,128], index: 3, kind: input, shape index: {}]   ;;  %s523_s1 = inlined_call_operand.vmem [shape: f32[1,16], index: 1, kind: input, shape index: {}]   ;;  %s524_s2 = inlined_call_operand.vmem [shape: f32[1,16], index: 2, kind: input, shape index: {}]   ;;  %s525_s4 = inlined_call_operand.vmem [shape: f32[1,128], index: 4, kind: input, shape index: {}]   ;;  %s526_s5 = inlined_call_operand.vmem [shape: bf16[40,128], index: 5, kind: output, shape index: {}]  }
   0x1   :  { %v375_v0 = vld [vmem:[%s521_s0 + $0x8] sm:$0xff]   ;;  %v358_v1 = vld [vmem:[%s521_s0] sm:$0xff]   ;;  %v29_v5 = vld [vmem:[%s521_s0 + $0x10] sm:$0xf]  ;;  %395 = vmatprep.subr.bf16.mxu1 %v423_v39  ;;  %381 = vmatprep.subr.bf16.mxu0 %v423_v39 }
   0x2   :  { %v363_v2 = vunpack.c.l.bf16 %v375_v0  ;;  %v364_v3 = vunpack.c.h.bf16 %v375_v0  ;;  %v359_v4 = vunpack.c.l.bf16 %v358_v1  ;;  %v360_v6 = vunpack.c.h.bf16 %v358_v1  ;;  %v399_v38 = vld [vmem:[%s522_s3] sm:$0xff]   ;;  %387 = vmatprep.mubr.msk.bf16.mxu1 %vm424_vm1, %v423_v39  ;;  %383 = vmatprep.mubr.msk.bf16.mxu0 %vm424_vm1, %v423_v39 }
   0x3   :  { %v34_v10 = vunpack.c.l.bf16 %v29_v5  ;;  %396 = vmatpush3.bf16.msra.mxu1 %v399_v38  ;;  %382 = vmatpush3.bf16.msra.mxu0 %v399_v38  ;;  %v327_v56 = vld [vmem:[%s523_s1] ss:$0 sm:$0xff] }
   0x4   :  { %v42_v7 = vsel %vm35_vm0, %v363_v2, 0.0  ;;  %v36_v8 = vsel %vm35_vm0, %v359_v4, 0.0  ;;  %v45_v9 = vsel %vm35_vm0, %v364_v3, 0.0  ;;  %v39_v11 = vsel %vm35_vm0, %v360_v6, 0.0  ;;  %v328_v58 = vld [vmem:[%s524_s2] ss:$0 sm:$0xff] }
   0x5   :  { %43 = vadd.xlane.f32.xlu0 %v42_v7  ;;  %37 = vadd.xlane.f32.xlu1 %v36_v8  ;;  %v48_v12 = vsel %vm35_vm0, %v34_v10, 0.0 }
   0x9   :  { %46 = vadd.xlane.f32.xlu0 %v45_v9  ;;  %40 = vadd.xlane.f32.xlu1 %v39_v11 }
   0xd   :  { %49 = vadd.xlane.f32.xlu0 %v48_v12 }
  0x8e   :  { %v44_v13 = vpop.xlane.xlu0 %43  ;;  %v38_v14 = vpop.xlane.xlu1 %37 }
  0x8f   :  { %v54_v15 = vmul.f32 0.0625, %v44_v13  ;;  %v52_v16 = vmul.f32 0.0625, %v38_v14 }
  0x91   :  { %v59_v17 = vsub.f32 %v363_v2, %v54_v15  ;;  %v469_v18 = vsub.f32 %v359_v4, %v52_v16 }
  0x92   :  { %v47_v19 = vpop.xlane.xlu0 %46  ;;  %v41_v20 = vpop.xlane.xlu1 %40 }
  0x93   :  { %v55_v21 = vmul.f32 0.0625, %v47_v19  ;;  %v64_v22 = vmul.f32 %v59_v17, %v59_v17  ;;  %v53_v23 = vmul.f32 0.0625, %v41_v20  ;;  %v62_v24 = vmul.f32 %v469_v18, %v469_v18 }
  0x95   :  { %v60_v25 = vsub.f32 %v364_v3, %v55_v21  ;;  %v73_v26 = vsel %vm35_vm0, %v64_v22, 0.0  ;;  %v474_v27 = vsub.f32 %v360_v6, %v53_v23  ;;  %v67_v31 = vsel %vm35_vm0, %v62_v24, 0.0  ;;  %v334_v21 = vld [vmem:[%s525_s4] ss:$0 sm:$0xff] }
  0x96   :  { %v50_v28 = vpop.xlane.xlu0 %49  ;;  %74 = vadd.xlane.f32.xlu1 %v73_v26 }
  0x97   :  { %v56_v29 = vmul.f32 0.0625, %v50_v28  ;;  %v65_v30 = vmul.f32 %v60_v25, %v60_v25  ;;  %v63_v32 = vmul.f32 %v474_v27, %v474_v27 }
  0x99   :  { %v61_v33 = vsub.f32 %v34_v10, %v56_v29  ;;  %v76_v34 = vsel %vm35_vm0, %v65_v30, 0.0  ;;  %v70_v36 = vsel %vm35_vm0, %v63_v32, 0.0 }
  0x9a   :  { %77 = vadd.xlane.f32.xlu0 %v76_v34  ;;  %68 = vadd.xlane.f32.xlu1 %v67_v31 }
  0x9b   :  { %v66_v35 = vmul.f32 %v61_v33, %v61_v33 }
  0x9d   :  { %v79_v37 = vsel %vm35_vm0, %v66_v35, 0.0 }
  0x9e   :  { %80 = vadd.xlane.f32.xlu1 %v79_v37  ;;  %71 = vadd.xlane.f32.xlu0 %v70_v36 }
 0x11f   :  { %v75_v40 = vpop.xlane.xlu1 %74 }
 0x120   :  { %v84_v41 = vmul.f32 0.0625, %v75_v40 }
 0x122   :  { %v89_v42 = vadd.f32 1e-06, %v84_v41 }
 0x123   :  { %v78_v43 = vpop.xlane.xlu0 %77  ;;  %v69_v44 = vpop.xlane.xlu1 %68 }
 0x124   :  { %403 = vrsqrt.f32 %v89_v42  ;;  %v85_v45 = vmul.f32 0.0625, %v78_v43  ;;  %v82_v46 = vmul.f32 0.0625, %v69_v44 }
 0x126   :  { %v90_v47 = vadd.f32 1e-06, %v85_v45  ;;  %v87_v48 = vadd.f32 1e-06, %v82_v46 }
 0x127   :  { %v72_v49 = vpop.xlane.xlu0 %71  ;;  %v81_v50 = vpop.xlane.xlu1 %80 }
 0x128   :  { %405 = vrsqrt.f32 %v90_v47  ;;  %v83_v51 = vmul.f32 0.0625, %v72_v49  ;;  %v86_v52 = vmul.f32 0.0625, %v81_v50 }
 0x129   :  { %407 = vrsqrt.f32 %v87_v48 }
 0x12a   :  { %v88_v53 = vadd.f32 1e-06, %v83_v51  ;;  %v91_v54 = vadd.f32 1e-06, %v86_v52 }
 0x12c   :  { %409 = vrsqrt.f32 %v88_v53 }
 0x12d   :  { %411 = vrsqrt.f32 %v91_v54 }
 0x131   :  { %v404_v55 = vpop.eup %403 }
 0x132   :  { %v99_v57 = vmul.f32 %v404_v55, %v59_v17 }
 0x134   :  { %v111_v59 = vmul.f32 %v327_v56, %v99_v57 }
 0x135   :  { %v406_v60 = vpop.eup %405 }
 0x136   :  { %v408_v61 = vpop.eup %407  ;;  %v123_v62 = vadd.f32 %v328_v58, %v111_v59  ;;  %v100_v63 = vmul.f32 %v406_v60, %v60_v25 }
 0x137   :  { %v97_v0 = vmul.f32 %v408_v61, %v469_v18 }
 0x138   :  { %v349_v1 = vpack.c.bf16 %v123_v62, %v123_v62  ;;  %v112_v2 = vmul.f32 %v327_v56, %v100_v63 }
 0x139   :  { %v410_v3 = vpop.eup %409  ;;  %v109_v4 = vmul.f32 %v327_v56, %v97_v0 }
 0x13a   :  { %v412_v5 = vpop.eup %411  ;;  %150 = vst.msk [vmem:[#allocation2 + $0x8] sm:$0xf] %vm147_vm2, %v349_v1  ;;  %v124_v6 = vadd.f32 %v328_v58, %v112_v2  ;;  %v98_v7 = vmul.f32 %v410_v3, %v474_v27 }
 0x13b   :  { %v121_v8 = vadd.f32 %v328_v58, %v109_v4  ;;  %v101_v9 = vmul.f32 %v412_v5, %v61_v33 }
 0x13c   :  { %v350_v10 = vpack.c.bf16 %v124_v6, %v124_v6  ;;  %v110_v11 = vmul.f32 %v327_v56, %v98_v7 }
 0x13d   :  { %v347_v12 = vpack.c.bf16 %v121_v8, %v121_v8  ;;  %v113_v13 = vmul.f32 %v327_v56, %v101_v9 }
 0x13e   :  { %151 = vst.msk [vmem:[#allocation2 + $0xc] sm:$0xf] %vm147_vm2, %v350_v10  ;;  %v122_v14 = vadd.f32 %v328_v58, %v110_v11 }
 0x13f   :  { %148 = vst.msk [vmem:[#allocation2] sm:$0xf] %vm147_vm2, %v347_v12  ;;  %v125_v15 = vadd.f32 %v328_v58, %v113_v13 }
 0x140   :  { %v348_v16 = vpack.c.bf16 %v122_v14, %v122_v14 }
 0x141   :  { %v351_v17 = vpack.c.bf16 %v125_v15, %v125_v15 }
 0x142   :  { %149 = vst.msk [vmem:[#allocation2 + $0x4] sm:$0xf] %vm147_vm2, %v348_v16 }
 0x143   :  { %152 = vst.msk [vmem:[#allocation2 + $0x10] sm:$0xf] %vm147_vm2, %v351_v17 }
 0x145   :  { %v400_v18 = vld [vmem:[#allocation2 + $0x8] sm:$0xff]  }
 0x146   :  { %388 = vmatmul.mubr.msk.bf16.vlgmr.msra.gmra.mxu1 %vm35_vm0, %v400_v18 }
 0x147   :  { %391 = vmatprep.mubr.msk.bf16.mxu1 %vm424_vm1, %v423_v39 }
 0x149   :  { %v401_v19 = vld [vmem:[#allocation2] sm:$0xff]  }
 0x14a   :  { %384 = vmatmul.mubr.msk.bf16.vlgmr.msra.gmra.mxu0 %vm35_vm0, %v401_v19  ;;  %v402_v20 = vld [vmem:[#allocation2 + $0x10] ss:$0 sps:$4 sm:$0xff]  }
 0x14e   :  { %392 = vmatmul.mubr.msk.bf16.gmra.mxu1 %vm35_vm0, %v402_v20 }
 0x206   :  { %v238_v22 = vpop.f32.mrf.mxu1 }
 0x207   :  { %v239_v23 = vadd.f32 %v334_v21, %v238_v22 }
 0x208   :  { %v389_v24 = vpop.f32.mrf.mxu1 }
 0x209   :  { %v254_v25 = vmul.f32 %v239_v23, %v239_v23 }
 0x20a   :  { %v230_v26 = vpop.f32.mrf.mxu0  ;;  %v241_v27 = vpop.f32.mrf.mxu1 }
 0x20b   :  { %v259_v28 = vmul.f32 %v254_v25, %v239_v23  ;;  %v231_v29 = vadd.f32 %v334_v21, %v230_v26  ;;  %v242_v30 = vadd.f32 %v334_v21, %v241_v27 }
 0x20c   :  { %v385_v31 = vpop.f32.mrf.mxu0  ;;  %v390_v32 = vpop.f32.mrf.mxu1 }
 0x20d   :  { %v264_v33 = vmul.f32 0.044715, %v259_v28  ;;  %v252_v34 = vmul.f32 %v231_v29, %v231_v29  ;;  %v255_v35 = vmul.f32 %v242_v30, %v242_v30 }
 0x20e   :  { %v233_v36 = vpop.f32.mrf.mxu0  ;;  %v246_v37 = vpop.f32.mrf.mxu1 }
 0x20f   :  { %v269_v38 = vadd.f32 %v264_v33, %v239_v23  ;;  %v257_v39 = vmul.f32 %v252_v34, %v231_v29  ;;  %v260_v40 = vmul.f32 %v255_v35, %v242_v30  ;;  %v234_v41 = vadd.f32 %v334_v21, %v233_v36 }
 0x210   :  { %v247_v42 = vadd.f32 %v334_v21, %v246_v37  ;;  %v386_v43 = vpop.f32.mrf.mxu0  ;;  %v393_v44 = vpop.f32.mrf.mxu1 }
 0x211   :  { %v274_v45 = vmul.f32 0.7978846, %v269_v38  ;;  %v262_v46 = vmul.f32 0.044715, %v257_v39  ;;  %v265_v47 = vmul.f32 0.044715, %v260_v40  ;;  %v253_v48 = vmul.f32 %v234_v41, %v234_v41 }
 0x212   :  { %v256_v49 = vmul.f32 %v247_v42, %v247_v42  ;;  %v249_v50 = vpop.f32.mrf.mxu1 }
 0x213   :  { %413 = vtanh.f32 %v274_v45  ;;  %v267_v51 = vadd.f32 %v262_v46, %v231_v29  ;;  %v270_v52 = vadd.f32 %v265_v47, %v242_v30  ;;  %v258_v53 = vmul.f32 %v253_v48, %v234_v41 }
 0x214   :  { %v261_v54 = vmul.f32 %v256_v49, %v247_v42  ;;  %v394_v55 = vpop.f32.mrf.mxu1 }
 0x215   :  { %v272_v56 = vmul.f32 0.7978846, %v267_v51  ;;  %v275_v57 = vmul.f32 0.7978846, %v270_v52  ;;  %v263_v58 = vmul.f32 0.044715, %v258_v53 }
 0x216   :  { %v266_v59 = vmul.f32 0.044715, %v261_v54 }
 0x217   :  { %415 = vtanh.f32 %v272_v56  ;;  %v268_v60 = vadd.f32 %v263_v58, %v234_v41 }
 0x218   :  { %417 = vtanh.f32 %v275_v57  ;;  %v271_v61 = vadd.f32 %v266_v59, %v247_v42 }
 0x219   :  { %v273_v62 = vmul.f32 0.7978846, %v268_v60 }
 0x21a   :  { %v276_v63 = vmul.f32 0.7978846, %v271_v61 }
 0x21b   :  { %419 = vtanh.f32 %v273_v62 }
 0x21c   :  { %421 = vtanh.f32 %v276_v63 }
 0x220   :  { %v414_v0 = vpop.eup %413 }
 0x221   :  { %v284_v1 = vadd.f32 1.0, %v414_v0 }
 0x223   :  { %v289_v5 = vmul.f32 0.5, %v284_v1 }
 0x224   :  { %v416_v2 = vpop.eup %415 }
 0x225   :  { %v418_v3 = vpop.eup %417  ;;  %v282_v4 = vadd.f32 1.0, %v416_v2  ;;  %v294_v12 = vmul.f32 %v289_v5, %v239_v23 }
 0x226   :  { %v285_v6 = vadd.f32 1.0, %v418_v3 }
 0x227   :  { %v287_v10 = vmul.f32 0.5, %v282_v4 }
 0x228   :  { %v420_v7 = vpop.eup %419  ;;  %v290_v8 = vmul.f32 0.5, %v285_v6 }
 0x229   :  { %v422_v9 = vpop.eup %421  ;;  %v283_v11 = vadd.f32 1.0, %v420_v7  ;;  %v292_v18 = vmul.f32 %v287_v10, %v231_v29 }
 0x22a   :  { %v295_v13 = vmul.f32 %v290_v8, %v242_v30  ;;  %v286_v14 = vadd.f32 1.0, %v422_v9 }
 0x22b   :  { %v288_v15 = vmul.f32 0.5, %v283_v11 }
 0x22c   :  { %v373_v16 = vpack.c.bf16 %v295_v13, %v294_v12  ;;  %v291_v17 = vmul.f32 0.5, %v286_v14 }
 0x22d   :  { %v293_v19 = vmul.f32 %v288_v15, %v234_v41 }
 0x22e   :  { %376 = vst [vmem:[%s526_s5 + $0x8] sm:$0xff] %v373_v16   ;;  %v296_v20 = vmul.f32 %v291_v17, %v247_v42 }
 0x22f   :  { %v368_v21 = vpack.c.bf16 %v293_v19, %v292_v18 }
 0x230   :  { %v356_v22 = vpack.c.bf16 %v296_v20, %v296_v20 }
 0x231   :  { %369 = vst [vmem:[%s526_s5] sm:$0xff] %v368_v21  }
 0x232   :  { %322 = vst [vmem:[%s526_s5 + $0x10] sm:$0xf] %v356_v22 }

// kernel: _lambda_.37
= control target key start
LH: loop header
LB: loop body
LE: loop exit
PB: predicated region body
PF: predicated region fallthrough
CT: control target
= control target key end

     0   :  { %s2402_s12 = smov 0   ;;  %s2404_s13 = smov 0   ;;  %s2938_s0 = inlined_call_operand.vmem [shape: bf16[2,2,128,8], index: 0, kind: input, shape index: {}]   ;;  %s2939_s1 = inlined_call_operand.vmem [shape: bf16[2,2,128,8], index: 1, kind: input, shape index: {}]   ;;  %s2940_s2 = inlined_call_operand.vmem [shape: bf16[2,2,128,8], index: 2, kind: input, shape index: {}]   ;;  %s2941_s3 = inlined_call_operand.vmem [shape: bf16[2,2,128,8], index: 3, kind: output, shape index: {}]  }
   0x1   :  { %s2406_s14 = smov 0  }
   0x2 LB: > { %s25_s15 = sadd.s32 1, %s2376_s13  ;;  %p1807_p0 = scmp.ge.s32.totalorder %s2380_s14, 1  ;;  %s2380_s14 = sphi %s2406_s14, %s13_s14   ;;  %s2376_s13 = sphi %s2404_s13, %s2943_s13   ;;  %s2372_s12 = sphi %s2402_s12, %s2942_s12  }
   0x3   : > { %p27_p1 = scmp.ge.s32.totalorder %s25_s15, 2  ;;  %p195_p2 = scmp.lt.s32.totalorder %s2380_s14, 3 }
   0x5   : > { %s2945_s15 = smov (%p27_p1, %s25_s15), 0  ;;  %p196_p3 = pnand %p1807_p0, %p195_p2 }
   0x6   : > { %p250_p4 = scmp.lt.s32.totalorder (!%p196_p3), %s2372_s12, 1 }
   0x7   : > { %199 = sbr.rel (%p196_p3) target bundleno = 855 (0x357), region = 32 }
   0xc   : > { %s2947_s12 = smov (!%p250_p4, %s2372_s12), 1  ;;  %vm470_vm0 = vcmask 64512   ;;  %v841_v48 = vlaneseq  ;;  %vm1632_vm2 = vcmask 60416  }
   0xd   : > { %s2420_s16 = sshll.u32 %s2947_s12, 7 }
   0xe   : > { %s2426_s19 = scalar_lea.vmem %s2939_s1, %s2420_s16  ;;  %s2448_s22 = scalar_lea.vmem %s2938_s0, %s2420_s16  ;;  %v2514_v49 = vand.u32 127, %v841_v48 }
   0xf   : > { %v2182_v0 = vld [vmem:[%s2426_s19 + $0x38] sm:$0xff]   ;;  %v2184_v3 = vld [vmem:[%s2426_s19 + $0x30] sm:$0xff]   ;;  %v2186_v7 = vld [vmem:[%s2426_s19 + $0x28] sm:$0xff]   ;;  %s2707_s25 = scalar_lea.vmem %s2940_s2, %s2420_s16  ;;  %s2863_s28 = scalar_lea.vmem %s2941_s3, %s2420_s16 }
  0x10   : > { %v2183_v1 = vld [vmem:[%s2426_s19 + $0x78] sm:$0xff]   ;;  %2142 = vmatprep.subr.msk.bf16.mxu0 %vm470_vm0, %v2182_v0  ;;  %v517_v2 = vsel %vm470_vm0, %v2182_v0, 0  ;;  %v2185_v5 = vld [vmem:[%s2426_s19 + $0x70] sm:$0xff]   ;;  %v514_v6 = vsel %vm470_vm0, %v2184_v3, 0  ;;  %v2187_v9 = vld [vmem:[%s2426_s19 + $0x68] sm:$0xff]   ;;  %v511_v12 = vsel %vm470_vm0, %v2186_v7, 0 }
  0x11   : > { %2150 = vmatprep.subr.msk.bf16.mxu1 %vm470_vm0, %v2183_v1  ;;  %2015 = vmatpush3.bf16.xpose.msra.mxu0 %v517_v2  ;;  %v742_v4 = vsel %vm470_vm0, %v2183_v1, 0  ;;  %v739_v8 = vsel %vm470_vm0, %v2185_v5, 0  ;;  %v2188_v10 = vld [vmem:[%s2426_s19 + $0x20] sm:$0xff]   ;;  %v736_v14 = vsel %vm470_vm0, %v2187_v9, 0  ;;  %v2190_v17 = vld [vmem:[%s2426_s19 + $0x18] sm:$0xff]   ;;  %v2192_v21 = vld [vmem:[%s2426_s19 + $0x10] sm:$0xff]  }
  0x12   : > { %2047 = vmatpush3.bf16.xpose.msra.mxu1 %v742_v4  ;;  %2143 = vmatprep.subr.msk.bf16.mxu0 %vm470_vm0, %v2184_v3  ;;  %v2189_v11 = vld [vmem:[%s2426_s19 + $0x60] sm:$0xff]   ;;  %v508_v16 = vsel %vm470_vm0, %v2188_v10, 0  ;;  %v2191_v19 = vld [vmem:[%s2426_s19 + $0x58] sm:$0xff]   ;;  %v505_v20 = vsel %vm470_vm0, %v2190_v17, 0  ;;  %v2193_v23 = vld [vmem:[%s2426_s19 + $0x50] sm:$0xff]   ;;  %v502_v24 = vsel %vm470_vm0, %v2192_v21, 0 }
  0x13   : > { %2151 = vmatprep.subr.msk.bf16.mxu1 %vm470_vm0, %v2185_v5  ;;  %v2198_v13 = vld [vmem:[%s2448_s22] sm:$0xff]   ;;  %v733_v18 = vsel %vm470_vm0, %v2189_v11, 0  ;;  %v730_v22 = vsel %vm470_vm0, %v2191_v19, 0  ;;  %v2194_v25 = vld [vmem:[%s2426_s19 + $0x8] sm:$0xff]   ;;  %v727_v26 = vsel %vm470_vm0, %v2193_v23, 0  ;;  %v2202_v36 = vld [vmem:[%s2448_s22 + $0x10] sm:$0xff]  }
  0x14   : > { %v2199_v15 = vld [vmem:[%s2448_s22 + $0x40] sm:$0xff]   ;;  %2030 = vmatprep.mubr.msk.bf16.mxu0 %vm470_vm0, %v2198_v13  ;;  %v2195_v27 = vld [vmem:[%s2426_s19 + $0x48] sm:$0xff]   ;;  %v499_v28 = vsel %vm470_vm0, %v2194_v25, 0  ;;  %v2204_v37 = vld [vmem:[%s2448_s22 + $0x50] sm:$0xff]   ;;  %vm843_vm1 = vcmp.lt.s32.totalorder %v2514_v49, 17 }
  0x15   : > { %2062 = vmatprep.mubr.msk.bf16.mxu1 %vm470_vm0, %v2199_v15  ;;  %v2196_v29 = vld [vmem:[%s2426_s19] sm:$0xff]   ;;  %v724_v30 = vsel %vm470_vm0, %v2195_v27, 0  ;;  %v2200_v34 = vld [vmem:[%s2448_s22 + $0x8] sm:$0xff]   ;;  %v2203_v38 = vld [vmem:[%s2448_s22 + $0x18] sm:$0xff]  }
  0x16   : > { %v2197_v31 = vld [vmem:[%s2426_s19 + $0x40] sm:$0xff]   ;;  %v496_v32 = vsel %vm470_vm0, %v2196_v29, 0  ;;  %v2201_v35 = vld [vmem:[%s2448_s22 + $0x48] sm:$0xff]   ;;  %v2205_v39 = vld [vmem:[%s2448_s22 + $0x58] sm:$0xff]  }
  0x17   : > { %v721_v33 = vsel %vm470_vm0, %v2197_v31, 0  ;;  %v2206_v40 = vld [vmem:[%s2448_s22 + $0x20] sm:$0xff]   ;;  %v2207_v42 = vld [vmem:[%s2448_s22 + $0x28] sm:$0xff]   ;;  %v2210_v44 = vld [vmem:[%s2448_s22 + $0x30] sm:$0xff]  }
  0x18   : > { %v2208_v41 = vld [vmem:[%s2448_s22 + $0x60] sm:$0xff]   ;;  %v2209_v43 = vld [vmem:[%s2448_s22 + $0x68] sm:$0xff]   ;;  %v2212_v45 = vld [vmem:[%s2448_s22 + $0x70] sm:$0xff]  }
  0x19   : > { %2017 = vmatpush3.bf16.xpose.msra.mxu0 %v514_v6  ;;  %v2211_v46 = vld [vmem:[%s2448_s22 + $0x38] sm:$0xff]  }
  0x1a   : > { %2049 = vmatpush3.bf16.xpose.msra.mxu1 %v739_v8  ;;  %2144 = vmatprep.subr.msk.bf16.mxu0 %vm470_vm0, %v2186_v7  ;;  %v2213_v47 = vld [vmem:[%s2448_s22 + $0x78] sm:$0xff]  }
  0x1b   : > { %2152 = vmatprep.subr.msk.bf16.mxu1 %vm470_vm0, %v2187_v9 }
  0x21   : > { %2019 = vmatpush3.bf16.xpose.msra.mxu0 %v511_v12 }
  0x22   : > { %2051 = vmatpush3.bf16.xpose.msra.mxu1 %v736_v14  ;;  %2145 = vmatprep.subr.msk.bf16.mxu0 %vm470_vm0, %v2188_v10 }
  0x23   : > { %2153 = vmatprep.subr.msk.bf16.mxu1 %vm470_vm0, %v2189_v11 }
  0x29   : > { %2021 = vmatpush3.bf16.xpose.msra.mxu0 %v508_v16 }
  0x2a   : > { %2053 = vmatpush3.bf16.xpose.msra.mxu1 %v733_v18  ;;  %2146 = vmatprep.subr.msk.bf16.mxu0 %vm470_vm0, %v2190_v17 }
  0x2b   : > { %2154 = vmatprep.subr.msk.bf16.mxu1 %vm470_vm0, %v2191_v19 }
  0x31   : > { %2023 = vmatpush3.bf16.xpose.msra.mxu0 %v505_v20 }
  0x32   : > { %2055 = vmatpush3.bf16.xpose.msra.mxu1 %v730_v22  ;;  %2147 = vmatprep.subr.msk.bf16.mxu0 %vm470_vm0, %v2192_v21 }
  0x33   : > { %2155 = vmatprep.subr.msk.bf16.mxu1 %vm470_vm0, %v2193_v23 }
  0x39   : > { %2025 = vmatpush3.bf16.xpose.msra.mxu0 %v502_v24 }
  0x3a   : > { %2057 = vmatpush3.bf16.xpose.msra.mxu1 %v727_v26  ;;  %2148 = vmatprep.subr.msk.bf16.mxu0 %vm470_vm0, %v2194_v25 }
  0x3b   : > { %2156 = vmatprep.subr.msk.bf16.mxu1 %vm470_vm0, %v2195_v27 }
  0x41   : > { %2027 = vmatpush3.bf16.xpose.msra.mxu0 %v499_v28 }
  0x42   : > { %2059 = vmatpush3.bf16.xpose.msra.mxu1 %v724_v30  ;;  %2149 = vmatprep.subr.msk.bf16.mxu0 %vm470_vm0, %v2196_v29 }
  0x43   : > { %2157 = vmatprep.subr.msk.bf16.mxu1 %vm470_vm0, %v2197_v31 }
  0x49   : > { %2029 = vmatpush3.bf16.xpose.msra.mxu0 %v496_v32 }
  0x4a   : > { %2061 = vmatpush3.bf16.xpose.msra.mxu1 %v721_v33 }
  0x50   : > { %2031 = vmatmul.mubr.msk.bf16.vlgmr.msra.gmra.mxu0 %vm470_vm0, %v2200_v34 }
  0x51   : > { %2063 = vmatmul.mubr.msk.bf16.vlgmr.msra.gmra.mxu1 %vm470_vm0, %v2201_v35  ;;  %2034 = vmatprep.mubr.msk.bf16.mxu0 %vm470_vm0, %v2202_v36 }
  0x52   : > { %2066 = vmatprep.mubr.msk.bf16.mxu1 %vm470_vm0, %v2204_v37 }
  0x58   : > { %2035 = vmatmul.mubr.msk.bf16.gmra.mxu0 %vm470_vm0, %v2203_v38 }
  0x59   : > { %2067 = vmatmul.mubr.msk.bf16.gmra.mxu1 %vm470_vm0, %v2205_v39  ;;  %2038 = vmatprep.mubr.msk.bf16.mxu0 %vm470_vm0, %v2206_v40 }
  0x5a   : > { %2070 = vmatprep.mubr.msk.bf16.mxu1 %vm470_vm0, %v2208_v41 }
  0x60   : > { %2039 = vmatmul.mubr.msk.bf16.gmra.mxu0 %vm470_vm0, %v2207_v42 }
  0x61   : > { %2071 = vmatmul.mubr.msk.bf16.gmra.mxu1 %vm470_vm0, %v2209_v43  ;;  %2042 = vmatprep.mubr.msk.bf16.mxu0 %vm470_vm0, %v2210_v44 }
  0x62   : > { %2074 = vmatprep.mubr.msk.bf16.mxu1 %vm470_vm0, %v2212_v45 }
  0x68   : > { %2043 = vmatmul.mubr.msk.bf16.gmra.mxu0 %vm470_vm0, %v2211_v46 }
  0x69   : > { %2075 = vmatmul.mubr.msk.bf16.gmra.mxu1 %vm470_vm0, %v2213_v47 }
 0x110   : > { %v2032_v50 = vpop.f32.mrf.mxu0 }
 0x111   : > { %v2064_v51 = vpop.f32.mrf.mxu1  ;;  %v2519_v52 = vsel %vm843_vm1, %v2032_v50, -1e+30 }
 0x112   : > { %882 = vmax.xlane.f32.xlu0 %v2519_v52  ;;  %v553_v53 = vpop.f32.mrf.mxu0  ;;  %v2529_v57 = vsel %vm843_vm1, %v2064_v51, -1e+30 }
 0x113   : > { %v778_v54 = vpop.f32.mrf.mxu1  ;;  %v2539_v61 = vsel %vm843_vm1, %v553_v53, -1e+30 }
 0x114   : > { %v2524_v55 = vsel %vm843_vm1, %v778_v54, -1e+30  ;;  %v2033_v56 = vpop.f32.mrf.mxu0 }
 0x115   : > { %910 = vmax.xlane.f32.xlu1 %v2524_v55  ;;  %v2065_v58 = vpop.f32.mrf.mxu1  ;;  %v2534_v60 = vsel %vm843_vm1, %v2033_v56, -1e+30 }
 0x116   : > { %914 = vmax.xlane.f32.xlu0 %v2529_v57  ;;  %v556_v59 = vpop.f32.mrf.mxu0  ;;  %v2544_v0 = vsel %vm843_vm1, %v2065_v58, -1e+30 }
 0x117   : > { %v781_v63 = vpop.f32.mrf.mxu1  ;;  %v2549_v1 = vsel %vm843_vm1, %v556_v59, -1e+30 }
 0x118   : > { %v2036_v62 = vpop.f32.mrf.mxu0  ;;  %v2558_v5 = vsel %vm843_vm1, %v781_v63, -1e+30 }
 0x119   : > { %884 = vmax.xlane.f32.xlu1 %v2534_v60  ;;  %v2068_v3 = vpop.f32.mrf.mxu1  ;;  %v2554_v4 = vsel %vm843_vm1, %v2036_v62, -1e+30 }
 0x11a   : > { %878 = vmax.xlane.f32.xlu0 %v2539_v61  ;;  %v569_v2 = vpop.f32.mrf.mxu0  ;;  %v2568_v9 = vsel %vm843_vm1, %v2068_v3, -1e+30 }
 0x11b   : > { %v794_v7 = vpop.f32.mrf.mxu1  ;;  %v2579_v13 = vsel %vm843_vm1, %v569_v2, -1e+30 }
 0x11c   : > { %v2037_v6 = vpop.f32.mrf.mxu0  ;;  %v2589_v17 = vsel %vm843_vm1, %v794_v7, -1e+30 }
 0x11d   : > { %916 = vmax.xlane.f32.xlu1 %v2544_v0  ;;  %v2564_v8 = vsel %vm843_vm1, %v2037_v6, -1e+30  ;;  %v2069_v10 = vpop.f32.mrf.mxu1 }
 0x11e   : > { %880 = vmax.xlane.f32.xlu0 %v2549_v1  ;;  %v2574_v11 = vsel %vm843_vm1, %v2069_v10, -1e+30  ;;  %v572_v12 = vpop.f32.mrf.mxu0 }
 0x11f   : > { %v797_v15 = vpop.f32.mrf.mxu1  ;;  %v2584_v16 = vsel %vm843_vm1, %v572_v12, -1e+30 }
 0x120   : > { %v2040_v14 = vpop.f32.mrf.mxu0  ;;  %v2598_v21 = vsel %vm843_vm1, %v797_v15, -1e+30 }
 0x121   : > { %912 = vmax.xlane.f32.xlu1 %v2558_v5  ;;  %v2072_v19 = vpop.f32.mrf.mxu1  ;;  %v2594_v20 = vsel %vm843_vm1, %v2040_v14, -1e+30 }
 0x122   : > { %890 = vmax.xlane.f32.xlu0 %v2554_v4  ;;  %v585_v18 = vpop.f32.mrf.mxu0  ;;  %v2608_v25 = vsel %vm843_vm1, %v2072_v19, -1e+30 }
 0x123   : > { %v810_v23 = vpop.f32.mrf.mxu1  ;;  %v2619_v29 = vsel %vm843_vm1, %v585_v18, -1e+30 }
 0x124   : > { %v2041_v22 = vpop.f32.mrf.mxu0  ;;  %v2629_v33 = vsel %vm843_vm1, %v810_v23, -1e+30 }
 0x125   : > { %892 = vmax.xlane.f32.xlu1 %v2564_v8  ;;  %v2604_v24 = vsel %vm843_vm1, %v2041_v22, -1e+30  ;;  %v2073_v26 = vpop.f32.mrf.mxu1 }
 0x126   : > { %922 = vmax.xlane.f32.xlu0 %v2568_v9  ;;  %v2614_v27 = vsel %vm843_vm1, %v2073_v26, -1e+30  ;;  %v588_v28 = vpop.f32.mrf.mxu0 }
 0x127   : > { %v813_v31 = vpop.f32.mrf.mxu1  ;;  %v2624_v32 = vsel %vm843_vm1, %v588_v28, -1e+30 }
 0x128   : > { %v2044_v30 = vpop.f32.mrf.mxu0  ;;  %v2638_v37 = vsel %vm843_vm1, %v813_v31, -1e+30 }
 0x129   : > { %924 = vmax.xlane.f32.xlu1 %v2574_v11  ;;  %v2076_v35 = vpop.f32.mrf.mxu1  ;;  %v2634_v36 = vsel %vm843_vm1, %v2044_v30, -1e+30 }
 0x12a   : > { %886 = vmax.xlane.f32.xlu0 %v2579_v13  ;;  %v601_v34 = vpop.f32.mrf.mxu0  ;;  %v2669_v48 = vsel %vm843_vm1, %v2076_v35, -1e+30 }
 0x12b   : > { %v826_v39 = vpop.f32.mrf.mxu1  ;;  %v2649_v43 = vsel %vm843_vm1, %v601_v34, -1e+30 }
 0x12c   : > { %v2045_v38 = vpop.f32.mrf.mxu0  ;;  %v2654_v44 = vsel %vm843_vm1, %v826_v39, -1e+30 }
 0x12d   : > { %888 = vmax.xlane.f32.xlu1 %v2584_v16  ;;  %v2644_v40 = vsel %vm843_vm1, %v2045_v38, -1e+30  ;;  %v2077_v42 = vpop.f32.mrf.mxu1 }
 0x12e   : > { %918 = vmax.xlane.f32.xlu0 %v2589_v17  ;;  %v604_v41 = vpop.f32.mrf.mxu0  ;;  %v2674_v50 = vsel %vm843_vm1, %v2077_v42, -1e+30 }
 0x12f   : > { %v2658_v45 = vsel %vm843_vm1, %v604_v41, -1e+30  ;;  %v829_v46 = vpop.f32.mrf.mxu1 }
 0x130   : > { %v2664_v47 = vsel %vm843_vm1, %v829_v46, -1e+30 }
 0x131   : > { %920 = vmax.xlane.f32.xlu1 %v2598_v21 }
 0x132   : > { %898 = vmax.xlane.f32.xlu0 %v2594_v20 }
 0x135   : > { %900 = vmax.xlane.f32.xlu1 %v2604_v24 }
 0x136   : > { %930 = vmax.xlane.f32.xlu0 %v2608_v25 }
 0x139   : > { %932 = vmax.xlane.f32.xlu1 %v2614_v27 }
 0x13a   : > { %894 = vmax.xlane.f32.xlu0 %v2619_v29 }
 0x13d   : > { %896 = vmax.xlane.f32.xlu1 %v2624_v32 }
 0x13e   : > { %926 = vmax.xlane.f32.xlu0 %v2629_v33 }
 0x141   : > { %928 = vmax.xlane.f32.xlu1 %v2638_v37 }
 0x142   : > { %906 = vmax.xlane.f32.xlu0 %v2634_v36 }
 0x145   : > { %908 = vmax.xlane.f32.xlu1 %v2644_v40 }
 0x146   : > { %902 = vmax.xlane.f32.xlu0 %v2649_v43 }
 0x149   : > { %904 = vmax.xlane.f32.xlu1 %v2658_v45 }
 0x14a   : > { %934 = vmax.xlane.f32.xlu0 %v2654_v44 }
 0x14d   : > { %936 = vmax.xlane.f32.xlu1 %v2664_v47 }
 0x14e   : > { %938 = vmax.xlane.f32.xlu0 %v2669_v48 }
 0x151   : > { %940 = vmax.xlane.f32.xlu1 %v2674_v50 }
 0x19b   : > { %v883_v51 = vpop.xlane.xlu0 %882 }
 0x19c   : > { %v944_v53 = vsub.f32 %v2519_v52, %v883_v51 }
 0x19e   : > { %v978_v54 = vmul.f32 1.442695, %v944_v53  ;;  %v911_v56 = vpop.xlane.xlu1 %910 }
 0x19f   : > { %v915_v58 = vpop.xlane.xlu0 %914  ;;  %v958_v49 = vsub.f32 %v2524_v55, %v911_v56  ;;  %v2214_v56 = vld [vmem:[%s2707_s25 + $0x38] sm:$0xff]  }
 0x1a0   : > { %2230 = vpow2.f32 %v978_v54  ;;  %v960_v59 = vsub.f32 %v2529_v57, %v915_v58  ;;  %2078 = vmatprep.subr.bf16.mxu0 %v2214_v56 }
 0x1a1   : > { %v1006_v15 = vmul.f32 1.442695, %v958_v49  ;;  %2079 = vmatpush3.bf16.msra.mxu0 %v2214_v56  ;;  %v2215_v49 = vld [vmem:[%s2707_s25 + $0x30] sm:$0xff]   ;;  %v2224_v56 = vld [vmem:[%s2707_s25 + $0x58] sm:$0xff]  }
 0x1a2   : > { %v1010_v62 = vmul.f32 1.442695, %v960_v59  ;;  %v885_v63 = vpop.xlane.xlu1 %884  ;;  %2080 = vmatprep.subr.bf16.mxu0 %v2215_v49 }
 0x1a3   : > { %v945_v2 = vsub.f32 %v2534_v60, %v885_v63  ;;  %v879_v3 = vpop.xlane.xlu0 %878 }
 0x1a4   : > { %2232 = vpow2.f32 %v1010_v62  ;;  %v942_v6 = vsub.f32 %v2539_v61, %v879_v3 }
 0x1a5   : > { %v980_v7 = vmul.f32 1.442695, %v945_v2  ;;  %2081 = vmatpush3.bf16.msra.mxu0 %v2215_v49  ;;  %v2225_v49 = vld [vmem:[%s2707_s25 + $0x8] sm:$0xff]  }
 0x1a6   : > { %v974_v10 = vmul.f32 1.442695, %v942_v6  ;;  %v917_v12 = vpop.xlane.xlu1 %916  ;;  %v2216_v6 = vld [vmem:[%s2707_s25 + $0x78] sm:$0xff]  }
 0x1a7   : > { %2234 = vpow2.f32 %v980_v7  ;;  %v961_v52 = vsub.f32 %v2544_v0, %v917_v12  ;;  %v881_v14 = vpop.xlane.xlu0 %880  ;;  %2110 = vmatprep.subr.bf16.mxu1 %v2216_v6 }
 0x1a8   : > { %2236 = vpow2.f32 %v974_v10  ;;  %v943_v57 = vsub.f32 %v2549_v1, %v881_v14  ;;  %2111 = vmatpush3.bf16.msra.mxu1 %v2216_v6  ;;  %v2226_v6 = vld [vmem:[%s2707_s25 + $0x50] sm:$0xff]  }
 0x1a9   : > { %v1012_v18 = vmul.f32 1.442695, %v961_v52 }
 0x1aa   : > { %v913_v19 = vpop.xlane.xlu1 %912  ;;  %v976_v60 = vmul.f32 1.442695, %v943_v57  ;;  %v2217_v57 = vld [vmem:[%s2707_s25 + $0x28] sm:$0xff]  }
 0x1ab   : > { %2238 = vpow2.f32 %v1012_v18  ;;  %v959_v55 = vsub.f32 %v2558_v5, %v913_v19  ;;  %v891_v22 = vpop.xlane.xlu0 %890  ;;  %v2218_v18 = vld [vmem:[%s2707_s25 + $0x70] sm:$0xff]   ;;  %2082 = vmatprep.subr.bf16.mxu0 %v2217_v57 }
 0x1ac   : > { %2240 = vpow2.f32 %v1006_v15  ;;  %v948_v61 = vsub.f32 %v2554_v4, %v891_v22  ;;  %2112 = vmatprep.subr.bf16.mxu1 %v2218_v18  ;;  %2083 = vmatpush3.bf16.msra.mxu0 %v2217_v57  ;;  %v2227_v57 = vld [vmem:[%s2707_s25] sm:$0xff]  }
 0x1ad   : > { %v2686_v23 = vpop.eup %2230  ;;  %2242 = vpow2.f32 %v976_v60  ;;  %v1008_v0 = vmul.f32 1.442695, %v959_v55  ;;  %2113 = vmatpush3.bf16.msra.mxu1 %v2218_v18  ;;  %v2228_v18 = vld [vmem:[%s2707_s25 + $0x48] sm:$0xff]  }
 0x1ae   : > { %v986_v26 = vmul.f32 1.442695, %v948_v61  ;;  %v893_v28 = vpop.xlane.xlu1 %892  ;;  %1042 = vadd.xlane.f32.xlu0 %v2686_v23 }
 0x1af   : > { %v949_v1 = vsub.f32 %v2564_v8, %v893_v28  ;;  %v923_v30 = vpop.xlane.xlu0 %922  ;;  %v2219_v28 = vld [vmem:[%s2707_s25 + $0x20] sm:$0xff]  }
 0x1b0   : > { %2244 = vpow2.f32 %v986_v26  ;;  %v964_v31 = vsub.f32 %v2568_v9, %v923_v30  ;;  %2084 = vmatprep.subr.bf16.mxu0 %v2219_v28 }
 0x1b1   : > { %v2691_v34 = vpop.eup %2232  ;;  %2246 = vpow2.f32 %v1008_v0  ;;  %v988_v4 = vmul.f32 1.442695, %v949_v1  ;;  %v2220_v0 = vld [vmem:[%s2707_s25 + $0x68] sm:$0xff]   ;;  %2085 = vmatpush3.bf16.msra.mxu0 %v2219_v28  ;;  %v2229_v28 = vld [vmem:[%s2707_s25 + $0x40] sm:$0xff]  }
 0x1b2   : > { %v1018_v5 = vmul.f32 1.442695, %v964_v31  ;;  %v925_v35 = vpop.xlane.xlu1 %924  ;;  %1074 = vadd.xlane.f32.xlu0 %v2691_v34  ;;  %2114 = vmatprep.subr.bf16.mxu1 %v2220_v0 }
 0x1b3   : > { %v965_v38 = vsub.f32 %v2574_v11, %v925_v35  ;;  %v887_v39 = vpop.xlane.xlu0 %886  ;;  %2115 = vmatpush3.bf16.msra.mxu1 %v2220_v0 }
 0x1b4   : > { %v2695_v41 = vpop.eup %2234  ;;  %2248 = vpow2.f32 %v1018_v5  ;;  %v946_v8 = vsub.f32 %v2579_v13, %v887_v39  ;;  %v2222_v39 = vld [vmem:[%s2707_s25 + $0x60] sm:$0xff]  }
 0x1b5   : > { %v2698_v42 = vpop.eup %2236  ;;  %1044 = vadd.xlane.f32.xlu1 %v2695_v41  ;;  %2250 = vpow2.f32 %v988_v4  ;;  %v1020_v51 = vmul.f32 1.442695, %v965_v38  ;;  %v2221_v38 = vld [vmem:[%s2707_s25 + $0x18] sm:$0xff]   ;;  %2116 = vmatprep.subr.bf16.mxu1 %v2222_v39 }
 0x1b6   : > { %v982_v9 = vmul.f32 1.442695, %v946_v8  ;;  %v889_v46 = vpop.xlane.xlu1 %888  ;;  %1038 = vadd.xlane.f32.xlu0 %v2698_v42  ;;  %2086 = vmatprep.subr.bf16.mxu0 %v2221_v38 }
 0x1b7   : > { %v947_v53 = vsub.f32 %v2584_v16, %v889_v46  ;;  %v919_v54 = vpop.xlane.xlu0 %918  ;;  %2087 = vmatpush3.bf16.msra.mxu0 %v2221_v38  ;;  %2117 = vmatpush3.bf16.msra.mxu1 %v2222_v39 }
 0x1b8   : > { %v2709_v11 = vpop.eup %2238  ;;  %2252 = vpow2.f32 %v982_v9  ;;  %v962_v13 = vsub.f32 %v2589_v17, %v919_v54  ;;  %2118 = vmatprep.subr.bf16.mxu1 %v2224_v56 }
 0x1b9   : > { %v2713_v58 = vpop.eup %2240  ;;  %v984_v59 = vmul.f32 1.442695, %v947_v53  ;;  %1076 = vadd.xlane.f32.xlu1 %v2709_v11  ;;  %2254 = vpow2.f32 %v1020_v51 }
 0x1ba   : > { %v1014_v16 = vmul.f32 1.442695, %v962_v13  ;;  %v921_v62 = vpop.xlane.xlu1 %920  ;;  %1070 = vadd.xlane.f32.xlu0 %v2713_v58  ;;  %v2718_v3 = vpop.eup %2242  ;;  %v2223_v13 = vld [vmem:[%s2707_s25 + $0x10] sm:$0xff]  }
 0x1bb   : > { %v963_v63 = vsub.f32 %v2598_v21, %v921_v62  ;;  %v899_v2 = vpop.xlane.xlu0 %898  ;;  %2088 = vmatprep.subr.bf16.mxu0 %v2223_v13  ;;  %2119 = vmatpush3.bf16.msra.mxu1 %v2224_v56 }
 0x1bc   : > { %2256 = vpow2.f32 %v1014_v16  ;;  %v952_v17 = vsub.f32 %v2594_v20, %v899_v2  ;;  %2089 = vmatpush3.bf16.msra.mxu0 %v2223_v13  ;;  %2120 = vmatprep.subr.bf16.mxu1 %v2226_v6 }
 0x1bd   : > { %v2723_v7 = vpop.eup %2244  ;;  %v1016_v10 = vmul.f32 1.442695, %v963_v63  ;;  %1040 = vadd.xlane.f32.xlu1 %v2718_v3  ;;  %2258 = vpow2.f32 %v984_v59  ;;  %2090 = vmatprep.subr.bf16.mxu0 %v2225_v49 }
 0x1be   : > { %v994_v12 = vmul.f32 1.442695, %v952_v17  ;;  %v901_v52 = vpop.xlane.xlu1 %900  ;;  %1050 = vadd.xlane.f32.xlu0 %v2723_v7  ;;  %v2728_v20 = vpop.eup %2246 }
 0x1bf   : > { %v953_v21 = vsub.f32 %v2604_v24, %v901_v52  ;;  %v931_v14 = vpop.xlane.xlu0 %930  ;;  %2121 = vmatpush3.bf16.msra.mxu1 %v2226_v6 }
 0x1c0   : > { %2260 = vpow2.f32 %v994_v12  ;;  %v968_v15 = vsub.f32 %v2608_v25, %v931_v14  ;;  %2091 = vmatpush3.bf16.msra.mxu0 %v2225_v49  ;;  %2122 = vmatprep.subr.bf16.mxu1 %v2228_v18 }
 0x1c1   : > { %v2733_v19 = vpop.eup %2248  ;;  %v996_v60 = vmul.f32 1.442695, %v953_v21  ;;  %1072 = vadd.xlane.f32.xlu1 %v2728_v20  ;;  %2262 = vpow2.f32 %v1016_v10  ;;  %2092 = vmatprep.subr.bf16.mxu0 %v2227_v57 }
 0x1c2   : > { %v1026_v55 = vmul.f32 1.442695, %v968_v15  ;;  %v933_v24 = vpop.xlane.xlu1 %932  ;;  %1082 = vadd.xlane.f32.xlu0 %v2733_v19  ;;  %v2738_v25 = vpop.eup %2250 }
 0x1c3   : > { %v969_v22 = vsub.f32 %v2614_v27, %v933_v24  ;;  %v895_v61 = vpop.xlane.xlu0 %894  ;;  %2123 = vmatpush3.bf16.msra.mxu1 %v2228_v18 }
 0x1c4   : > { %2264 = vpow2.f32 %v1026_v55  ;;  %v950_v26 = vsub.f32 %v2619_v29, %v895_v61  ;;  %2093 = vmatpush3.bf16.msra.mxu0 %v2227_v57  ;;  %2124 = vmatprep.subr.bf16.mxu1 %v2229_v28 }
 0x1c5   : > { %v2743_v1 = vpop.eup %2252  ;;  %1052 = vadd.xlane.f32.xlu1 %v2738_v25  ;;  %2266 = vpow2.f32 %v996_v60  ;;  %v1028_v27 = vmul.f32 1.442695, %v969_v22 }
 0x1c6   : > { %v990_v30 = vmul.f32 1.442695, %v950_v26  ;;  %v897_v31 = vpop.xlane.xlu1 %896  ;;  %1046 = vadd.xlane.f32.xlu0 %v2743_v1  ;;  %v2748_v29 = vpop.eup %2254 }
 0x1c7   : > { %v951_v5 = vsub.f32 %v2624_v32, %v897_v31  ;;  %v927_v35 = vpop.xlane.xlu0 %926  ;;  %2125 = vmatpush3.bf16.msra.mxu1 %v2229_v28 }
 0x1c8   : > { %2268 = vpow2.f32 %v990_v30  ;;  %v966_v4 = vsub.f32 %v2629_v33, %v927_v35 }
 0x1c9   : > { %v2753_v8 = vpop.eup %2256  ;;  %1084 = vadd.xlane.f32.xlu1 %v2748_v29  ;;  %2270 = vpow2.f32 %v1028_v27  ;;  %v992_v32 = vmul.f32 1.442695, %v951_v5 }
 0x1ca   : > { %v1022_v9 = vmul.f32 1.442695, %v966_v4  ;;  %v929_v46 = vpop.xlane.xlu1 %928  ;;  %1078 = vadd.xlane.f32.xlu0 %v2753_v8  ;;  %v2758_v33 = vpop.eup %2258 }
 0x1cb   : > { %v967_v51 = vsub.f32 %v2638_v37, %v929_v46  ;;  %v907_v53 = vpop.xlane.xlu0 %906 }
 0x1cc   : > { %2272 = vpow2.f32 %v1022_v9  ;;  %v956_v54 = vsub.f32 %v2634_v36, %v907_v53 }
 0x1cd   : > { %v2763_v59 = vpop.eup %2260  ;;  %1048 = vadd.xlane.f32.xlu1 %v2758_v33  ;;  %2274 = vpow2.f32 %v992_v32  ;;  %v1024_v37 = vmul.f32 1.442695, %v967_v51 }
 0x1ce   : > { %v1002_v16 = vmul.f32 1.442695, %v956_v54  ;;  %v909_v62 = vpop.xlane.xlu1 %908  ;;  %1058 = vadd.xlane.f32.xlu0 %v2763_v59  ;;  %v2768_v36 = vpop.eup %2262 }
 0x1cf   : > { %v957_v63 = vsub.f32 %v2644_v40, %v909_v62  ;;  %v903_v2 = vpop.xlane.xlu0 %902 }
 0x1d0   : > { %2276 = vpow2.f32 %v1002_v16  ;;  %v954_v17 = vsub.f32 %v2649_v43, %v903_v2 }
 0x1d1   : > { %v2773_v10 = vpop.eup %2264  ;;  %1080 = vadd.xlane.f32.xlu1 %v2768_v36  ;;  %2278 = vpow2.f32 %v1024_v37  ;;  %v1004_v40 = vmul.f32 1.442695, %v957_v63 }
 0x1d2   : > { %v998_v12 = vmul.f32 1.442695, %v954_v17  ;;  %v905_v52 = vpop.xlane.xlu1 %904  ;;  %1090 = vadd.xlane.f32.xlu0 %v2773_v10  ;;  %v2778_v43 = vpop.eup %2266 }
 0x1d3   : > { %v955_v21 = vsub.f32 %v2658_v45, %v905_v52  ;;  %v935_v14 = vpop.xlane.xlu0 %934 }
 0x1d4   : > { %2280 = vpow2.f32 %v998_v12  ;;  %v970_v15 = vsub.f32 %v2654_v44, %v935_v14 }
 0x1d5   : > { %v2783_v60 = vpop.eup %2268  ;;  %1060 = vadd.xlane.f32.xlu1 %v2778_v43  ;;  %2282 = vpow2.f32 %v1004_v40  ;;  %v1000_v45 = vmul.f32 1.442695, %v955_v21 }
 0x1d6   : > { %v1030_v55 = vmul.f32 1.442695, %v970_v15  ;;  %v937_v24 = vpop.xlane.xlu1 %936  ;;  %1054 = vadd.xlane.f32.xlu0 %v2783_v60  ;;  %v2788_v44 = vpop.eup %2270 }
 0x1d7   : > { %v971_v22 = vsub.f32 %v2664_v47, %v937_v24  ;;  %v939_v61 = vpop.xlane.xlu0 %938 }
 0x1d8   : > { %2284 = vpow2.f32 %v1030_v55  ;;  %v972_v26 = vsub.f32 %v2669_v48, %v939_v61 }
 0x1d9   : > { %v2792_v0 = vpop.eup %2272  ;;  %1092 = vadd.xlane.f32.xlu1 %v2788_v44  ;;  %2286 = vpow2.f32 %v1000_v45  ;;  %v1032_v47 = vmul.f32 1.442695, %v971_v22 }
 0x1da   : > { %v1034_v30 = vmul.f32 1.442695, %v972_v26  ;;  %v941_v31 = vpop.xlane.xlu1 %940  ;;  %1086 = vadd.xlane.f32.xlu0 %v2792_v0  ;;  %v2797_v5 = vpop.eup %2274 }
 0x1db   : > { %v973_v27 = vsub.f32 %v2674_v50, %v941_v31 }
 0x1dc   : > { %2288 = vpow2.f32 %v1034_v30 }
 0x1dd   : > { %v2799_v48 = vpop.eup %2276  ;;  %1056 = vadd.xlane.f32.xlu1 %v2797_v5  ;;  %2290 = vpow2.f32 %v1032_v47  ;;  %v1036_v35 = vmul.f32 1.442695, %v973_v27 }
 0x1de   : > { %1066 = vadd.xlane.f32.xlu0 %v2799_v48  ;;  %v2803_v4 = vpop.eup %2278 }
 0x1df   : > { %2292 = vpow2.f32 %v1036_v35 }
 0x1e1   : > { %v2805_v38 = vpop.eup %2280  ;;  %1088 = vadd.xlane.f32.xlu1 %v2803_v4 }
 0x1e2   : > { %1062 = vadd.xlane.f32.xlu0 %v2805_v38  ;;  %v2809_v50 = vpop.eup %2282 }
 0x1e5   : > { %v2811_v39 = vpop.eup %2284  ;;  %1068 = vadd.xlane.f32.xlu1 %v2809_v50 }
 0x1e6   : > { %1094 = vadd.xlane.f32.xlu0 %v2811_v39  ;;  %v2815_v9 = vpop.eup %2286 }
 0x1e9   : > { %v2817_v46 = vpop.eup %2288  ;;  %1064 = vadd.xlane.f32.xlu1 %v2815_v9 }
 0x1ea   : > { %1098 = vadd.xlane.f32.xlu0 %v2817_v46  ;;  %v2821_v32 = vpop.eup %2290 }
 0x1ec   : > { %v2824_v51 = vpop.eup %2292 }
 0x1ed   : > { %1096 = vadd.xlane.f32.xlu1 %v2821_v32 }
 0x1f1   : > { %1100 = vadd.xlane.f32.xlu1 %v2824_v51 }
 0x237   : > { %v1043_v53 = vpop.xlane.xlu0 %1042 }
 0x23b   : > { %v1075_v54 = vpop.xlane.xlu0 %1074 }
 0x23e   : > { %v1045_v13 = vpop.xlane.xlu1 %1044 }
 0x23f   : > { %v1039_v56 = vpop.xlane.xlu0 %1038  ;;  %2294 = vrcp.f32 %v1045_v13 }
 0x240   : > { %2296 = vrcp.f32 %v1039_v56 }
 0x241   : > { %2298 = vrcp.f32 %v1043_v53 }
 0x242   : > { %v1077_v16 = vpop.xlane.xlu1 %1076 }
 0x243   : > { %v1071_v62 = vpop.xlane.xlu0 %1070 }
 0x246   : > { %v1041_v37 = vpop.xlane.xlu1 %1040 }
 0x247   : > { %2300 = vrcp.f32 %v1041_v37  ;;  %v1051_v63 = vpop.xlane.xlu0 %1050 }
 0x248   : > { %2302 = vrcp.f32 %v1077_v16 }
 0x249   : > { %2304 = vrcp.f32 %v1071_v62 }
 0x24a   : > { %2306 = vrcp.f32 %v1075_v54  ;;  %v1073_v2 = vpop.xlane.xlu1 %1072 }
 0x24b   : > { %2308 = vrcp.f32 %v1073_v2  ;;  %v1083_v17 = vpop.xlane.xlu0 %1082 }
 0x24c   : > { %v2295_v12 = vpop.eup %2294 }
 0x24d   : > { %v2297_v52 = vpop.eup %2296  ;;  %v1169_v57 = vmul.f32 %v2295_v12, %v2695_v41 }
 0x24e   : > { %v1053_v49 = vpop.xlane.xlu1 %1052  ;;  %v2299_v21 = vpop.eup %2298  ;;  %v1166_v55 = vmul.f32 %v2297_v52, %v2698_v42 }
 0x24f   : > { %v1047_v6 = vpop.xlane.xlu0 %1046  ;;  %2310 = vrcp.f32 %v1053_v49  ;;  %v1168_v61 = vmul.f32 %v2299_v21, %v2686_v23 }
 0x250   : > { %2312 = vrcp.f32 %v1047_v6 }
 0x251   : > { %2314 = vrcp.f32 %v1051_v63  ;;  %v1199_v47 = vpack.c.bf16 %v1169_v57, %v1168_v61 }
 0x252   : > { %v1085_v40 = vpop.xlane.xlu1 %1084 }
 0x253   : > { %v1079_v14 = vpop.xlane.xlu0 %1078 }
 0x254   : > { %v2301_v15 = vpop.eup %2300 }
 0x255   : > { %v2303_v18 = vpop.eup %2302  ;;  %v1167_v24 = vmul.f32 %v2301_v15, %v2718_v3 }
 0x256   : > { %v2305_v45 = vpop.eup %2304  ;;  %v1049_v22 = vpop.xlane.xlu1 %1048  ;;  %v1185_v41 = vmul.f32 %v2303_v18, %v2709_v11 }
 0x257   : > { %v2307_v26 = vpop.eup %2306  ;;  %2316 = vrcp.f32 %v1049_v22  ;;  %v1059_v28 = vpop.xlane.xlu0 %1058  ;;  %v1198_v30 = vpack.c.bf16 %v1167_v24, %v1166_v55  ;;  %v1182_v42 = vmul.f32 %v2305_v45, %v2713_v58 }
 0x258   : > { %v2309_v31 = vpop.eup %2308  ;;  %2318 = vrcp.f32 %v1085_v40  ;;  %v1184_v23 = vmul.f32 %v2307_v26, %v2691_v34 }
 0x259   : > { %2320 = vrcp.f32 %v1079_v14  ;;  %2094 = vmatprep.mubr.bf16.mxu0 %v1198_v30  ;;  %v1183_v3 = vmul.f32 %v2309_v31, %v2728_v20 }
 0x25a   : > { %2322 = vrcp.f32 %v1083_v17  ;;  %2095 = vmatmul.mubr.bf16.vlgmr.msra.gmra.mxu0 %v1199_v47  ;;  %v1081_v27 = vpop.xlane.xlu1 %1080  ;;  %v1207_v54 = vpack.c.bf16 %v1185_v41, %v1184_v23 }
 0x25b   : > { %2324 = vrcp.f32 %v1081_v27  ;;  %v1091_v35 = vpop.xlane.xlu0 %1090  ;;  %v1206_v53 = vpack.c.bf16 %v1183_v3, %v1182_v42 }
 0x25c   : > { %v2311_v11 = vpop.eup %2310 }
 0x25d   : > { %2126 = vmatprep.mubr.bf16.mxu1 %v1206_v53  ;;  %v2313_v16 = vpop.eup %2312  ;;  %v1173_v20 = vmul.f32 %v2311_v11, %v2738_v25 }
 0x25e   : > { %2127 = vmatmul.mubr.bf16.vlgmr.msra.gmra.mxu1 %v1207_v54  ;;  %v1061_v13 = vpop.xlane.xlu1 %1060  ;;  %v2315_v37 = vpop.eup %2314  ;;  %v1170_v34 = vmul.f32 %v2313_v16, %v2743_v1 }
 0x25f   : > { %v1055_v56 = vpop.xlane.xlu0 %1054  ;;  %2326 = vrcp.f32 %v1061_v13  ;;  %v1172_v12 = vmul.f32 %v2315_v37, %v2723_v7 }
 0x260   : > { %2328 = vrcp.f32 %v1055_v56 }
 0x261   : > { %2330 = vrcp.f32 %v1059_v28  ;;  %v1201_v15 = vpack.c.bf16 %v1173_v20, %v1172_v12 }
 0x262   : > { %v1093_v62 = vpop.xlane.xlu1 %1092 }
 0x263   : > { %v1087_v58 = vpop.xlane.xlu0 %1086 }
 0x264   : > { %v2317_v63 = vpop.eup %2316 }
 0x265   : > { %v2319_v2 = vpop.eup %2318  ;;  %v1171_v17 = vmul.f32 %v2317_v63, %v2758_v33 }
 0x266   : > { %v2321_v49 = vpop.eup %2320  ;;  %v1057_v6 = vpop.xlane.xlu1 %1056  ;;  %v1189_v25 = vmul.f32 %v2319_v2, %v2748_v29 }
 0x267   : > { %v2323_v52 = vpop.eup %2322  ;;  %2332 = vrcp.f32 %v1057_v6  ;;  %v1067_v40 = vpop.xlane.xlu0 %1066  ;;  %v1200_v21 = vpack.c.bf16 %v1171_v17, %v1170_v34  ;;  %v1186_v1 = vmul.f32 %v2321_v49, %v2753_v8 }
 0x268   : > { %v2325_v14 = vpop.eup %2324  ;;  %2334 = vrcp.f32 %v1093_v62  ;;  %v1188_v7 = vmul.f32 %v2323_v52, %v2733_v19 }
 0x269   : > { %2336 = vrcp.f32 %v1087_v58  ;;  %2098 = vmatprep.mubr.bf16.mxu0 %v1200_v21  ;;  %v1187_v33 = vmul.f32 %v2325_v14, %v2768_v36 }
 0x26a   : > { %2338 = vrcp.f32 %v1091_v35  ;;  %2099 = vmatmul.mubr.bf16.gmra.mxu0 %v1201_v15  ;;  %v1089_v57 = vpop.xlane.xlu1 %1088  ;;  %v1209_v24 = vpack.c.bf16 %v1189_v25, %v1188_v7 }
 0x26b   : > { %2340 = vrcp.f32 %v1089_v57  ;;  %v1063_v18 = vpop.xlane.xlu0 %1062  ;;  %v1208_v55 = vpack.c.bf16 %v1187_v33, %v1186_v1 }
 0x26c   : > { %v2327_v22 = vpop.eup %2326 }
 0x26d   : > { %2130 = vmatprep.mubr.bf16.mxu1 %v1208_v55  ;;  %v2329_v61 = vpop.eup %2328  ;;  %v1177_v28 = vmul.f32 %v2327_v22, %v2778_v43 }
 0x26e   : > { %2131 = vmatmul.mubr.bf16.gmra.mxu1 %v1209_v24  ;;  %v1069_v45 = vpop.xlane.xlu1 %1068  ;;  %v2331_v36 = vpop.eup %2330  ;;  %v1174_v30 = vmul.f32 %v2329_v61, %v2783_v60 }
 0x26f   : > { %2342 = vrcp.f32 %v1069_v45  ;;  %v1095_v29 = vpop.xlane.xlu0 %1094  ;;  %v1176_v3 = vmul.f32 %v2331_v36, %v2763_v59 }
 0x270   : > { %2344 = vrcp.f32 %v1063_v18 }
 0x271   : > { %2346 = vrcp.f32 %v1067_v40  ;;  %v1203_v53 = vpack.c.bf16 %v1177_v28, %v1176_v3 }
 0x272   : > { %v1065_v8 = vpop.xlane.xlu1 %1064 }
 0x273   : > { %2348 = vrcp.f32 %v1065_v8  ;;  %v1099_v41 = vpop.xlane.xlu0 %1098 }
 0x274   : > { %v2333_v26 = vpop.eup %2332  ;;  %2350 = vrcp.f32 %v1095_v29 }
 0x275   : > { %v2335_v19 = vpop.eup %2334  ;;  %v1175_v31 = vmul.f32 %v2333_v26, %v2797_v5 }
 0x276   : > { %v2337_v47 = vpop.eup %2336  ;;  %v1097_v42 = vpop.xlane.xlu1 %1096  ;;  %v1193_v54 = vmul.f32 %v2335_v19, %v2788_v44 }
 0x277   : > { %v2339_v27 = vpop.eup %2338  ;;  %2352 = vrcp.f32 %v1097_v42  ;;  %v1202_v23 = vpack.c.bf16 %v1175_v31, %v1174_v30  ;;  %v1190_v43 = vmul.f32 %v2337_v47, %v2792_v0 }
 0x278   : > { %v2341_v35 = vpop.eup %2340  ;;  %2354 = vrcp.f32 %v1099_v41  ;;  %v1192_v13 = vmul.f32 %v2339_v27, %v2773_v10 }
 0x279   : > { %2102 = vmatprep.mubr.bf16.mxu0 %v1202_v23  ;;  %v1191_v60 = vmul.f32 %v2341_v35, %v2803_v4 }
 0x27a   : > { %2103 = vmatmul.mubr.bf16.gmra.mxu0 %v1203_v53  ;;  %v1101_v5 = vpop.xlane.xlu1 %1100  ;;  %v1211_v59 = vpack.c.bf16 %v1193_v54, %v1192_v13 }
 0x27b   : > { %2356 = vrcp.f32 %v1101_v5  ;;  %v1210_v56 = vpack.c.bf16 %v1191_v60, %v1190_v43 }
 0x27c   : > { %v2343_v11 = vpop.eup %2342 }
 0x27d   : > { %2134 = vmatprep.mubr.bf16.mxu1 %v1210_v56  ;;  %v2345_v16 = vpop.eup %2344  ;;  %v1181_v44 = vmul.f32 %v2343_v11, %v2809_v50 }
 0x27e   : > { %2135 = vmatmul.mubr.bf16.gmra.mxu1 %v1211_v59  ;;  %v2347_v62 = vpop.eup %2346  ;;  %v1178_v58 = vmul.f32 %v2345_v16, %v2805_v38 }
 0x27f   : > { %v1180_v63 = vmul.f32 %v2347_v62, %v2799_v48 }
 0x280   : > { %v2349_v37 = vpop.eup %2348 }
 0x281   : > { %v1179_v0 = vmul.f32 %v2349_v37, %v2815_v9  ;;  %v2351_v4 = vpop.eup %2350  ;;  %v1205_v2 = vpack.c.bf16 %v1181_v44, %v1180_v63 }
 0x282   : > { %v1194_v34 = vmul.f32 %v2351_v4, %v2811_v39 }
 0x283   : > { %v1204_v10 = vpack.c.bf16 %v1179_v0, %v1178_v58 }
 0x284   : > { %v2353_v20 = vpop.eup %2352 }
 0x285   : > { %2106 = vmatprep.mubr.bf16.mxu0 %v1204_v10  ;;  %v1195_v17 = vmul.f32 %v2353_v20, %v2821_v32  ;;  %v2355_v49 = vpop.eup %2354 }
 0x286   : > { %2107 = vmatmul.mubr.bf16.gmra.mxu0 %v1205_v2  ;;  %v1196_v38 = vmul.f32 %v2355_v49, %v2817_v46 }
 0x287   : > { %v1212_v6 = vpack.c.bf16 %v1195_v17, %v1194_v34 }
 0x288   : > { %v2357_v50 = vpop.eup %2356 }
 0x289   : > { %2138 = vmatprep.mubr.bf16.mxu1 %v1212_v6  ;;  %v1197_v9 = vmul.f32 %v2357_v50, %v2824_v51 }
 0x28b   : > { %v1213_v12 = vpack.c.bf16 %v1197_v9, %v1196_v38 }
 0x28d   : > { %2139 = vmatmul.mubr.bf16.gmra.mxu1 %v1213_v12 }
 0x31a   : > { %v2096_v48 = vpop.f32.mrf.mxu0 }
 0x31b   : > { %v1920_v39 = vpack.c.bf16 %v2096_v48, %v2096_v48 }
 0x31c   : > { %v1296_v32 = vpop.f32.mrf.mxu0 }
 0x31d   : > { %1635 = vst.msk [vmem:[%s2863_s28 + $0x8] sm:$0xf] %vm1632_vm2, %v1920_v39  ;;  %v1918_v46 = vpack.c.bf16 %v1296_v32, %v1296_v32 }
 0x31e   : > { %v2097_v51 = vpop.f32.mrf.mxu0  ;;  %v2128_v52 = vpop.f32.mrf.mxu1 }
 0x31f   : > { %1633 = vst.msk [vmem:[%s2863_s28] sm:$0xf] %vm1632_vm2, %v1918_v46  ;;  %v1921_v40 = vpack.c.bf16 %v2097_v51, %v2097_v51  ;;  %v1936_v21 = vpack.c.bf16 %v2128_v52, %v2128_v52 }
 0x320   : > { %v1299_v14 = vpop.f32.mrf.mxu0  ;;  %v1441_v15 = vpop.f32.mrf.mxu1 }
 0x321   : > { %1636 = vst.msk [vmem:[%s2863_s28 + $0xc] sm:$0xf] %vm1632_vm2, %v1921_v40  ;;  %1651 = vst.msk [vmem:[%s2863_s28 + $0x48] sm:$0xf] %vm1632_vm2, %v1936_v21  ;;  %v1919_v25 = vpack.c.bf16 %v1299_v14, %v1299_v14  ;;  %v1934_v1 = vpack.c.bf16 %v1441_v15, %v1441_v15 }
 0x322   : > { %v2129_v33 = vpop.f32.mrf.mxu1 }
 0x323   : > { %1634 = vst.msk [vmem:[%s2863_s28 + $0x4] sm:$0xf] %vm1632_vm2, %v1919_v25  ;;  %1649 = vst.msk [vmem:[%s2863_s28 + $0x40] sm:$0xf] %vm1632_vm2, %v1934_v1  ;;  %v1937_v57 = vpack.c.bf16 %v2129_v33, %v2129_v33 }
 0x324   : > { %v1444_v7 = vpop.f32.mrf.mxu1 }
 0x325   : > { %1652 = vst.msk [vmem:[%s2863_s28 + $0x4c] sm:$0xf] %vm1632_vm2, %v1937_v57  ;;  %v1935_v18 = vpack.c.bf16 %v1444_v7, %v1444_v7 }
 0x327   : > { %1650 = vst.msk [vmem:[%s2863_s28 + $0x44] sm:$0xf] %vm1632_vm2, %v1935_v18 }
 0x32a   : > { %v2100_v55 = vpop.f32.mrf.mxu0 }
 0x32b   : > { %v1924_v24 = vpack.c.bf16 %v2100_v55, %v2100_v55 }
 0x32c   : > { %v1312_v45 = vpop.f32.mrf.mxu0 }
 0x32d   : > { %1639 = vst.msk [vmem:[%s2863_s28 + $0x18] sm:$0xf] %vm1632_vm2, %v1924_v24  ;;  %v1922_v29 = vpack.c.bf16 %v1312_v45, %v1312_v45 }
 0x32e   : > { %v2101_v22 = vpop.f32.mrf.mxu0  ;;  %v2132_v61 = vpop.f32.mrf.mxu1 }
 0x32f   : > { %1637 = vst.msk [vmem:[%s2863_s28 + $0x10] sm:$0xf] %vm1632_vm2, %v1922_v29  ;;  %v1925_v8 = vpack.c.bf16 %v2101_v22, %v2101_v22  ;;  %v1940_v36 = vpack.c.bf16 %v2132_v61, %v2132_v61 }
 0x330   : > { %v1315_v26 = vpop.f32.mrf.mxu0  ;;  %v1457_v28 = vpop.f32.mrf.mxu1 }
 0x331   : > { %1640 = vst.msk [vmem:[%s2863_s28 + $0x1c] sm:$0xf] %vm1632_vm2, %v1925_v8  ;;  %1655 = vst.msk [vmem:[%s2863_s28 + $0x58] sm:$0xf] %vm1632_vm2, %v1940_v36  ;;  %v1923_v19 = vpack.c.bf16 %v1315_v26, %v1315_v26  ;;  %v1938_v30 = vpack.c.bf16 %v1457_v28, %v1457_v28 }
 0x332   : > { %v2133_v31 = vpop.f32.mrf.mxu1 }
 0x333   : > { %1638 = vst.msk [vmem:[%s2863_s28 + $0x14] sm:$0xf] %vm1632_vm2, %v1923_v19  ;;  %1653 = vst.msk [vmem:[%s2863_s28 + $0x50] sm:$0xf] %vm1632_vm2, %v1938_v30  ;;  %v1941_v47 = vpack.c.bf16 %v2133_v31, %v2133_v31 }
 0x334   : > { %v1460_v41 = vpop.f32.mrf.mxu1 }
 0x335   : > { %1656 = vst.msk [vmem:[%s2863_s28 + $0x5c] sm:$0xf] %vm1632_vm2, %v1941_v47  ;;  %v1939_v42 = vpack.c.bf16 %v1460_v41, %v1460_v41 }
 0x337   : > { %1654 = vst.msk [vmem:[%s2863_s28 + $0x54] sm:$0xf] %vm1632_vm2, %v1939_v42 }
 0x33a   : > { %v2104_v3 = vpop.f32.mrf.mxu0 }
 0x33b   : > { %v1928_v27 = vpack.c.bf16 %v2104_v3, %v2104_v3 }
 0x33c   : > { %v1328_v23 = vpop.f32.mrf.mxu0 }
 0x33d   : > { %1643 = vst.msk [vmem:[%s2863_s28 + $0x28] sm:$0xf] %vm1632_vm2, %v1928_v27  ;;  %v1926_v35 = vpack.c.bf16 %v1328_v23, %v1328_v23 }
 0x33e   : > { %v2105_v53 = vpop.f32.mrf.mxu0  ;;  %v2136_v54 = vpop.f32.mrf.mxu1 }
 0x33f   : > { %1641 = vst.msk [vmem:[%s2863_s28 + $0x20] sm:$0xf] %vm1632_vm2, %v1926_v35  ;;  %v1929_v43 = vpack.c.bf16 %v2105_v53, %v2105_v53  ;;  %v1944_v60 = vpack.c.bf16 %v2136_v54, %v2136_v54 }
 0x340   : > { %v1331_v5 = vpop.f32.mrf.mxu0  ;;  %v1473_v13 = vpop.f32.mrf.mxu1 }
 0x341   : > { %1644 = vst.msk [vmem:[%s2863_s28 + $0x2c] sm:$0xf] %vm1632_vm2, %v1929_v43  ;;  %1659 = vst.msk [vmem:[%s2863_s28 + $0x68] sm:$0xf] %vm1632_vm2, %v1944_v60  ;;  %v1927_v56 = vpack.c.bf16 %v1331_v5, %v1331_v5  ;;  %v1942_v59 = vpack.c.bf16 %v1473_v13, %v1473_v13 }
 0x342   : > { %v2137_v11 = vpop.f32.mrf.mxu1 }
 0x343   : > { %1642 = vst.msk [vmem:[%s2863_s28 + $0x24] sm:$0xf] %vm1632_vm2, %v1927_v56  ;;  %1657 = vst.msk [vmem:[%s2863_s28 + $0x60] sm:$0xf] %vm1632_vm2, %v1942_v59  ;;  %v1945_v16 = vpack.c.bf16 %v2137_v11, %v2137_v11 }
 0x344   : > { %v1476_v62 = vpop.f32.mrf.mxu1 }
 0x345   : > { %1660 = vst.msk [vmem:[%s2863_s28 + $0x6c] sm:$0xf] %vm1632_vm2, %v1945_v16  ;;  %v1943_v37 = vpack.c.bf16 %v1476_v62, %v1476_v62 }
 0x346   : > { %v2108_v44 = vpop.f32.mrf.mxu0 }
 0x347   : > { %1658 = vst.msk [vmem:[%s2863_s28 + $0x64] sm:$0xf] %vm1632_vm2, %v1943_v37  ;;  %v1932_v58 = vpack.c.bf16 %v2108_v44, %v2108_v44 }
 0x348   : > { %v1344_v0 = vpop.f32.mrf.mxu0 }
 0x349   : > { %1647 = vst.msk [vmem:[%s2863_s28 + $0x38] sm:$0xf] %vm1632_vm2, %v1932_v58  ;;  %v1930_v4 = vpack.c.bf16 %v1344_v0, %v1344_v0 }
 0x34a   : > { %v2109_v63 = vpop.f32.mrf.mxu0 }
 0x34b   : > { %1645 = vst.msk [vmem:[%s2863_s28 + $0x30] sm:$0xf] %vm1632_vm2, %v1930_v4  ;;  %v1933_v10 = vpack.c.bf16 %v2109_v63, %v2109_v63 }
 0x34c   : > { %v1347_v20 = vpop.f32.mrf.mxu0 }
 0x34d   : > { %1648 = vst.msk [vmem:[%s2863_s28 + $0x3c] sm:$0xf] %vm1632_vm2, %v1933_v10  ;;  %v1931_v2 = vpack.c.bf16 %v1347_v20, %v1347_v20  ;;  %v2140_v34 = vpop.f32.mrf.mxu1 }
 0x34e   : > { %v1948_v17 = vpack.c.bf16 %v2140_v34, %v2140_v34 }
 0x34f   : > { %1646 = vst.msk [vmem:[%s2863_s28 + $0x34] sm:$0xf] %vm1632_vm2, %v1931_v2  ;;  %v1489_v49 = vpop.f32.mrf.mxu1 }
 0x350   : > { %1663 = vst.msk [vmem:[%s2863_s28 + $0x78] sm:$0xf] %vm1632_vm2, %v1948_v17  ;;  %v1946_v6 = vpack.c.bf16 %v1489_v49, %v1489_v49 }
 0x351   : > { %v2141_v50 = vpop.f32.mrf.mxu1 }
 0x352   : > { %1661 = vst.msk [vmem:[%s2863_s28 + $0x70] sm:$0xf] %vm1632_vm2, %v1946_v6  ;;  %v1949_v38 = vpack.c.bf16 %v2141_v50, %v2141_v50 }
 0x353   : > { %v1492_v9 = vpop.f32.mrf.mxu1 }
 0x354   : > { %1664 = vst.msk [vmem:[%s2863_s28 + $0x7c] sm:$0xf] %vm1632_vm2, %v1949_v38  ;;  %v1947_v12 = vpack.c.bf16 %v1492_v9, %v1492_v9 }
 0x356   : > { %1662 = vst.msk [vmem:[%s2863_s28 + $0x74] sm:$0xf] %vm1632_vm2, %v1947_v12 }
 0x357 PF: > { %s13_s14 = sadd.s32 1, %s2380_s14   ;;  %s2942_s12 = smov %s2376_s13 }
 0x358   : > { %p10_p5 = scmp.ge.s32.totalorder %s13_s14, 4   ;;  %s2943_s13 = smov %s2945_s15 }
 0x35a   :  { %12 = sbr.rel (!%p10_p5) target bundleno = 2 (0x2), region = 68 }

</bundles_post_ra>
